<compile_context>
chip_gen: v7x
topology: tpu7x:2x2x1
jax: 0.10.0
libtpu: 0.0.40
codegen_flags: <defaults>
</compile_context>

<pallas_src>
import functools
import math

import jax
import jax.numpy as jnp
from jax import lax
from jax.experimental import pallas as pl
from jax.experimental.pallas import tpu as pltpu


def _round_up(x, m):
    return (x + m - 1) // m * m


def _detect_big_vmem():
    try:
        info = pltpu.get_tpu_info()
        vmem = getattr(info, "vmem_capacity_bytes", None)
        if vmem is None:
            vmem = getattr(info, "vmem_bytes", 64 * 1024 * 1024)
        return int(vmem) >= 100 * 1024 * 1024
    except Exception:
        return False            # conservative (v7x-safe) defaults


_BIG_VMEM = _detect_big_vmem()
_VMEM_LIMIT = (96 if _BIG_VMEM else 40) * 1024 * 1024
_TILE_BYTES = (8 << 20) if _BIG_VMEM else (4 << 20)


# ----------------------------------------------------------------------------
# Shared activation epilogue.
# ----------------------------------------------------------------------------
def _apply_act(y, act):
    if act == "gelu":            # tanh approximation
        return 0.5 * y * (1.0 + jnp.tanh(0.7978845608028654 *
                                         (y + 0.044715 * y * y * y)))
    if act == "tanh":
        return jnp.tanh(y)
    if act == "leaky":
        return jnp.where(y >= 0, y, 0.2 * y)
    return y


# ----------------------------------------------------------------------------
# Pallas kernel 1: tiled MXU matmul, bf16 operands, f32 accum, fused bias + act.
#   - single-K-step variant (no scratch, no pl.when) used whenever tk == K.
# ----------------------------------------------------------------------------
def _mm_kernel_single(a_ref, b_ref, bias_ref, o_ref, *, act):
    y = jnp.dot(a_ref[...], b_ref[...],
                preferred_element_type=jnp.float32) + bias_ref[...]
    o_ref[...] = _apply_act(y, act).astype(o_ref.dtype)


def _mm_kernel_acc(a_ref, b_ref, bias_ref, o_ref, acc_ref, *, act):
    @pl.when(pl.program_id(2) == 0)
    def _():
        acc_ref[...] = jnp.zeros_like(acc_ref)

    acc_ref[...] += jnp.dot(a_ref[...], b_ref[...],
                            preferred_element_type=jnp.float32)

    @pl.when(pl.program_id(2) == pl.num_programs(2) - 1)
    def _():
        o_ref[...] = _apply_act(acc_ref[...] + bias_ref[...], act).astype(o_ref.dtype)


def _pick_tiles(M, K, N):
    """Choose (Mp, tm, tk, tn).  K / N never padded; only M may be padded."""
    Mp8 = _round_up(M, 8)
    if K <= 1024:
        tk = K
    else:
        tk = next((c for c in (2048, 1024, 512, 256, 128) if K % c == 0), K)
    if N <= 256:
        tn = N
    elif Mp8 <= 256:
        # deep-UNet "matvec" shapes: wide N tiles, but keep >= 2 N-steps on the
        # dual-TensorCore generation so both cores get parallel work.
        max_tn = N if _BIG_VMEM else max(256, N // 2)
        tn = next((c for c in (4096, 2048, 1024, 512, 384, 256, 128)
                   if c <= max_tn and N % c == 0), N)
    else:
        tn = next((c for c in (512, 384, 256, 128) if N % c == 0), N)
    cap = min(_TILE_BYTES // (2 * tk), _TILE_BYTES // (4 * tn), 4096)
    cap = max(256, (cap // 256) * 256)
    if Mp8 <= cap:
        return Mp8, Mp8, tk, tn
    cands = [c for c in (4096, 3072, 2048, 1536, 1024, 768, 512, 384, 256) if c <= cap]
    tm = None
    for c in cands:                                   # bound zero-padding waste
        if _round_up(M, c) - M <= max(M // 8, 64):
            tm = c
            break
    if tm is None:
        tm = min(cands, key=lambda c: _round_up(M, c))
    return _round_up(M, tm), tm, tk, tn


@functools.lru_cache(maxsize=None)
def _mm_call(Mp, K, N, tm, tk, tn, act, out_dtype):
    if tk == K:
        call = pl.pallas_call(
            functools.partial(_mm_kernel_single, act=act),
            out_shape=jax.ShapeDtypeStruct((Mp, N), out_dtype),
            grid=(Mp // tm, N // tn),
            in_specs=[pl.BlockSpec((tm, tk), lambda i, j: (i, 0)),
                      pl.BlockSpec((tk, tn), lambda i, j: (0, j)),
                      pl.BlockSpec((1, tn), lambda i, j: (0, j))],
            out_specs=pl.BlockSpec((tm, tn), lambda i, j: (i, j)),
            compiler_params=pltpu.CompilerParams(
                dimension_semantics=("parallel", "parallel"),
                vmem_limit_bytes=_VMEM_LIMIT),
        )
    else:
        call = pl.pallas_call(
            functools.partial(_mm_kernel_acc, act=act),
            out_shape=jax.ShapeDtypeStruct((Mp, N), out_dtype),
            grid=(Mp // tm, N // tn, K // tk),
            in_specs=[pl.BlockSpec((tm, tk), lambda i, j, k: (i, k)),
                      pl.BlockSpec((tk, tn), lambda i, j, k: (k, j)),
                      pl.BlockSpec((1, tn), lambda i, j, k: (0, j))],
            out_specs=pl.BlockSpec((tm, tn), lambda i, j, k: (i, j)),
            scratch_shapes=[pltpu.VMEM((tm, tn), jnp.float32)],
            compiler_params=pltpu.CompilerParams(
                dimension_semantics=("parallel", "parallel", "arbitrary"),
                vmem_limit_bytes=_VMEM_LIMIT),
        )
    return jax.jit(call)


def matmul(a, b, bias=None, act=None, out_dtype=jnp.bfloat16):
    """a: (M, K), b: (K, N), bias: (N,) or None -> (M, N)."""
    M, K = a.shape
    _, N = b.shape
    a = a.astype(jnp.bfloat16)
    b = b.astype(jnp.bfloat16)
    if K % 8:                                   # keep the contraction dim sublane aligned
        Kp = _round_up(K, 8)
        a = jnp.pad(a, ((0, 0), (0, Kp - K)))
        b = jnp.pad(b, ((0, Kp - K), (0, 0)))
        K = Kp
    if K > 1024 and all(K % c for c in (2048, 1024, 512, 256, 128)):
        Kp = _round_up(K, 256)                  # guard: bounded contraction tile
        a = jnp.pad(a, ((0, 0), (0, Kp - K)))
        b = jnp.pad(b, ((0, Kp - K), (0, 0)))
        K = Kp
    bias = jnp.zeros((N,), jnp.float32) if bias is None else bias
    bias = bias.astype(jnp.float32).reshape(1, N)
    Mp, tm, tk, tn = _pick_tiles(M, K, N)
    if Mp != M:
        a = jnp.pad(a, ((0, Mp - M), (0, 0)))
    out = _mm_call(Mp, K, N, tm, tk, tn, act, out_dtype)(a, b, bias)
    return out if Mp == M else out[:M]


# ----------------------------------------------------------------------------
# Pallas kernel 2: fused LayerNorm (last axis, f32 stats) -> Linear -> act.
# ----------------------------------------------------------------------------
def _ln_mm_kernel(a_ref, g_ref, b2_ref, w_ref, bias_ref, o_ref, *, act):
    a = a_ref[...].astype(jnp.float32)
    mu = jnp.mean(a, axis=-1, keepdims=True)
    var = jnp.mean(jnp.square(a - mu), axis=-1, keepdims=True)
    h = (a - mu) * lax.rsqrt(var + 1e-5) * g_ref[...] + b2_ref[...]
    y = jnp.dot(h.astype(jnp.bfloat16), w_ref[...],
                preferred_element_type=jnp.float32) + bias_ref[...]
    o_ref[...] = _apply_act(y, act).astype(o_ref.dtype)


@functools.lru_cache(maxsize=None)
def _ln_mm_call(M, K, N, tm, tn, act):
    call = pl.pallas_call(
        functools.partial(_ln_mm_kernel, act=act),
        out_shape=jax.ShapeDtypeStruct((M, N), jnp.bfloat16),
        grid=(M // tm, N // tn),
        in_specs=[pl.BlockSpec((tm, K), lambda i, j: (i, 0)),
                  pl.BlockSpec((1, K), lambda i, j: (0, 0)),
                  pl.BlockSpec((1, K), lambda i, j: (0, 0)),
                  pl.BlockSpec((K, tn), lambda i, j: (0, j)),
                  pl.BlockSpec((1, tn), lambda i, j: (0, j))],
        out_specs=pl.BlockSpec((tm, tn), lambda i, j: (i, j)),
        compiler_params=pltpu.CompilerParams(
            dimension_semantics=("parallel", "parallel"),
            vmem_limit_bytes=_VMEM_LIMIT),
    )
    return jax.jit(call)


def ln_matmul(x2, g, b, w, bias, act=None):
    """Fused LayerNorm(last dim) -> Linear(+bias) -> act.  K must be a multiple of 8."""
    M, K = x2.shape
    N = w.shape[1]
    tm = 512 if (M % 512 == 0 and M > 512) else M
    tn = next((c for c in (768, 512, 384, 256) if c < N and N % c == 0), N)
    return _ln_mm_call(M, K, N, tm, tn, act)(
        x2.astype(jnp.bfloat16),
        g.astype(jnp.float32).reshape(1, K),
        b.astype(jnp.float32).reshape(1, K),
        w.astype(jnp.bfloat16),
        bias.astype(jnp.float32).reshape(1, N))


# ----------------------------------------------------------------------------
# Pallas kernel 3: InstanceNorm2d (stats over H*W per (n,c), f32) + Leaky/ReLU.
# g = 128/C spatial positions are folded onto the lane axis; per-channel stats are
# recovered via a tiny one-hot fold matmul, so the normalize pass stays lane-dense.
# ----------------------------------------------------------------------------
def _in_kernel(x_ref, f_ref, o_ref, *, slope, fold, inv_n):
    x = x_ref[0].astype(jnp.float32)                       # (R, L)
    s1 = jnp.sum(x, axis=0, keepdims=True)                 # (1, L)
    s2 = jnp.sum(x * x, axis=0, keepdims=True)
    if fold:
        f = f_ref[...]                                      # (L, C) one-hot
        m_c = jnp.dot(s1, f, preferred_element_type=jnp.float32) * inv_n
        e2_c = jnp.dot(s2, f, preferred_element_type=jnp.float32) * inv_n
        v_c = jnp.maximum(e2_c - m_c * m_c, 0.0)
        r_c = lax.rsqrt(v_c + 1e-5)
        dn = (((1,), (1,)), ((), ()))
        mean = lax.dot_general(m_c, f, dn, preferred_element_type=jnp.float32)
        rstd = lax.dot_general(r_c, f, dn, preferred_element_type=jnp.float32)
    else:
        mean = s1 * inv_n
        var = jnp.maximum(s2 * inv_n - mean * mean, 0.0)
        rstd = lax.rsqrt(var + 1e-5)
    y = (x - mean) * rstd
    o_ref[0] = jnp.where(y >= 0, y, y * slope).astype(o_ref.dtype)


@functools.lru_cache(maxsize=None)
def _in_call(NB, R, L, C, fold, slope):
    g = L // C
    f_shape = (L, C) if fold else (1, 1)
    call = pl.pallas_call(
        functools.partial(_in_kernel, slope=slope, fold=fold,
                          inv_n=1.0 / float(R * g)),
        out_shape=jax.ShapeDtypeStruct((NB, R, L), jnp.bfloat16),
        grid=(NB,),
        in_specs=[pl.BlockSpec((1, R, L), lambda n: (n, 0, 0)),
                  pl.BlockSpec(f_shape, lambda n: (0, 0))],
        out_specs=pl.BlockSpec((1, R, L), lambda n: (n, 0, 0)),
        compiler_params=pltpu.CompilerParams(
            dimension_semantics=("parallel",),
            vmem_limit_bytes=_VMEM_LIMIT),
    )
    return jax.jit(call)


def instnorm_act(x, slope):
    """x: NHWC. InstanceNorm2d(affine=False) over HxW per (n,c), then LeakyReLU(slope)."""
    N, H, W, C = x.shape
    HW = H * W
    if C <= 128 and 128 % C == 0 and HW % (128 // C) == 0:
        g = 128 // C
    else:
        g = 1
    R, L = HW // g, g * C
    fold = g > 1
    arr = x.reshape(N, R, L).astype(jnp.bfloat16)
    if fold:
        f = (jnp.arange(L)[:, None] % C == jnp.arange(C)[None, :]).astype(jnp.float32)
    else:
        f = jnp.zeros((1, 1), jnp.float32)
    out = _in_call(N, R, L, C, fold, float(slope))(arr, f)
    return out.reshape(N, H, W, C)


# ----------------------------------------------------------------------------
# Pallas kernel 4: per-head attention (QK^T * scale -> softmax -> @V).
# ----------------------------------------------------------------------------
def _attn_kernel(q_ref, k_ref, v_ref, o_ref, *, scale):
    q = q_ref[0]
    k = k_ref[0]
    v = v_ref[0]
    s = lax.dot_general(q, k, (((1,), (1,)), ((), ())),
                        preferred_element_type=jnp.float32) * scale
    s = s - jnp.max(s, axis=-1, keepdims=True)
    p = jnp.exp(s)
    denom = jnp.sum(p, axis=-1, keepdims=True)
    p = (p * pl.reciprocal(denom, approx=True)).astype(v.dtype)
    o_ref[0] = jnp.dot(p, v, preferred_element_type=jnp.float32).astype(o_ref.dtype)


@functools.lru_cache(maxsize=None)
def _attn_call(BH, N, dh, scale):
    call = pl.pallas_call(
        functools.partial(_attn_kernel, scale=scale),
        out_shape=jax.ShapeDtypeStruct((BH, N, dh), jnp.bfloat16),
        grid=(BH,),
        in_specs=[pl.BlockSpec((1, N, dh), lambda h: (h, 0, 0))] * 3,
        out_specs=pl.BlockSpec((1, N, dh), lambda h: (h, 0, 0)),
        compiler_params=pltpu.CompilerParams(
            dimension_semantics=("parallel",),
            vmem_limit_bytes=_VMEM_LIMIT),
    )
    return jax.jit(call)


def mhsa_core(q, k, v, scale):
    """q,k,v: (B*heads, N, dh) -> (B*heads, N, dh). Head dim only rounded to 8."""
    BH, N, dh = q.shape
    dp = _round_up(dh, 8)
    if dp != dh:
        pad = ((0, 0), (0, 0), (0, dp - dh))
        q, k, v = jnp.pad(q, pad), jnp.pad(k, pad), jnp.pad(v, pad)
    out = _attn_call(BH, N, dp, float(scale))(q.astype(jnp.bfloat16),
                                              k.astype(jnp.bfloat16),
                                              v.astype(jnp.bfloat16))
    return out[..., :dh] if dp != dh else out


# ----------------------------------------------------------------------------
# Pallas kernel 5: dedicated final head.
# Upsample(2, nearest) -> ZeroPad2d((1,0,1,0)) -> Conv2d(C, 1, 4, pad=1) -> Tanh,
# folded into 4 phase sub-convs evaluated from the un-upsampled input (no im2col).
# ----------------------------------------------------------------------------
def _final_head_kernel(x_ref, w_ref, b_ref, o_ref, *, S, C):
    acc = jnp.zeros((S * S, 4), jnp.float32)
    for a in range(3):
        for b in range(3):
            sl = x_ref[0, a:a + S, b:b + S, :].reshape(S * S, C)
            acc = acc + jnp.dot(sl, w_ref[a * 3 + b],
                                preferred_element_type=jnp.float32)
    y = jnp.tanh(acc + b_ref[0])
    o_ref[0] = y.reshape(S, S, 4)


@functools.lru_cache(maxsize=None)
def _final_head_call(B, S, C, Sp):
    call = pl.pallas_call(
        functools.partial(_final_head_kernel, S=S, C=C),
        out_shape=jax.ShapeDtypeStruct((B, S, S, 4), jnp.float32),
        grid=(B,),
        in_specs=[pl.BlockSpec((1, Sp, Sp, C), lambda b: (b, 0, 0, 0)),
                  pl.BlockSpec((9, C, 4), lambda b: (0, 0, 0)),
                  pl.BlockSpec(memory_space=pltpu.MemorySpace.SMEM)],
        out_specs=pl.BlockSpec((1, S, S, 4), lambda b: (b, 0, 0, 0)),
        compiler_params=pltpu.CompilerParams(
            dimension_semantics=("parallel",),
            vmem_limit_bytes=_VMEM_LIMIT),
    )
    return jax.jit(call)


def final_head(x, w_pt, bias):
    """x: (B, S, S, C) NHWC. Returns (B, 2S, 2S) f32 (Tanh applied)."""
    B, S, _, C = x.shape
    Sp = _round_up(S + 2, 8)
    xp = jnp.pad(x.astype(jnp.bfloat16),
                 ((0, 0), (1, Sp - S - 1), (1, Sp - S - 1), (0, 0)))
    # phase/tap mixing: rows a of the 3x3 window pick up conv taps di per phase p.
    m2 = jnp.array([[[1, 1, 0, 0], [0, 0, 1, 1], [0, 0, 0, 0]],
                    [[1, 0, 0, 0], [0, 1, 1, 0], [0, 0, 0, 1]]], jnp.float32)
    k4 = jnp.einsum("pai,qbj,cij->abcpq", m2, m2, w_pt[0].astype(jnp.float32))
    wtaps = k4.reshape(3, 3, C, 4).reshape(9, C, 4).astype(jnp.bfloat16)
    out = _final_head_call(B, S, C, Sp)(xp, wtaps,
                                        bias.astype(jnp.float32).reshape(1))
    out = out.reshape(B, S, S, 2, 2).transpose(0, 1, 3, 2, 4).reshape(B, 2 * S, 2 * S)
    return out


# ----------------------------------------------------------------------------
# Pallas kernel 6: out_layer Conv2d(2, 1, 3, stride=1, pad=1), lane-dense VPU conv
# over two channel planes (W on lanes); avoids im2col and the channel concat.
# ----------------------------------------------------------------------------
def _out_conv_kernel(x0_ref, x1_ref, w_ref, o_ref, *, Ho, Wo):
    acc = jnp.full((Ho, Wo), w_ref[18], jnp.float32)      # bias
    k = 0
    for xref in (x0_ref, x1_ref):
        for di in range(3):
            for dj in range(3):
                acc = acc + xref[0, di:di + Ho, dj:dj + Wo].astype(jnp.float32) * w_ref[k]
                k += 1
    o_ref[0] = acc


@functools.lru_cache(maxsize=None)
def _out_conv_call(B, Ho, Wo, Hp, Wp):
    call = pl.pallas_call(
        functools.partial(_out_conv_kernel, Ho=Ho, Wo=Wo),
        out_shape=jax.ShapeDtypeStruct((B, Ho, Wo), jnp.float32),
        grid=(B,),
        in_specs=[pl.BlockSpec((1, Hp, Wp), lambda b: (b, 0, 0)),
                  pl.BlockSpec((1, Hp, Wp), lambda b: (b, 0, 0)),
                  pl.BlockSpec(memory_space=pltpu.MemorySpace.SMEM)],
        out_specs=pl.BlockSpec((1, Ho, Wo), lambda b: (b, 0, 0)),
        compiler_params=pltpu.CompilerParams(
            dimension_semantics=("parallel",),
            vmem_limit_bytes=_VMEM_LIMIT),
    )
    return jax.jit(call)


def out_layer_conv(p0, p1, w_pt, bias):
    """p0/p1: (B, H, W) channel planes (channel order: p0, p1). Returns (B, H, W) f32."""
    B, H, W = p0.shape
    Hp = _round_up(H + 2, 8)
    Wp = _round_up(W + 2, 128)
    pad = ((0, 0), (1, Hp - H - 1), (1, Wp - W - 1))
    p0 = jnp.pad(p0.astype(jnp.bfloat16), pad)
    p1 = jnp.pad(p1.astype(jnp.bfloat16), pad)
    wf = jnp.concatenate([w_pt[0].reshape(-1).astype(jnp.float32),
                          bias.reshape(-1).astype(jnp.float32)])
    return _out_conv_call(B, H, W, Hp, Wp)(p0, p1, wf)


# ----------------------------------------------------------------------------
# Convolution glue (NHWC im2col + Pallas matmul).
# ----------------------------------------------------------------------------
def _im2col(x, kh, kw, stride, pad):
    """NHWC im2col. Returns (N*Ho*Wo, kh*kw*C) with column order (kh, kw, c)."""
    N, H, W, C = x.shape
    if pad:
        x = jnp.pad(x, ((0, 0), (pad, pad), (pad, pad), (0, 0)))
    Ho = (H + 2 * pad - kh) // stride + 1
    Wo = (W + 2 * pad - kw) // stride + 1
    cols = []
    for i in range(kh):
        for j in range(kw):
            cols.append(x[:, i:i + (Ho - 1) * stride + 1:stride,
                             j:j + (Wo - 1) * stride + 1:stride, :])
    patches = jnp.concatenate(cols, axis=-1) if len(cols) > 1 else cols[0]
    return patches.reshape(N * Ho * Wo, kh * kw * C), Ho, Wo


def conv2d(x, w_pt, bias=None, stride=1, pad=0, act=None, out_dtype=jnp.bfloat16):
    """x: NHWC, w_pt: PyTorch layout (Cout, Cin, kh, kw)."""
    Cout, Cin, kh, kw = w_pt.shape
    N = x.shape[0]
    patches, Ho, Wo = _im2col(x, kh, kw, stride, pad)
    w2 = jnp.transpose(w_pt, (2, 3, 1, 0)).reshape(kh * kw * Cin, Cout)
    y = matmul(patches, w2, bias=bias, act=act, out_dtype=out_dtype)
    return y.reshape(N, Ho, Wo, Cout)


def conv_transpose2d(x, w_pt):
    """PyTorch ConvTranspose2d(k=4, s=2, p=1, bias=False) via the 4-sub-conv
    (pixel-shuffle) decomposition. x: NHWC, w_pt: (Cin, Cout, 4, 4)."""
    N, H, W, Cin = x.shape
    Cout = w_pt.shape[1]
    xp = jnp.pad(x, ((0, 0), (1, 1), (1, 1), (0, 0)))
    idx = jnp.array([[3, 2], [1, 0]], dtype=jnp.int32)        # [window d, phase] -> tap
    wc = w_pt[:, :, idx][:, :, :, :, idx]                      # (Cin,Cout,dh,ph,dw,pw)
    wc = jnp.transpose(wc, (2, 4, 0, 3, 5, 1)).reshape(4 * Cin, 4 * Cout)
    patches, _, _ = _im2col(xp, 2, 2, 1, 0)                    # (N*(H+1)*(W+1), 4*Cin)
    y = matmul(patches, wc)
    y = y.reshape(N, H + 1, W + 1, 2, 2, Cout)
    p00 = y[:, 0:H,     0:W,     0, 0, :]
    p01 = y[:, 0:H,     1:W + 1, 0, 1, :]
    p10 = y[:, 1:H + 1, 0:W,     1, 0, :]
    p11 = y[:, 1:H + 1, 1:W + 1, 1, 1, :]
    t = jnp.stack([p00, p01, p10, p11], axis=3).reshape(N, H, W, 2, 2, Cout)
    return jnp.transpose(t, (0, 1, 3, 2, 4, 5)).reshape(N, 2 * H, 2 * W, Cout)


# ----------------------------------------------------------------------------
# UNet / Transformer building blocks.
# ----------------------------------------------------------------------------
def unet_down(x, w, normalize=True):
    if normalize:
        y = conv2d(x, w, stride=2, pad=1)
        return instnorm_act(y, 0.2)                   # LeakyReLU(0.2); dropout = identity
    return conv2d(x, w, stride=2, pad=1, act="leaky")  # fused LeakyReLU(0.2)


def unet_up(x, skip, w):
    y = instnorm_act(conv_transpose2d(x, w), 0.0)     # ReLU
    return jnp.concatenate([y, skip], axis=-1)


def encoder_block(x, p, heads):
    B, N, D = x.shape
    dh = D // heads
    qkv = ln_matmul(x.reshape(B * N, D), p["ln1_g"], p["ln1_b"],
                    p["w_qkv"], p["b_qkv"])
    qkv = qkv.reshape(B, N, 3, heads, dh).transpose(2, 0, 3, 1, 4).reshape(3, B * heads, N, dh)
    o = mhsa_core(qkv[0], qkv[1], qkv[2], scale=dh ** -0.5)
    o = o.reshape(B, heads, N, dh).transpose(0, 2, 1, 3).reshape(B * N, D)
    o = matmul(o, p["w_proj"], bias=p["b_proj"])
    x = x + o.reshape(B, N, D)
    h = ln_matmul(x.reshape(B * N, D), p["ln2_g"], p["ln2_b"],
                  p["w_fc1"], p["b_fc1"], act="gelu")
    h = matmul(h, p["w_fc2"], bias=p["b_fc2"])
    return x + h.reshape(B, N, D)


def transformer_encoder(x, blocks, heads):
    for p in blocks:
        x = encoder_block(x, p, heads)
    return x


def upsampling(x, H, W):
    """TransGAN UpSampling: token grid -> PixelShuffle(2) -> token grid."""
    B, _, C = x.shape
    x = jnp.transpose(x, (0, 2, 1)).reshape(B, C, H, W)
    x = x.reshape(B, C // 4, 2, 2, H, W).transpose(0, 1, 4, 2, 5, 3)
    x = x.reshape(B, C // 4, 2 * H, 2 * W)
    H, W = 2 * H, 2 * W
    x = x.reshape(B, C // 4, H * W).transpose(0, 2, 1)
    return x, H, W


# ----------------------------------------------------------------------------
# Deterministic synthetic parameters (PyTorch weight layouts).
# ----------------------------------------------------------------------------
class ParamGen:
    def __init__(self, key):
        self.key = key

    def next(self):
        self.key, k = jax.random.split(self.key)
        return k

    def conv(self, cout, cin, kh, kw):
        fan_in = cin * kh * kw
        return jax.random.normal(self.next(), (cout, cin, kh, kw), jnp.float32) / math.sqrt(fan_in)

    def convT(self, cin, cout, kh, kw):
        fan_in = cin * kh * kw
        return jax.random.normal(self.next(), (cin, cout, kh, kw), jnp.float32) / math.sqrt(fan_in)

    def linear(self, din, dout):
        w = jax.random.normal(self.next(), (din, dout), jnp.float32) / math.sqrt(din)
        b = 0.01 * jax.random.normal(self.next(), (dout,), jnp.float32)
        return w, b


def make_block(pg, dim, mlp_ratio):
    w_qkv, b_qkv = pg.linear(dim, 3 * dim)
    w_proj, b_proj = pg.linear(dim, dim)
    w_fc1, b_fc1 = pg.linear(dim, dim * mlp_ratio)
    w_fc2, b_fc2 = pg.linear(dim * mlp_ratio, dim)
    return dict(
        ln1_g=jnp.ones((dim,), jnp.float32), ln1_b=jnp.zeros((dim,), jnp.float32),
        ln2_g=jnp.ones((dim,), jnp.float32), ln2_b=jnp.zeros((dim,), jnp.float32),
        w_qkv=w_qkv, b_qkv=b_qkv, w_proj=w_proj, b_proj=b_proj,
        w_fc1=w_fc1, b_fc1=b_fc1, w_fc2=w_fc2, b_fc2=b_fc2,
    )


def init_params(key, dim=384, initial_size=8, mlp_ratio=4, depth1=5, depth2=4, depth3=2):
    pg = ParamGen(key)
    P = {}
    # trans down path
    P["td1"] = pg.conv(16, 1, 4, 4)
    P["td2"] = pg.conv(16, 16, 4, 4)
    P["td3"] = pg.conv(3, 16, 4, 4)
    # token projections
    P["lin1_w"], P["lin1_b"] = pg.linear(3072, 1024)
    P["mlp_w"], P["mlp_b"] = pg.linear(1024, initial_size ** 2 * dim)
    # positional embeddings (zero-initialized in the PyTorch module)
    P["pos1"] = jnp.zeros((1, 8 ** 2, dim), jnp.float32)
    P["pos2"] = jnp.zeros((1, 16 ** 2, dim // 4), jnp.float32)
    P["pos3"] = jnp.zeros((1, 32 ** 2, dim // 16), jnp.float32)
    # transformer encoders
    P["enc1"] = [make_block(pg, dim, mlp_ratio) for _ in range(depth1)]
    P["enc2"] = [make_block(pg, dim // 4, mlp_ratio) for _ in range(depth2)]
    P["enc3"] = [make_block(pg, dim // 16, mlp_ratio) for _ in range(depth3)]
    # 1x1 conv after the transformer
    P["lin_conv_w"] = pg.conv(3, dim // 16, 1, 1)
    P["lin_conv_b"] = 0.01 * jax.random.normal(pg.next(), (3,), jnp.float32)
    # trans up path
    P["tu1"] = pg.convT(3, 16, 4, 4)
    P["tu2"] = pg.convT(32, 16, 4, 4)
    P["tu3"] = pg.convT(32, 1, 4, 4)
    P["out_w"] = pg.conv(1, 2, 3, 3)
    P["out_b"] = 0.01 * jax.random.normal(pg.next(), (1,), jnp.float32)
    # UNet down
    P["d1"] = pg.conv(64, 1, 4, 4)
    P["d2"] = pg.conv(128, 64, 4, 4)
    P["d3"] = pg.conv(256, 128, 4, 4)
    P["d4"] = pg.conv(512, 256, 4, 4)
    P["d5"] = pg.conv(512, 512, 4, 4)
    P["d6"] = pg.conv(512, 512, 4, 4)
    P["d7"] = pg.conv(512, 512, 4, 4)
    P["d8"] = pg.conv(512, 512, 4, 4)
    # UNet up (up8 exists in __init__ of the PyTorch module but is unused in forward)
    P["u1"] = pg.convT(512, 512, 4, 4)
    P["u2"] = pg.convT(1024, 512, 4, 4)
    P["u3"] = pg.convT(1024, 512, 4, 4)
    P["u4"] = pg.convT(1024, 512, 4, 4)
    P["u5"] = pg.convT(1024, 256, 4, 4)
    P["u6"] = pg.convT(512, 128, 4, 4)
    P["u7"] = pg.convT(256, 64, 4, 4)
    # final head
    P["final_w"] = pg.conv(1, 128, 4, 4)
    P["final_b"] = 0.01 * jax.random.normal(pg.next(), (1,), jnp.float32)
    return P


# ----------------------------------------------------------------------------
# Full forward pass (mirrors TransGeneratorUNetV4.forward).
# ----------------------------------------------------------------------------
def forward(x_nchw, P, heads=4, dim=384, initial_size=8):
    B = x_nchw.shape[0]
    x = jnp.transpose(x_nchw, (0, 2, 3, 1)).astype(jnp.bfloat16)    # NHWC
    tmp_input = x

    # transformer-branch downsampling
    t1 = unet_down(x, P["td1"])                    # (B,128,128,16)
    t2 = unet_down(t1, P["td2"])                   # (B, 64, 64,16)
    t3 = unet_down(t2, P["td3"])                   # (B, 32, 32, 3)

    # flatten in PyTorch (C,H,W) order to feed Linear(3072, 1024)
    z = jnp.transpose(t3, (0, 3, 1, 2)).reshape(B, 3 * 32 * 32)
    z = matmul(z, P["lin1_w"], bias=P["lin1_b"])                    # 3072 -> 1024
    z = matmul(z, P["mlp_w"], bias=P["mlp_b"])                      # 1024 -> 64*384
    z = z.reshape(B, initial_size ** 2, dim)

    H = W = initial_size
    z = z + P["pos1"].astype(z.dtype)
    z = transformer_encoder(z, P["enc1"], heads)
    z, H, W = upsampling(z, H, W)
    z = z + P["pos2"].astype(z.dtype)
    z = transformer_encoder(z, P["enc2"], heads)
    z, H, W = upsampling(z, H, W)
    z = z + P["pos3"].astype(z.dtype)
    z = transformer_encoder(z, P["enc3"], heads)

    z = z.reshape(B, H, W, dim // 16)                               # (B,32,32,24)
    z = conv2d(z, P["lin_conv_w"], bias=P["lin_conv_b"])            # 1x1 conv -> (B,32,32,3)

    z = unet_up(z, t2, P["tu1"])                   # (B, 64, 64,32)
    z = unet_up(z, t1, P["tu2"])                   # (B,128,128,32)
    y3 = instnorm_act(conv_transpose2d(z, P["tu3"]), 0.0)           # (B,256,256,1)
    # out_layer on [y3, tmp_input] channel planes (concat folded into the kernel)
    trans_out = out_layer_conv(y3[..., 0], tmp_input[..., 0],
                               P["out_w"], P["out_b"])              # (B,256,256) f32

    new_in = ((trans_out[..., None] + tmp_input.astype(jnp.float32)) * 0.5).astype(jnp.bfloat16)

    d1 = unet_down(new_in, P["d1"], normalize=False)
    d2 = unet_down(d1, P["d2"])
    d3 = unet_down(d2, P["d3"])
    d4 = unet_down(d3, P["d4"])
    d5 = unet_down(d4, P["d5"])
    d6 = unet_down(d5, P["d6"])
    d7 = unet_down(d6, P["d7"])
    d8 = unet_down(d7, P["d8"], normalize=False)   # (B,1,1,512)

    u1 = unet_up(d8, d7, P["u1"])
    u2 = unet_up(u1, d6, P["u2"])
    u3 = unet_up(u2, d5, P["u3"])
    u4 = unet_up(u3, d4, P["u4"])
    u5 = unet_up(u4, d3, P["u5"])
    u6 = unet_up(u5, d2, P["u6"])
    u7 = unet_up(u6, d1, P["u7"])                  # (B,128,128,128)

    # final: Upsample(x2) -> ZeroPad2d((1,0,1,0)) -> Conv2d(128,1,4,p=1) -> Tanh
    out = final_head(u7, P["final_w"], P["final_b"])                # (B,256,256) f32
    return out[:, None, :, :]                                       # NCHW (B,1,256,256)


if __name__ == "__main__":
    root = jax.random.PRNGKey(0)
    k_params, k_input = jax.random.split(root)

    params = init_params(k_params)
    # Smallest input consistent with the module: Linear(3072,1024) on the flattened
    # trans_down3 output and the eight stride-2 UNet downs force (B, 1, 256, 256).
    x = jax.random.normal(k_input, (1, 1, 256, 256), jnp.float32)

    out = forward(x, params)
    out = jax.block_until_ready(out)

    assert out.shape == (1, 1, 256, 256), out.shape
    assert bool(jnp.all(jnp.isfinite(out)))
    print("KERNEL_OK")
</pallas_src>

<mosaic_0001>
module attributes {stable_mosaic.version = 11 : i64} {
  func.func @_mm_kernel_single(%arg0: i32, %arg1: i32, %arg2: memref<4096x16xbf16, #tpu.memory_space<vmem>>, %arg3: memref<16x16xbf16, #tpu.memory_space<vmem>>, %arg4: memref<1x16xf32, #tpu.memory_space<vmem>>, %arg5: memref<4096x16xbf16, #tpu.memory_space<vmem>>) attributes {dimension_semantics = [#tpu.dimension_semantics<parallel>, #tpu.dimension_semantics<parallel>], iteration_bounds = array<i64: 4, 1>, scalar_prefetch = 0 : i64, scratch_operands = 0 : i64, tpu.core_type = #tpu.core_type<tc>, window_params = [{transform_indices = @transform_0, window_bounds = array<i64: 4096, 16>}, {transform_indices = @transform_1, window_bounds = array<i64: 16, 16>}, {transform_indices = @transform_2, window_bounds = array<i64: 1, 16>}, {transform_indices = @transform_3, window_bounds = array<i64: 4096, 16>}]} {
    %c0 = arith.constant 0 : index
    %c0_0 = arith.constant 0 : index
    %0 = vector.load %arg2[%c0, %c0_0] : memref<4096x16xbf16, #tpu.memory_space<vmem>>, vector<4096x16xbf16>
    %c0_1 = arith.constant 0 : index
    %c0_2 = arith.constant 0 : index
    %1 = vector.load %arg3[%c0_1, %c0_2] : memref<16x16xbf16, #tpu.memory_space<vmem>>, vector<16x16xbf16>
    %cst = arith.constant dense<0.000000e+00> : vector<4096x16xf32>
    %2 = tpu.matmul %0, %1, %cst {dimension_numbers = #tpu.dot_dimension_numbers<[1], [0], [0], [1], [0, 0, 1, 1], [], []>} : vector<4096x16xbf16>, vector<16x16xbf16>, vector<4096x16xf32> -> vector<4096x16xf32>
    %c0_3 = arith.constant 0 : index
    %c0_4 = arith.constant 0 : index
    %3 = vector.load %arg4[%c0_3, %c0_4] : memref<1x16xf32, #tpu.memory_space<vmem>>, vector<1x16xf32>
    %4 = vector.broadcast %3 : vector<1x16xf32> to vector<4096x16xf32>
    %5 = arith.addf %2, %4 : vector<4096x16xf32>
    %6 = arith.truncf %5 : vector<4096x16xf32> to vector<4096x16xbf16>
    %c0_5 = arith.constant 0 : index
    %c0_6 = arith.constant 0 : index
    %7 = vector.load %arg5[%c0_5, %c0_6] : memref<4096x16xbf16, #tpu.memory_space<vmem>>, vector<4096x16xbf16>
    tpu.vector_store %arg5[%c0_5, %c0_6], %6 {strides = array<i32>} : memref<4096x16xbf16, #tpu.memory_space<vmem>>, vector<4096x16xbf16>,
    return
  }
  func.func @transform_0(%arg0: i32, %arg1: i32) -> (i32, i32) {
    %c0_i32 = arith.constant 0 : i32
    %c0_i32_0 = arith.constant 0 : i32
    return %arg0, %c0_i32 : i32, i32
  }
  func.func @transform_1(%arg0: i32, %arg1: i32) -> (i32, i32) {
    %c0_i32 = arith.constant 0 : i32
    %c0_i32_0 = arith.constant 0 : i32
    return %c0_i32, %arg1 : i32, i32
  }
  func.func @transform_2(%arg0: i32, %arg1: i32) -> (i32, i32) {
    %c0_i32 = arith.constant 0 : i32
    %c0_i32_0 = arith.constant 0 : i32
    return %c0_i32, %arg1 : i32, i32
  }
  func.func @transform_3(%arg0: i32, %arg1: i32) -> (i32, i32) {
    %c0_i32 = arith.constant 0 : i32
    return %arg0, %arg1 : i32, i32
  }
}

</mosaic_0001>

<bundles_post_ra>
// kernel: tpu_custom_call.1
= control target key start
LH: loop header
LB: loop body
LE: loop exit
PB: predicated region body
PF: predicated region fallthrough
CT: control target
= control target key end

     0   :  { %s10199_s12 = smov 0   ;;  %s10201_s13 = smov 0   ;;  %s12319_s0 = inlined_call_operand.vmem [shape: bf16[16384,16], index: 0, kind: input, shape index: {}]   ;;  %s12320_s1 = inlined_call_operand.vmem [shape: bf16[16,16], index: 1, kind: input, shape index: {}]   ;;  %s12321_s2 = inlined_call_operand.vmem [shape: f32[1,16], index: 2, kind: input, shape index: {}]   ;;  %s12322_s3 = inlined_call_operand.vmem [shape: bf16[16384,16], index: 3, kind: output, shape index: {}]  }
   0x1   :  { %s10203_s14 = smov 0  }
   0x2 LB: > { %s25_s15 = sadd.s32 1, %s10173_s13  ;;  %p7552_p0 = scmp.ge.s32.totalorder %s10177_s14, 1  ;;  %s10177_s14 = sphi %s10203_s14, %s13_s14   ;;  %s10173_s13 = sphi %s10201_s13, %s12324_s13   ;;  %s10169_s12 = sphi %s10199_s12, %s12323_s12  }
   0x3   : > { %p27_p1 = scmp.ge.s32.totalorder %s25_s15, 4  ;;  %p169_p2 = scmp.lt.s32.totalorder %s10177_s14, 5 }
   0x5   : > { %s12326_s15 = smov (%p27_p1, %s25_s15), 0  ;;  %p170_p3 = pnand %p7552_p0, %p169_p2 }
   0x6   : > { %v9894_v0 = vld [vmem:[%s12320_s1] sm:$0xff] (!%p170_p3)   ;;  %s7553_s18 = sshll.u32 (!%p170_p3), %s10169_s12, 9  ;;  %vm2033_vm0 = vcmask (!%p170_p3), 130048   ;;  %vm6931_vm1 = vcmask (!%p170_p3), 125952  }
   0x7   : > { %173 = sbr.rel (%p170_p3) target bundleno = 744 (0x2e8), region = 32  ;;  %p204_p4 = scmp.lt.s32.totalorder (!%p170_p3), %s7553_s18, 2047  ;;  %9354 = vmatprep.subr.bf16.mxu0 (!%p170_p3), %v9894_v0  ;;  %9868 = vmatprep.subr.bf16.mxu1 (!%p170_p3), %v9894_v0 }
   0x8   : > { %9355 = vmatpush3.bf16.msra.mxu0 (!%p170_p3), %v9894_v0  ;;  %9869 = vmatpush3.bf16.msra.mxu1 (!%p170_p3), %v9894_v0 }
   0xe   : > { %s12328_s18 = smov (!%p204_p4, %s7553_s18), 2047 }
   0xf   : > { %s7554_s19 = sshll.u32 %s12328_s18, 2 }
  0x10   : > { %s10228_s22 = scalar_lea.vmem %s12319_s0, %s7554_s19  ;;  %s10464_s27 = scalar_lea.vmem %s12322_s3, %s7554_s19 }
  0x11   : > { %v9895_v1 = vld [vmem:[%s10228_s22] sm:$0xff]   ;;  %v9897_v3 = vld [vmem:[%s10228_s22 + $0x8] sm:$0xff]   ;;  %v9899_v5 = vld [vmem:[%s10228_s22 + $0x10] sm:$0xff]  }
  0x12   : > { %v9896_v2 = vld [vmem:[%s10228_s22 + $0x400] sm:$0xff]   ;;  %9356 = vmatprep.mubr.msk.bf16.mxu0 %vm2033_vm0, %v9895_v1  ;;  %v9898_v4 = vld [vmem:[%s10228_s22 + $0x408] sm:$0xff]   ;;  %v9900_v6 = vld [vmem:[%s10228_s22 + $0x410] sm:$0xff]  }
  0x13   : > { %9612 = vmatprep.mubr.msk.bf16.mxu1 %vm2033_vm0, %v9896_v2  ;;  %9357 = vmatmul.mubr.msk.bf16.vlgmr.msra.gmra.mrb[0].mxu0 %vm2033_vm0, %v9897_v3  ;;  %v9901_v7 = vld [vmem:[%s10228_s22 + $0x18] sm:$0xff]   ;;  %v9903_v9 = vld [vmem:[%s10228_s22 + $0x20] sm:$0xff]   ;;  %v9905_v11 = vld [vmem:[%s10228_s22 + $0x28] sm:$0xff]  }
  0x14   : > { %9613 = vmatmul.mubr.msk.bf16.vlgmr.msra.gmra.mrb[0].mxu1 %vm2033_vm0, %v9898_v4  ;;  %9360 = vmatprep.mubr.msk.bf16.mxu0 %vm2033_vm0, %v9899_v5  ;;  %v9902_v8 = vld [vmem:[%s10228_s22 + $0x418] sm:$0xff]   ;;  %v9904_v10 = vld [vmem:[%s10228_s22 + $0x420] sm:$0xff]   ;;  %v9906_v12 = vld [vmem:[%s10228_s22 + $0x428] sm:$0xff]  }
  0x15   : > { %9616 = vmatprep.mubr.msk.bf16.mxu1 %vm2033_vm0, %v9900_v6  ;;  %v9907_v13 = vld [vmem:[%s10228_s22 + $0x30] sm:$0xff]   ;;  %v9909_v15 = vld [vmem:[%s10228_s22 + $0x38] sm:$0xff]   ;;  %v9911_v17 = vld [vmem:[%s10228_s22 + $0x40] sm:$0xff]  }
  0x16   : > { %v9908_v14 = vld [vmem:[%s10228_s22 + $0x430] sm:$0xff]   ;;  %v9910_v16 = vld [vmem:[%s10228_s22 + $0x438] sm:$0xff]   ;;  %v9912_v18 = vld [vmem:[%s10228_s22 + $0x440] sm:$0xff]  }
  0x17   : > { %v9913_v19 = vld [vmem:[%s10228_s22 + $0x48] sm:$0xff]   ;;  %v9915_v21 = vld [vmem:[%s10228_s22 + $0x50] sm:$0xff]   ;;  %v9917_v23 = vld [vmem:[%s10228_s22 + $0x58] sm:$0xff]  }
  0x18   : > { %v9914_v20 = vld [vmem:[%s10228_s22 + $0x448] sm:$0xff]   ;;  %v9916_v22 = vld [vmem:[%s10228_s22 + $0x450] sm:$0xff]   ;;  %v9918_v24 = vld [vmem:[%s10228_s22 + $0x458] sm:$0xff]  }
  0x19   : > { %v9919_v25 = vld [vmem:[%s10228_s22 + $0x60] sm:$0xff]   ;;  %v9921_v27 = vld [vmem:[%s10228_s22 + $0x68] sm:$0xff]   ;;  %v9923_v29 = vld [vmem:[%s10228_s22 + $0x70] sm:$0xff]  }
  0x1a   : > { %v9920_v26 = vld [vmem:[%s10228_s22 + $0x460] sm:$0xff]   ;;  %v9922_v28 = vld [vmem:[%s10228_s22 + $0x468] sm:$0xff]   ;;  %v9924_v30 = vld [vmem:[%s10228_s22 + $0x470] sm:$0xff]  }
  0x1b   : > { %9361 = vmatmul.mubr.msk.bf16.gmra.mrb[4].mxu0 %vm2033_vm0, %v9901_v7  ;;  %v9925_v31 = vld [vmem:[%s10228_s22 + $0x78] sm:$0xff]   ;;  %v9927_v33 = vld [vmem:[%s10228_s22 + $0x80] sm:$0xff]   ;;  %v9929_v35 = vld [vmem:[%s10228_s22 + $0x88] sm:$0xff]  }
  0x1c   : > { %9617 = vmatmul.mubr.msk.bf16.gmra.mrb[4].mxu1 %vm2033_vm0, %v9902_v8  ;;  %9364 = vmatprep.mubr.msk.bf16.mxu0 %vm2033_vm0, %v9903_v9  ;;  %v9926_v32 = vld [vmem:[%s10228_s22 + $0x478] sm:$0xff]   ;;  %v9928_v34 = vld [vmem:[%s10228_s22 + $0x480] sm:$0xff]   ;;  %v9930_v36 = vld [vmem:[%s10228_s22 + $0x488] sm:$0xff]  }
  0x1d   : > { %9620 = vmatprep.mubr.msk.bf16.mxu1 %vm2033_vm0, %v9904_v10  ;;  %v9931_v37 = vld [vmem:[%s10228_s22 + $0x90] sm:$0xff]   ;;  %v9933_v39 = vld [vmem:[%s10228_s22 + $0x98] sm:$0xff]   ;;  %v9935_v41 = vld [vmem:[%s10228_s22 + $0xa0] sm:$0xff]  }
  0x1e   : > { %v9932_v38 = vld [vmem:[%s10228_s22 + $0x490] sm:$0xff]   ;;  %v9934_v40 = vld [vmem:[%s10228_s22 + $0x498] sm:$0xff]   ;;  %v9936_v42 = vld [vmem:[%s10228_s22 + $0x4a0] sm:$0xff]  }
  0x1f   : > { %v9937_v43 = vld [vmem:[%s10228_s22 + $0xa8] sm:$0xff]   ;;  %v9939_v45 = vld [vmem:[%s10228_s22 + $0xb0] sm:$0xff]   ;;  %v9941_v47 = vld [vmem:[%s10228_s22 + $0xb8] sm:$0xff]  }
  0x20   : > { %v9938_v44 = vld [vmem:[%s10228_s22 + $0x4a8] sm:$0xff]   ;;  %v9940_v46 = vld [vmem:[%s10228_s22 + $0x4b0] sm:$0xff]   ;;  %v9942_v48 = vld [vmem:[%s10228_s22 + $0x4b8] sm:$0xff]  }
  0x21   : > { %v9943_v49 = vld [vmem:[%s10228_s22 + $0xc0] sm:$0xff]   ;;  %v9945_v51 = vld [vmem:[%s10228_s22 + $0xc8] sm:$0xff]   ;;  %v9947_v53 = vld [vmem:[%s10228_s22 + $0xd0] sm:$0xff]  }
  0x22   : > { %v9944_v50 = vld [vmem:[%s10228_s22 + $0x4c0] sm:$0xff]   ;;  %v9946_v52 = vld [vmem:[%s10228_s22 + $0x4c8] sm:$0xff]   ;;  %v9948_v54 = vld [vmem:[%s10228_s22 + $0x4d0] sm:$0xff]  }
  0x23   : > { %9365 = vmatmul.mubr.msk.bf16.gmra.mrb[8].mxu0 %vm2033_vm0, %v9905_v11  ;;  %v9949_v55 = vld [vmem:[%s10228_s22 + $0xd8] sm:$0xff]   ;;  %v9951_v57 = vld [vmem:[%s10228_s22 + $0xe0] sm:$0xff]   ;;  %v9953_v59 = vld [vmem:[%s10228_s22 + $0xe8] sm:$0xff]  }
  0x24   : > { %9621 = vmatmul.mubr.msk.bf16.gmra.mrb[8].mxu1 %vm2033_vm0, %v9906_v12  ;;  %9368 = vmatprep.mubr.msk.bf16.mxu0 %vm2033_vm0, %v9907_v13  ;;  %v9950_v56 = vld [vmem:[%s10228_s22 + $0x4d8] sm:$0xff]   ;;  %v9952_v58 = vld [vmem:[%s10228_s22 + $0x4e0] sm:$0xff]   ;;  %v9954_v60 = vld [vmem:[%s10228_s22 + $0x4e8] sm:$0xff]  }
  0x25   : > { %9624 = vmatprep.mubr.msk.bf16.mxu1 %vm2033_vm0, %v9908_v14  ;;  %v9955_v61 = vld [vmem:[%s10228_s22 + $0xf0] sm:$0xff]   ;;  %v9957_v63 = vld [vmem:[%s10228_s22 + $0xf8] sm:$0xff]   ;;  %v9959_v1 = vld [vmem:[%s10228_s22 + $0x100] sm:$0xff]  }
  0x26   : > { %v9956_v62 = vld [vmem:[%s10228_s22 + $0x4f0] sm:$0xff]   ;;  %v9958_v0 = vld [vmem:[%s10228_s22 + $0x4f8] sm:$0xff]   ;;  %v9960_v2 = vld [vmem:[%s10228_s22 + $0x500] sm:$0xff]  }
  0x27   : > { %v9961_v3 = vld [vmem:[%s10228_s22 + $0x108] sm:$0xff]   ;;  %v9963_v5 = vld [vmem:[%s10228_s22 + $0x110] sm:$0xff]   ;;  %v9965_v7 = vld [vmem:[%s10228_s22 + $0x118] sm:$0xff]  }
  0x28   : > { %v9962_v4 = vld [vmem:[%s10228_s22 + $0x508] sm:$0xff]   ;;  %v9964_v6 = vld [vmem:[%s10228_s22 + $0x510] sm:$0xff]   ;;  %v9966_v8 = vld [vmem:[%s10228_s22 + $0x518] sm:$0xff]  }
  0x29   : > { %v9967_v9 = vld [vmem:[%s10228_s22 + $0x120] sm:$0xff]   ;;  %v9969_v11 = vld [vmem:[%s10228_s22 + $0x128] sm:$0xff]   ;;  %v9971_v13 = vld [vmem:[%s10228_s22 + $0x130] sm:$0xff]  }
  0x2a   : > { %v9968_v10 = vld [vmem:[%s10228_s22 + $0x520] sm:$0xff]   ;;  %v9970_v12 = vld [vmem:[%s10228_s22 + $0x528] sm:$0xff]   ;;  %v9972_v14 = vld [vmem:[%s10228_s22 + $0x530] sm:$0xff]  }
  0x2b   : > { %9369 = vmatmul.mubr.msk.bf16.gmra.mrb[12].mxu0 %vm2033_vm0, %v9909_v15  ;;  %v9973_v15 = vld [vmem:[%s10228_s22 + $0x138] sm:$0xff]  }
  0x2c   : > { %9625 = vmatmul.mubr.msk.bf16.gmra.mrb[12].mxu1 %vm2033_vm0, %v9910_v16  ;;  %9372 = vmatprep.mubr.msk.bf16.mxu0 %vm2033_vm0, %v9911_v17  ;;  %v9974_v16 = vld [vmem:[%s10228_s22 + $0x538] sm:$0xff]   ;;  %v9975_v17 = vld [vmem:[%s10228_s22 + $0x140] sm:$0xff]  }
  0x2d   : > { %9628 = vmatprep.mubr.msk.bf16.mxu1 %vm2033_vm0, %v9912_v18  ;;  %v9976_v18 = vld [vmem:[%s10228_s22 + $0x540] sm:$0xff]  }
  0x33   : > { %9373 = vmatmul.mubr.msk.bf16.gmra.mrb[16].mxu0 %vm2033_vm0, %v9913_v19  ;;  %v9977_v19 = vld [vmem:[%s10228_s22 + $0x148] sm:$0xff]  }
  0x34   : > { %9629 = vmatmul.mubr.msk.bf16.gmra.mrb[16].mxu1 %vm2033_vm0, %v9914_v20  ;;  %9376 = vmatprep.mubr.msk.bf16.mxu0 %vm2033_vm0, %v9915_v21  ;;  %v9978_v20 = vld [vmem:[%s10228_s22 + $0x548] sm:$0xff]   ;;  %v9979_v21 = vld [vmem:[%s10228_s22 + $0x150] sm:$0xff]  }
  0x35   : > { %9632 = vmatprep.mubr.msk.bf16.mxu1 %vm2033_vm0, %v9916_v22  ;;  %v9980_v22 = vld [vmem:[%s10228_s22 + $0x550] sm:$0xff]  }
  0x3b   : > { %9377 = vmatmul.mubr.msk.bf16.gmra.mrb[20].mxu0 %vm2033_vm0, %v9917_v23  ;;  %v9981_v23 = vld [vmem:[%s10228_s22 + $0x158] sm:$0xff]  }
  0x3c   : > { %9633 = vmatmul.mubr.msk.bf16.gmra.mrb[20].mxu1 %vm2033_vm0, %v9918_v24  ;;  %9380 = vmatprep.mubr.msk.bf16.mxu0 %vm2033_vm0, %v9919_v25  ;;  %v9982_v24 = vld [vmem:[%s10228_s22 + $0x558] sm:$0xff]   ;;  %v9983_v25 = vld [vmem:[%s10228_s22 + $0x160] sm:$0xff]  }
  0x3d   : > { %9636 = vmatprep.mubr.msk.bf16.mxu1 %vm2033_vm0, %v9920_v26  ;;  %v9984_v26 = vld [vmem:[%s10228_s22 + $0x560] sm:$0xff]  }
  0x43   : > { %9381 = vmatmul.mubr.msk.bf16.gmra.mrb[24].mxu0 %vm2033_vm0, %v9921_v27  ;;  %v9985_v27 = vld [vmem:[%s10228_s22 + $0x168] sm:$0xff]  }
  0x44   : > { %9637 = vmatmul.mubr.msk.bf16.gmra.mrb[24].mxu1 %vm2033_vm0, %v9922_v28  ;;  %9384 = vmatprep.mubr.msk.bf16.mxu0 %vm2033_vm0, %v9923_v29  ;;  %v9986_v28 = vld [vmem:[%s10228_s22 + $0x568] sm:$0xff]   ;;  %v9987_v29 = vld [vmem:[%s10228_s22 + $0x170] sm:$0xff]  }
  0x45   : > { %9640 = vmatprep.mubr.msk.bf16.mxu1 %vm2033_vm0, %v9924_v30  ;;  %v9988_v30 = vld [vmem:[%s10228_s22 + $0x570] sm:$0xff]  }
  0x4b   : > { %9385 = vmatmul.mubr.msk.bf16.gmra.mrb[28].mxu0 %vm2033_vm0, %v9925_v31  ;;  %v9989_v31 = vld [vmem:[%s10228_s22 + $0x178] sm:$0xff]  }
  0x4c   : > { %9641 = vmatmul.mubr.msk.bf16.gmra.mrb[28].mxu1 %vm2033_vm0, %v9926_v32  ;;  %9388 = vmatprep.mubr.msk.bf16.mxu0 %vm2033_vm0, %v9927_v33  ;;  %v9990_v32 = vld [vmem:[%s10228_s22 + $0x578] sm:$0xff]   ;;  %v9991_v33 = vld [vmem:[%s10228_s22 + $0x180] sm:$0xff]  }
  0x4d   : > { %9644 = vmatprep.mubr.msk.bf16.mxu1 %vm2033_vm0, %v9928_v34  ;;  %v9992_v34 = vld [vmem:[%s10228_s22 + $0x580] sm:$0xff]  }
  0x53   : > { %9389 = vmatmul.mubr.msk.bf16.gmra.mrb[32].mxu0 %vm2033_vm0, %v9929_v35  ;;  %v9993_v35 = vld [vmem:[%s10228_s22 + $0x188] sm:$0xff]  }
  0x54   : > { %9645 = vmatmul.mubr.msk.bf16.gmra.mrb[32].mxu1 %vm2033_vm0, %v9930_v36  ;;  %9392 = vmatprep.mubr.msk.bf16.mxu0 %vm2033_vm0, %v9931_v37  ;;  %v9994_v36 = vld [vmem:[%s10228_s22 + $0x588] sm:$0xff]   ;;  %v9995_v37 = vld [vmem:[%s10228_s22 + $0x190] sm:$0xff]  }
  0x55   : > { %9648 = vmatprep.mubr.msk.bf16.mxu1 %vm2033_vm0, %v9932_v38  ;;  %v9996_v38 = vld [vmem:[%s10228_s22 + $0x590] sm:$0xff]  }
  0x5b   : > { %9393 = vmatmul.mubr.msk.bf16.gmra.mrb[36].mxu0 %vm2033_vm0, %v9933_v39  ;;  %v9997_v39 = vld [vmem:[%s10228_s22 + $0x198] sm:$0xff]  }
  0x5c   : > { %9649 = vmatmul.mubr.msk.bf16.gmra.mrb[36].mxu1 %vm2033_vm0, %v9934_v40  ;;  %9396 = vmatprep.mubr.msk.bf16.mxu0 %vm2033_vm0, %v9935_v41  ;;  %v9998_v40 = vld [vmem:[%s10228_s22 + $0x598] sm:$0xff]   ;;  %v9999_v41 = vld [vmem:[%s10228_s22 + $0x1a0] sm:$0xff]  }
  0x5d   : > { %9652 = vmatprep.mubr.msk.bf16.mxu1 %vm2033_vm0, %v9936_v42  ;;  %v10000_v42 = vld [vmem:[%s10228_s22 + $0x5a0] sm:$0xff]  }
  0x63   : > { %9397 = vmatmul.mubr.msk.bf16.gmra.mrb[40].mxu0 %vm2033_vm0, %v9937_v43  ;;  %v10001_v43 = vld [vmem:[%s10228_s22 + $0x1a8] sm:$0xff]  }
  0x64   : > { %9653 = vmatmul.mubr.msk.bf16.gmra.mrb[40].mxu1 %vm2033_vm0, %v9938_v44  ;;  %9400 = vmatprep.mubr.msk.bf16.mxu0 %vm2033_vm0, %v9939_v45  ;;  %v10002_v44 = vld [vmem:[%s10228_s22 + $0x5a8] sm:$0xff]   ;;  %v10003_v45 = vld [vmem:[%s10228_s22 + $0x1b0] sm:$0xff]  }
  0x65   : > { %9656 = vmatprep.mubr.msk.bf16.mxu1 %vm2033_vm0, %v9940_v46  ;;  %v10004_v46 = vld [vmem:[%s10228_s22 + $0x5b0] sm:$0xff]  }
  0x6b   : > { %9401 = vmatmul.mubr.msk.bf16.gmra.mrb[44].mxu0 %vm2033_vm0, %v9941_v47  ;;  %v10449_v47 = vld [vmem:[%s12321_s2] ss:$0 sm:$0xff] }
  0x6c   : > { %9657 = vmatmul.mubr.msk.bf16.gmra.mrb[44].mxu1 %vm2033_vm0, %v9942_v48  ;;  %9404 = vmatprep.mubr.msk.bf16.mxu0 %vm2033_vm0, %v9943_v49  ;;  %v10005_v48 = vld [vmem:[%s10228_s22 + $0x1b8] sm:$0xff]  }
  0x6d   : > { %9660 = vmatprep.mubr.msk.bf16.mxu1 %vm2033_vm0, %v9944_v50  ;;  %v10006_v50 = vld [vmem:[%s10228_s22 + $0x5b8] sm:$0xff]  }
  0x73   : > { %9405 = vmatmul.mubr.msk.bf16.gmra.mrb[48].mxu0 %vm2033_vm0, %v9945_v51  ;;  %v10007_v51 = vld [vmem:[%s10228_s22 + $0x1c0] sm:$0xff]  }
  0x74   : > { %9661 = vmatmul.mubr.msk.bf16.gmra.mrb[48].mxu1 %vm2033_vm0, %v9946_v52  ;;  %9408 = vmatprep.mubr.msk.bf16.mxu0 %vm2033_vm0, %v9947_v53 }
  0x75   : > { %9664 = vmatprep.mubr.msk.bf16.mxu1 %vm2033_vm0, %v9948_v54 }
  0x7b   : > { %9409 = vmatmul.mubr.msk.bf16.gmra.mrb[52].mxu0 %vm2033_vm0, %v9949_v55 }
  0x7c   : > { %9665 = vmatmul.mubr.msk.bf16.gmra.mrb[52].mxu1 %vm2033_vm0, %v9950_v56  ;;  %9412 = vmatprep.mubr.msk.bf16.mxu0 %vm2033_vm0, %v9951_v57 }
  0x7d   : > { %9668 = vmatprep.mubr.msk.bf16.mxu1 %vm2033_vm0, %v9952_v58 }
  0x83   : > { %9413 = vmatmul.mubr.msk.bf16.gmra.mrb[56].mxu0 %vm2033_vm0, %v9953_v59 }
  0x84   : > { %9669 = vmatmul.mubr.msk.bf16.gmra.mrb[56].mxu1 %vm2033_vm0, %v9954_v60  ;;  %9416 = vmatprep.mubr.msk.bf16.mxu0 %vm2033_vm0, %v9955_v61 }
  0x85   : > { %9672 = vmatprep.mubr.msk.bf16.mxu1 %vm2033_vm0, %v9956_v62 }
  0x8b   : > { %9417 = vmatmul.mubr.msk.bf16.gmra.mrb[60].mxu0 %vm2033_vm0, %v9957_v63 }
  0x8c   : > { %9673 = vmatmul.mubr.msk.bf16.gmra.mrb[60].mxu1 %vm2033_vm0, %v9958_v0  ;;  %9420 = vmatprep.mubr.msk.bf16.mxu0 %vm2033_vm0, %v9959_v1  ;;  %v10008_v0 = vld [vmem:[%s10228_s22 + $0x5c0] sm:$0xff]  }
  0x8d   : > { %9676 = vmatprep.mubr.msk.bf16.mxu1 %vm2033_vm0, %v9960_v2 }
  0x93   : > { %9421 = vmatmul.mubr.msk.bf16.gmra.mrb[64].mxu0 %vm2033_vm0, %v9961_v3 }
  0x94   : > { %9677 = vmatmul.mubr.msk.bf16.gmra.mrb[64].mxu1 %vm2033_vm0, %v9962_v4  ;;  %9424 = vmatprep.mubr.msk.bf16.mxu0 %vm2033_vm0, %v9963_v5 }
  0x95   : > { %9680 = vmatprep.mubr.msk.bf16.mxu1 %vm2033_vm0, %v9964_v6 }
  0x9b   : > { %9425 = vmatmul.mubr.msk.bf16.gmra.mrb[68].mxu0 %vm2033_vm0, %v9965_v7 }
  0x9c   : > { %9681 = vmatmul.mubr.msk.bf16.gmra.mrb[68].mxu1 %vm2033_vm0, %v9966_v8  ;;  %9428 = vmatprep.mubr.msk.bf16.mxu0 %vm2033_vm0, %v9967_v9 }
  0x9d   : > { %9684 = vmatprep.mubr.msk.bf16.mxu1 %vm2033_vm0, %v9968_v10 }
  0xa3   : > { %9429 = vmatmul.mubr.msk.bf16.gmra.mrb[72].mxu0 %vm2033_vm0, %v9969_v11 }
  0xa4   : > { %9685 = vmatmul.mubr.msk.bf16.gmra.mrb[72].mxu1 %vm2033_vm0, %v9970_v12  ;;  %9432 = vmatprep.mubr.msk.bf16.mxu0 %vm2033_vm0, %v9971_v13  ;;  %v10009_v12 = vld [vmem:[%s10228_s22 + $0x1c8] sm:$0xff]  }
  0xa5   : > { %9688 = vmatprep.mubr.msk.bf16.mxu1 %vm2033_vm0, %v9972_v14  ;;  %v10010_v14 = vld [vmem:[%s10228_s22 + $0x5c8] sm:$0xff]  }
  0xab   : > { %9433 = vmatmul.mubr.msk.bf16.gmra.mrb[76].mxu0 %vm2033_vm0, %v9973_v15  ;;  %v10011_v15 = vld [vmem:[%s10228_s22 + $0x1d0] sm:$0xff]  }
  0xac   : > { %9689 = vmatmul.mubr.msk.bf16.gmra.mrb[76].mxu1 %vm2033_vm0, %v9974_v16  ;;  %9436 = vmatprep.mubr.msk.bf16.mxu0 %vm2033_vm0, %v9975_v17 }
  0xad   : > { %9692 = vmatprep.mubr.msk.bf16.mxu1 %vm2033_vm0, %v9976_v18 }
  0xb3   : > { %9437 = vmatmul.mubr.msk.bf16.gmra.mrb[80].mxu0 %vm2033_vm0, %v9977_v19 }
  0xb4   : > { %9693 = vmatmul.mubr.msk.bf16.gmra.mrb[80].mxu1 %vm2033_vm0, %v9978_v20  ;;  %9440 = vmatprep.mubr.msk.bf16.mxu0 %vm2033_vm0, %v9979_v21 }
  0xb5   : > { %9696 = vmatprep.mubr.msk.bf16.mxu1 %vm2033_vm0, %v9980_v22 }
  0xbb   : > { %9441 = vmatmul.mubr.msk.bf16.gmra.mrb[84].mxu0 %vm2033_vm0, %v9981_v23 }
  0xbc   : > { %9697 = vmatmul.mubr.msk.bf16.gmra.mrb[84].mxu1 %vm2033_vm0, %v9982_v24  ;;  %9444 = vmatprep.mubr.msk.bf16.mxu0 %vm2033_vm0, %v9983_v25 }
  0xbd   : > { %9700 = vmatprep.mubr.msk.bf16.mxu1 %vm2033_vm0, %v9984_v26 }
  0xc3   : > { %9445 = vmatmul.mubr.msk.bf16.gmra.mrb[88].mxu0 %vm2033_vm0, %v9985_v27 }
  0xc4   : > { %9701 = vmatmul.mubr.msk.bf16.gmra.mrb[88].mxu1 %vm2033_vm0, %v9986_v28  ;;  %9448 = vmatprep.mubr.msk.bf16.mxu0 %vm2033_vm0, %v9987_v29  ;;  %v10012_v28 = vld [vmem:[%s10228_s22 + $0x5d0] sm:$0xff]  }
  0xc5   : > { %9704 = vmatprep.mubr.msk.bf16.mxu1 %vm2033_vm0, %v9988_v30 }
  0xcb   : > { %9449 = vmatmul.mubr.msk.bf16.gmra.mrb[92].mxu0 %vm2033_vm0, %v9989_v31 }
  0xcc   : > { %9705 = vmatmul.mubr.msk.bf16.gmra.mrb[92].mxu1 %vm2033_vm0, %v9990_v32  ;;  %9452 = vmatprep.mubr.msk.bf16.mxu0 %vm2033_vm0, %v9991_v33 }
  0xcd   : > { %9708 = vmatprep.mubr.msk.bf16.mxu1 %vm2033_vm0, %v9992_v34 }
  0xd3   : > { %9453 = vmatmul.mubr.msk.bf16.gmra.mrb[96].mxu0 %vm2033_vm0, %v9993_v35 }
  0xd4   : > { %9709 = vmatmul.mubr.msk.bf16.gmra.mrb[96].mxu1 %vm2033_vm0, %v9994_v36  ;;  %9456 = vmatprep.mubr.msk.bf16.mxu0 %vm2033_vm0, %v9995_v37 }
  0xd5   : > { %9712 = vmatprep.mubr.msk.bf16.mxu1 %vm2033_vm0, %v9996_v38 }
  0xdb   : > { %9457 = vmatmul.mubr.msk.bf16.gmra.mrb[100].mxu0 %vm2033_vm0, %v9997_v39 }
  0xdc   : > { %9713 = vmatmul.mubr.msk.bf16.gmra.mrb[100].mxu1 %vm2033_vm0, %v9998_v40  ;;  %9460 = vmatprep.mubr.msk.bf16.mxu0 %vm2033_vm0, %v9999_v41  ;;  %v10013_v40 = vld [vmem:[%s10228_s22 + $0x1d8] sm:$0xff]  }
  0xdd   : > { %9716 = vmatprep.mubr.msk.bf16.mxu1 %vm2033_vm0, %v10000_v42  ;;  %v10014_v42 = vld [vmem:[%s10228_s22 + $0x5d8] sm:$0xff]  }
  0xe3   : > { %9461 = vmatmul.mubr.msk.bf16.gmra.mrb[104].mxu0 %vm2033_vm0, %v10001_v43  ;;  %v10015_v43 = vld [vmem:[%s10228_s22 + $0x1e0] sm:$0xff]  }
  0xe4   : > { %9717 = vmatmul.mubr.msk.bf16.gmra.mrb[104].mxu1 %vm2033_vm0, %v10002_v44  ;;  %9464 = vmatprep.mubr.msk.bf16.mxu0 %vm2033_vm0, %v10003_v45 }
  0xe5   : > { %9720 = vmatprep.mubr.msk.bf16.mxu1 %vm2033_vm0, %v10004_v46 }
  0xe6   : > { %v9358_v49 = vpop.f32.mrb[0].mxu0 }
  0xe7   : > { %v2845_v52 = vadd.f32 %v9358_v49, %v10449_v47  ;;  %v9614_v53 = vpop.f32.mrb[0].mxu1  ;;  %v2836_v54 = vpop.f32.mrb[1].mxu0 }
  0xe8   : > { %v3869_v55 = vadd.f32 %v9614_v53, %v10449_v47  ;;  %v2837_v56 = vadd.f32 %v10449_v47, %v2836_v54  ;;  %v3860_v57 = vpop.f32.mrb[1].mxu1  ;;  %v9359_v58 = vpop.f32.mrb[2].mxu0 }
  0xe9   : > { %v8587_v59 = vpack.c.bf16 %v2845_v52, %v2845_v52  ;;  %v3861_v60 = vadd.f32 %v10449_v47, %v3860_v57  ;;  %v2848_v61 = vadd.f32 %v9359_v58, %v10449_v47  ;;  %v9615_v62 = vpop.f32.mrb[2].mxu1  ;;  %v2839_v63 = vpop.f32.mrb[3].mxu0  ;;  %v10016_v57 = vld [vmem:[%s10228_s22 + $0x5e0] sm:$0xff]  }
  0xea   : > { %v8843_v1 = vpack.c.bf16 %v3869_v55, %v3869_v55  ;;  %v8585_v2 = vpack.c.bf16 %v2837_v56, %v2837_v56  ;;  %v3872_v3 = vadd.f32 %v9615_v62, %v10449_v47  ;;  %v2840_v4 = vadd.f32 %v10449_v47, %v2839_v63  ;;  %v3863_v5 = vpop.f32.mrb[3].mxu1 }
  0xeb   : > { %6934 = vst.msk [vmem:[%s10464_s27 + $0x8] sm:$0xf] %vm6931_vm1, %v8587_v59  ;;  %v8841_v6 = vpack.c.bf16 %v3861_v60, %v3861_v60  ;;  %v8588_v7 = vpack.c.bf16 %v2848_v61, %v2848_v61  ;;  %v3864_v8 = vadd.f32 %v10449_v47, %v3863_v5  ;;  %9465 = vmatmul.mubr.msk.bf16.gmra.mrb[108].mxu0 %vm2033_vm0, %v10005_v48 }
  0xec   : > { %7190 = vst.msk [vmem:[%s10464_s27 + $0x408] sm:$0xf] %vm6931_vm1, %v8843_v1  ;;  %6932 = vst.msk [vmem:[%s10464_s27] sm:$0xf] %vm6931_vm1, %v8585_v2  ;;  %v8844_v9 = vpack.c.bf16 %v3872_v3, %v3872_v3  ;;  %v8586_v10 = vpack.c.bf16 %v2840_v4, %v2840_v4  ;;  %9721 = vmatmul.mubr.msk.bf16.gmra.mrb[108].mxu1 %vm2033_vm0, %v10006_v50  ;;  %9468 = vmatprep.mubr.msk.bf16.mxu0 %vm2033_vm0, %v10007_v51 }
  0xed   : > { %7188 = vst.msk [vmem:[%s10464_s27 + $0x400] sm:$0xf] %vm6931_vm1, %v8841_v6  ;;  %6935 = vst.msk [vmem:[%s10464_s27 + $0xc] sm:$0xf] %vm6931_vm1, %v8588_v7  ;;  %v8842_v11 = vpack.c.bf16 %v3864_v8, %v3864_v8  ;;  %9724 = vmatprep.mubr.msk.bf16.mxu1 %vm2033_vm0, %v10008_v0 }
  0xee   : > { %7191 = vst.msk [vmem:[%s10464_s27 + $0x40c] sm:$0xf] %vm6931_vm1, %v8844_v9  ;;  %6933 = vst.msk [vmem:[%s10464_s27 + $0x4] sm:$0xf] %vm6931_vm1, %v8586_v10  ;;  %v9362_v13 = vpop.f32.mrb[4].mxu0  ;;  %v10017_v9 = vld [vmem:[%s10228_s22 + $0x1e8] sm:$0xff]  }
  0xef   : > { %7189 = vst.msk [vmem:[%s10464_s27 + $0x404] sm:$0xf] %vm6931_vm1, %v8842_v11  ;;  %v2861_v16 = vadd.f32 %v9362_v13, %v10449_v47  ;;  %v9618_v17 = vpop.f32.mrb[4].mxu1  ;;  %v2852_v18 = vpop.f32.mrb[5].mxu0 }
  0xf0   : > { %v3885_v19 = vadd.f32 %v9618_v17, %v10449_v47  ;;  %v2853_v20 = vadd.f32 %v10449_v47, %v2852_v18  ;;  %v3876_v21 = vpop.f32.mrb[5].mxu1  ;;  %v9363_v22 = vpop.f32.mrb[6].mxu0 }
  0xf1   : > { %v8591_v23 = vpack.c.bf16 %v2861_v16, %v2861_v16  ;;  %v3877_v24 = vadd.f32 %v10449_v47, %v3876_v21  ;;  %v2864_v25 = vadd.f32 %v9363_v22, %v10449_v47  ;;  %v9619_v26 = vpop.f32.mrb[6].mxu1  ;;  %v2855_v27 = vpop.f32.mrb[7].mxu0  ;;  %v10020_v21 = vld [vmem:[%s10228_s22 + $0x5f0] sm:$0xff]  }
  0xf2   : > { %v8847_v29 = vpack.c.bf16 %v3885_v19, %v3885_v19  ;;  %v8589_v30 = vpack.c.bf16 %v2853_v20, %v2853_v20  ;;  %v3888_v31 = vadd.f32 %v9619_v26, %v10449_v47  ;;  %v2856_v32 = vadd.f32 %v10449_v47, %v2855_v27  ;;  %v3879_v33 = vpop.f32.mrb[7].mxu1 }
  0xf3   : > { %6938 = vst.msk [vmem:[%s10464_s27 + $0x18] sm:$0xf] %vm6931_vm1, %v8591_v23  ;;  %v8845_v34 = vpack.c.bf16 %v3877_v24, %v3877_v24  ;;  %v8592_v35 = vpack.c.bf16 %v2864_v25, %v2864_v25  ;;  %v3880_v36 = vadd.f32 %v10449_v47, %v3879_v33  ;;  %9469 = vmatmul.mubr.msk.bf16.gmra.mrb[112].mxu0 %vm2033_vm0, %v10009_v12 }
  0xf4   : > { %7194 = vst.msk [vmem:[%s10464_s27 + $0x418] sm:$0xf] %vm6931_vm1, %v8847_v29  ;;  %6936 = vst.msk [vmem:[%s10464_s27 + $0x10] sm:$0xf] %vm6931_vm1, %v8589_v30  ;;  %v8848_v37 = vpack.c.bf16 %v3888_v31, %v3888_v31  ;;  %v8590_v38 = vpack.c.bf16 %v2856_v32, %v2856_v32  ;;  %9725 = vmatmul.mubr.msk.bf16.gmra.mrb[112].mxu1 %vm2033_vm0, %v10010_v14  ;;  %9472 = vmatprep.mubr.msk.bf16.mxu0 %vm2033_vm0, %v10011_v15  ;;  %v10018_v14 = vld [vmem:[%s10228_s22 + $0x5e8] sm:$0xff]   ;;  %v10019_v15 = vld [vmem:[%s10228_s22 + $0x1f0] sm:$0xff]  }
  0xf5   : > { %7192 = vst.msk [vmem:[%s10464_s27 + $0x410] sm:$0xf] %vm6931_vm1, %v8845_v34  ;;  %6939 = vst.msk [vmem:[%s10464_s27 + $0x1c] sm:$0xf] %vm6931_vm1, %v8592_v35  ;;  %v8846_v39 = vpack.c.bf16 %v3880_v36, %v3880_v36  ;;  %9728 = vmatprep.mubr.msk.bf16.mxu1 %vm2033_vm0, %v10012_v28 }
  0xf6   : > { %7195 = vst.msk [vmem:[%s10464_s27 + $0x41c] sm:$0xf] %vm6931_vm1, %v8848_v37  ;;  %6937 = vst.msk [vmem:[%s10464_s27 + $0x14] sm:$0xf] %vm6931_vm1, %v8590_v38  ;;  %v9366_v41 = vpop.f32.mrb[8].mxu0  ;;  %v10021_v37 = vld [vmem:[%s10228_s22 + $0x1f8] sm:$0xff]  }
  0xf7   : > { %7193 = vst.msk [vmem:[%s10464_s27 + $0x414] sm:$0xf] %vm6931_vm1, %v8846_v39  ;;  %v2877_v44 = vadd.f32 %v9366_v41, %v10449_v47  ;;  %v9622_v45 = vpop.f32.mrb[8].mxu1  ;;  %v2868_v46 = vpop.f32.mrb[9].mxu0 }
  0xf8   : > { %v3901_v48 = vadd.f32 %v9622_v45, %v10449_v47  ;;  %v2869_v49 = vadd.f32 %v10449_v47, %v2868_v46  ;;  %v3892_v50 = vpop.f32.mrb[9].mxu1  ;;  %v9367_v51 = vpop.f32.mrb[10].mxu0 }
  0xf9   : > { %v8595_v52 = vpack.c.bf16 %v2877_v44, %v2877_v44  ;;  %v3893_v53 = vadd.f32 %v10449_v47, %v3892_v50  ;;  %v2880_v54 = vadd.f32 %v9367_v51, %v10449_v47  ;;  %v9623_v55 = vpop.f32.mrb[10].mxu1  ;;  %v2871_v56 = vpop.f32.mrb[11].mxu0  ;;  %v10024_v50 = vld [vmem:[%s10228_s22 + $0x600] sm:$0xff]  }
  0xfa   : > { %v8851_v58 = vpack.c.bf16 %v3901_v48, %v3901_v48  ;;  %v8593_v59 = vpack.c.bf16 %v2869_v49, %v2869_v49  ;;  %v3904_v60 = vadd.f32 %v9623_v55, %v10449_v47  ;;  %v2872_v61 = vadd.f32 %v10449_v47, %v2871_v56  ;;  %v3895_v62 = vpop.f32.mrb[11].mxu1 }
  0xfb   : > { %6942 = vst.msk [vmem:[%s10464_s27 + $0x28] sm:$0xf] %vm6931_vm1, %v8595_v52  ;;  %v8849_v63 = vpack.c.bf16 %v3893_v53, %v3893_v53  ;;  %v8596_v0 = vpack.c.bf16 %v2880_v54, %v2880_v54  ;;  %v3896_v1 = vadd.f32 %v10449_v47, %v3895_v62  ;;  %9473 = vmatmul.mubr.msk.bf16.gmra.mrb[116].mxu0 %vm2033_vm0, %v10013_v40 }
  0xfc   : > { %7198 = vst.msk [vmem:[%s10464_s27 + $0x428] sm:$0xf] %vm6931_vm1, %v8851_v58  ;;  %6940 = vst.msk [vmem:[%s10464_s27 + $0x20] sm:$0xf] %vm6931_vm1, %v8593_v59  ;;  %v8852_v2 = vpack.c.bf16 %v3904_v60, %v3904_v60  ;;  %v8594_v3 = vpack.c.bf16 %v2872_v61, %v2872_v61  ;;  %9729 = vmatmul.mubr.msk.bf16.gmra.mrb[116].mxu1 %vm2033_vm0, %v10014_v42  ;;  %9476 = vmatprep.mubr.msk.bf16.mxu0 %vm2033_vm0, %v10015_v43  ;;  %v10022_v42 = vld [vmem:[%s10228_s22 + $0x5f8] sm:$0xff]   ;;  %v10023_v43 = vld [vmem:[%s10228_s22 + $0x200] sm:$0xff]  }
  0xfd   : > { %7196 = vst.msk [vmem:[%s10464_s27 + $0x420] sm:$0xf] %vm6931_vm1, %v8849_v63  ;;  %6943 = vst.msk [vmem:[%s10464_s27 + $0x2c] sm:$0xf] %vm6931_vm1, %v8596_v0  ;;  %v8850_v4 = vpack.c.bf16 %v3896_v1, %v3896_v1  ;;  %9732 = vmatprep.mubr.msk.bf16.mxu1 %vm2033_vm0, %v10016_v57 }
  0xfe   : > { %7199 = vst.msk [vmem:[%s10464_s27 + $0x42c] sm:$0xf] %vm6931_vm1, %v8852_v2  ;;  %6941 = vst.msk [vmem:[%s10464_s27 + $0x24] sm:$0xf] %vm6931_vm1, %v8594_v3  ;;  %v9370_v5 = vpop.f32.mrb[12].mxu0  ;;  %v10025_v2 = vld [vmem:[%s10228_s22 + $0x208] sm:$0xff]  }
  0xff   : > { %7197 = vst.msk [vmem:[%s10464_s27 + $0x424] sm:$0xf] %vm6931_vm1, %v8850_v4  ;;  %v2893_v6 = vadd.f32 %v9370_v5, %v10449_v47  ;;  %v9626_v7 = vpop.f32.mrb[12].mxu1  ;;  %v2884_v8 = vpop.f32.mrb[13].mxu0 }
 0x100   : > { %v3917_v10 = vadd.f32 %v9626_v7, %v10449_v47  ;;  %v2885_v11 = vadd.f32 %v10449_v47, %v2884_v8  ;;  %v3908_v12 = vpop.f32.mrb[13].mxu1  ;;  %v9371_v13 = vpop.f32.mrb[14].mxu0  ;;  %v10026_v7 = vld [vmem:[%s10228_s22 + $0x608] sm:$0xff]   ;;  %v10027_v8 = vld [vmem:[%s10228_s22 + $0x210] sm:$0xff]  }
 0x101   : > { %v8599_v16 = vpack.c.bf16 %v2893_v6, %v2893_v6  ;;  %v3909_v17 = vadd.f32 %v10449_v47, %v3908_v12  ;;  %v2896_v18 = vadd.f32 %v9371_v13, %v10449_v47  ;;  %v9627_v19 = vpop.f32.mrb[14].mxu1  ;;  %v2887_v20 = vpop.f32.mrb[15].mxu0 }
 0x102   : > { %v8855_v22 = vpack.c.bf16 %v3917_v10, %v3917_v10  ;;  %v8597_v23 = vpack.c.bf16 %v2885_v11, %v2885_v11  ;;  %v3920_v24 = vadd.f32 %v9627_v19, %v10449_v47  ;;  %v2888_v25 = vadd.f32 %v10449_v47, %v2887_v20  ;;  %v3911_v26 = vpop.f32.mrb[15].mxu1 }
 0x103   : > { %6946 = vst.msk [vmem:[%s10464_s27 + $0x38] sm:$0xf] %vm6931_vm1, %v8599_v16  ;;  %v8853_v27 = vpack.c.bf16 %v3909_v17, %v3909_v17  ;;  %v8600_v28 = vpack.c.bf16 %v2896_v18, %v2896_v18  ;;  %v3912_v29 = vadd.f32 %v10449_v47, %v3911_v26  ;;  %9477 = vmatmul.mubr.msk.bf16.gmra.mrb[120].mxu0 %vm2033_vm0, %v10017_v9 }
 0x104   : > { %7202 = vst.msk [vmem:[%s10464_s27 + $0x438] sm:$0xf] %vm6931_vm1, %v8855_v22  ;;  %6944 = vst.msk [vmem:[%s10464_s27 + $0x30] sm:$0xf] %vm6931_vm1, %v8597_v23  ;;  %v8856_v30 = vpack.c.bf16 %v3920_v24, %v3920_v24  ;;  %v8598_v31 = vpack.c.bf16 %v2888_v25, %v2888_v25  ;;  %9733 = vmatmul.mubr.msk.bf16.gmra.mrb[120].mxu1 %vm2033_vm0, %v10018_v14  ;;  %9480 = vmatprep.mubr.msk.bf16.mxu0 %vm2033_vm0, %v10019_v15  ;;  %v10028_v14 = vld [vmem:[%s10228_s22 + $0x610] sm:$0xff]  }
 0x105   : > { %7200 = vst.msk [vmem:[%s10464_s27 + $0x430] sm:$0xf] %vm6931_vm1, %v8853_v27  ;;  %6947 = vst.msk [vmem:[%s10464_s27 + $0x3c] sm:$0xf] %vm6931_vm1, %v8600_v28  ;;  %v8854_v32 = vpack.c.bf16 %v3912_v29, %v3912_v29  ;;  %9736 = vmatprep.mubr.msk.bf16.mxu1 %vm2033_vm0, %v10020_v21 }
 0x106   : > { %7203 = vst.msk [vmem:[%s10464_s27 + $0x43c] sm:$0xf] %vm6931_vm1, %v8856_v30  ;;  %6945 = vst.msk [vmem:[%s10464_s27 + $0x34] sm:$0xf] %vm6931_vm1, %v8598_v31  ;;  %v9374_v33 = vpop.f32.mrb[16].mxu0  ;;  %v10029_v30 = vld [vmem:[%s10228_s22 + $0x218] sm:$0xff]  }
 0x107   : > { %7201 = vst.msk [vmem:[%s10464_s27 + $0x434] sm:$0xf] %vm6931_vm1, %v8854_v32  ;;  %v2909_v34 = vadd.f32 %v9374_v33, %v10449_v47  ;;  %v9630_v35 = vpop.f32.mrb[16].mxu1  ;;  %v2900_v36 = vpop.f32.mrb[17].mxu0 }
 0x108   : > { %v3933_v38 = vadd.f32 %v9630_v35, %v10449_v47  ;;  %v2901_v39 = vadd.f32 %v10449_v47, %v2900_v36  ;;  %v3924_v40 = vpop.f32.mrb[17].mxu1  ;;  %v9375_v41 = vpop.f32.mrb[18].mxu0  ;;  %v10030_v35 = vld [vmem:[%s10228_s22 + $0x618] sm:$0xff]   ;;  %v10031_v36 = vld [vmem:[%s10228_s22 + $0x220] sm:$0xff]  }
 0x109   : > { %v8603_v44 = vpack.c.bf16 %v2909_v34, %v2909_v34  ;;  %v3925_v45 = vadd.f32 %v10449_v47, %v3924_v40  ;;  %v2912_v46 = vadd.f32 %v9375_v41, %v10449_v47  ;;  %v9631_v48 = vpop.f32.mrb[18].mxu1  ;;  %v2903_v49 = vpop.f32.mrb[19].mxu0 }
 0x10a   : > { %v8859_v51 = vpack.c.bf16 %v3933_v38, %v3933_v38  ;;  %v8601_v52 = vpack.c.bf16 %v2901_v39, %v2901_v39  ;;  %v3936_v53 = vadd.f32 %v9631_v48, %v10449_v47  ;;  %v2904_v54 = vadd.f32 %v10449_v47, %v2903_v49  ;;  %v3927_v55 = vpop.f32.mrb[19].mxu1 }
 0x10b   : > { %6950 = vst.msk [vmem:[%s10464_s27 + $0x48] sm:$0xf] %vm6931_vm1, %v8603_v44  ;;  %v8857_v56 = vpack.c.bf16 %v3925_v45, %v3925_v45  ;;  %v8604_v57 = vpack.c.bf16 %v2912_v46, %v2912_v46  ;;  %v3928_v58 = vadd.f32 %v10449_v47, %v3927_v55  ;;  %9481 = vmatmul.mubr.msk.bf16.gmra.mrb[124].mxu0 %vm2033_vm0, %v10021_v37 }
 0x10c   : > { %7206 = vst.msk [vmem:[%s10464_s27 + $0x448] sm:$0xf] %vm6931_vm1, %v8859_v51  ;;  %6948 = vst.msk [vmem:[%s10464_s27 + $0x40] sm:$0xf] %vm6931_vm1, %v8601_v52  ;;  %v8860_v59 = vpack.c.bf16 %v3936_v53, %v3936_v53  ;;  %v8602_v60 = vpack.c.bf16 %v2904_v54, %v2904_v54  ;;  %9737 = vmatmul.mubr.msk.bf16.gmra.mrb[124].mxu1 %vm2033_vm0, %v10022_v42  ;;  %9484 = vmatprep.mubr.msk.bf16.mxu0 %vm2033_vm0, %v10023_v43  ;;  %v10032_v42 = vld [vmem:[%s10228_s22 + $0x620] sm:$0xff]  }
 0x10d   : > { %7204 = vst.msk [vmem:[%s10464_s27 + $0x440] sm:$0xf] %vm6931_vm1, %v8857_v56  ;;  %6951 = vst.msk [vmem:[%s10464_s27 + $0x4c] sm:$0xf] %vm6931_vm1, %v8604_v57  ;;  %v8858_v61 = vpack.c.bf16 %v3928_v58, %v3928_v58  ;;  %9740 = vmatprep.mubr.msk.bf16.mxu1 %vm2033_vm0, %v10024_v50 }
 0x10e   : > { %7207 = vst.msk [vmem:[%s10464_s27 + $0x44c] sm:$0xf] %vm6931_vm1, %v8860_v59  ;;  %6949 = vst.msk [vmem:[%s10464_s27 + $0x44] sm:$0xf] %vm6931_vm1, %v8602_v60  ;;  %v9378_v62 = vpop.f32.mrb[20].mxu0  ;;  %v10033_v59 = vld [vmem:[%s10228_s22 + $0x228] sm:$0xff]  }
 0x10f   : > { %7205 = vst.msk [vmem:[%s10464_s27 + $0x444] sm:$0xf] %vm6931_vm1, %v8858_v61  ;;  %v2925_v63 = vadd.f32 %v9378_v62, %v10449_v47  ;;  %v9634_v0 = vpop.f32.mrb[20].mxu1  ;;  %v2916_v1 = vpop.f32.mrb[21].mxu0 }
 0x110   : > { %v3949_v3 = vadd.f32 %v9634_v0, %v10449_v47  ;;  %v2917_v4 = vadd.f32 %v10449_v47, %v2916_v1  ;;  %v3940_v5 = vpop.f32.mrb[21].mxu1  ;;  %v9379_v6 = vpop.f32.mrb[22].mxu0  ;;  %v10034_v0 = vld [vmem:[%s10228_s22 + $0x628] sm:$0xff]   ;;  %v10035_v1 = vld [vmem:[%s10228_s22 + $0x230] sm:$0xff]  }
 0x111   : > { %v8607_v9 = vpack.c.bf16 %v2925_v63, %v2925_v63  ;;  %v3941_v10 = vadd.f32 %v10449_v47, %v3940_v5  ;;  %v2928_v11 = vadd.f32 %v9379_v6, %v10449_v47  ;;  %v9635_v12 = vpop.f32.mrb[22].mxu1  ;;  %v2919_v13 = vpop.f32.mrb[23].mxu0 }
 0x112   : > { %v8863_v15 = vpack.c.bf16 %v3949_v3, %v3949_v3  ;;  %v8605_v16 = vpack.c.bf16 %v2917_v4, %v2917_v4  ;;  %v3952_v17 = vadd.f32 %v9635_v12, %v10449_v47  ;;  %v2920_v18 = vadd.f32 %v10449_v47, %v2919_v13  ;;  %v3943_v19 = vpop.f32.mrb[23].mxu1 }
 0x113   : > { %6954 = vst.msk [vmem:[%s10464_s27 + $0x58] sm:$0xf] %vm6931_vm1, %v8607_v9  ;;  %v8861_v20 = vpack.c.bf16 %v3941_v10, %v3941_v10  ;;  %v8608_v21 = vpack.c.bf16 %v2928_v11, %v2928_v11  ;;  %v3944_v22 = vadd.f32 %v10449_v47, %v3943_v19  ;;  %9485 = vmatmul.mubr.msk.bf16.gmra.mrb[128].mxu0 %vm2033_vm0, %v10025_v2 }
 0x114   : > { %7210 = vst.msk [vmem:[%s10464_s27 + $0x458] sm:$0xf] %vm6931_vm1, %v8863_v15  ;;  %6952 = vst.msk [vmem:[%s10464_s27 + $0x50] sm:$0xf] %vm6931_vm1, %v8605_v16  ;;  %v8864_v23 = vpack.c.bf16 %v3952_v17, %v3952_v17  ;;  %v8606_v24 = vpack.c.bf16 %v2920_v18, %v2920_v18  ;;  %9741 = vmatmul.mubr.msk.bf16.gmra.mrb[128].mxu1 %vm2033_vm0, %v10026_v7  ;;  %9488 = vmatprep.mubr.msk.bf16.mxu0 %vm2033_vm0, %v10027_v8  ;;  %v10036_v7 = vld [vmem:[%s10228_s22 + $0x630] sm:$0xff]  }
 0x115   : > { %7208 = vst.msk [vmem:[%s10464_s27 + $0x450] sm:$0xf] %vm6931_vm1, %v8861_v20  ;;  %6955 = vst.msk [vmem:[%s10464_s27 + $0x5c] sm:$0xf] %vm6931_vm1, %v8608_v21  ;;  %v8862_v25 = vpack.c.bf16 %v3944_v22, %v3944_v22  ;;  %9744 = vmatprep.mubr.msk.bf16.mxu1 %vm2033_vm0, %v10028_v14 }
 0x116   : > { %7211 = vst.msk [vmem:[%s10464_s27 + $0x45c] sm:$0xf] %vm6931_vm1, %v8864_v23  ;;  %6953 = vst.msk [vmem:[%s10464_s27 + $0x54] sm:$0xf] %vm6931_vm1, %v8606_v24  ;;  %v9382_v26 = vpop.f32.mrb[24].mxu0  ;;  %v10037_v23 = vld [vmem:[%s10228_s22 + $0x238] sm:$0xff]  }
 0x117   : > { %7209 = vst.msk [vmem:[%s10464_s27 + $0x454] sm:$0xf] %vm6931_vm1, %v8862_v25  ;;  %v2941_v27 = vadd.f32 %v9382_v26, %v10449_v47  ;;  %v9638_v28 = vpop.f32.mrb[24].mxu1  ;;  %v2932_v29 = vpop.f32.mrb[25].mxu0 }
 0x118   : > { %v3965_v31 = vadd.f32 %v9638_v28, %v10449_v47  ;;  %v2933_v32 = vadd.f32 %v10449_v47, %v2932_v29  ;;  %v3956_v33 = vpop.f32.mrb[25].mxu1  ;;  %v9383_v34 = vpop.f32.mrb[26].mxu0  ;;  %v10038_v28 = vld [vmem:[%s10228_s22 + $0x638] sm:$0xff]   ;;  %v10039_v29 = vld [vmem:[%s10228_s22 + $0x240] sm:$0xff]  }
 0x119   : > { %v8611_v37 = vpack.c.bf16 %v2941_v27, %v2941_v27  ;;  %v3957_v38 = vadd.f32 %v10449_v47, %v3956_v33  ;;  %v2944_v39 = vadd.f32 %v9383_v34, %v10449_v47  ;;  %v9639_v40 = vpop.f32.mrb[26].mxu1  ;;  %v2935_v41 = vpop.f32.mrb[27].mxu0 }
 0x11a   : > { %v8867_v43 = vpack.c.bf16 %v3965_v31, %v3965_v31  ;;  %v8609_v44 = vpack.c.bf16 %v2933_v32, %v2933_v32  ;;  %v3968_v45 = vadd.f32 %v9639_v40, %v10449_v47  ;;  %v2936_v46 = vadd.f32 %v10449_v47, %v2935_v41  ;;  %v3959_v48 = vpop.f32.mrb[27].mxu1 }
 0x11b   : > { %6958 = vst.msk [vmem:[%s10464_s27 + $0x68] sm:$0xf] %vm6931_vm1, %v8611_v37  ;;  %v8865_v49 = vpack.c.bf16 %v3957_v38, %v3957_v38  ;;  %v8612_v50 = vpack.c.bf16 %v2944_v39, %v2944_v39  ;;  %v3960_v51 = vadd.f32 %v10449_v47, %v3959_v48  ;;  %9489 = vmatmul.mubr.msk.bf16.gmra.mrb[132].mxu0 %vm2033_vm0, %v10029_v30 }
 0x11c   : > { %7214 = vst.msk [vmem:[%s10464_s27 + $0x468] sm:$0xf] %vm6931_vm1, %v8867_v43  ;;  %6956 = vst.msk [vmem:[%s10464_s27 + $0x60] sm:$0xf] %vm6931_vm1, %v8609_v44  ;;  %v8868_v52 = vpack.c.bf16 %v3968_v45, %v3968_v45  ;;  %v8610_v53 = vpack.c.bf16 %v2936_v46, %v2936_v46  ;;  %9745 = vmatmul.mubr.msk.bf16.gmra.mrb[132].mxu1 %vm2033_vm0, %v10030_v35  ;;  %9492 = vmatprep.mubr.msk.bf16.mxu0 %vm2033_vm0, %v10031_v36  ;;  %v10040_v35 = vld [vmem:[%s10228_s22 + $0x640] sm:$0xff]  }
 0x11d   : > { %7212 = vst.msk [vmem:[%s10464_s27 + $0x460] sm:$0xf] %vm6931_vm1, %v8865_v49  ;;  %6959 = vst.msk [vmem:[%s10464_s27 + $0x6c] sm:$0xf] %vm6931_vm1, %v8612_v50  ;;  %v8866_v54 = vpack.c.bf16 %v3960_v51, %v3960_v51  ;;  %9748 = vmatprep.mubr.msk.bf16.mxu1 %vm2033_vm0, %v10032_v42 }
 0x11e   : > { %7215 = vst.msk [vmem:[%s10464_s27 + $0x46c] sm:$0xf] %vm6931_vm1, %v8868_v52  ;;  %6957 = vst.msk [vmem:[%s10464_s27 + $0x64] sm:$0xf] %vm6931_vm1, %v8610_v53  ;;  %v9386_v55 = vpop.f32.mrb[28].mxu0  ;;  %v10041_v52 = vld [vmem:[%s10228_s22 + $0x248] sm:$0xff]  }
 0x11f   : > { %7213 = vst.msk [vmem:[%s10464_s27 + $0x464] sm:$0xf] %vm6931_vm1, %v8866_v54  ;;  %v2957_v56 = vadd.f32 %v9386_v55, %v10449_v47  ;;  %v9642_v57 = vpop.f32.mrb[28].mxu1  ;;  %v2948_v58 = vpop.f32.mrb[29].mxu0 }
 0x120   : > { %v3981_v60 = vadd.f32 %v9642_v57, %v10449_v47  ;;  %v2949_v61 = vadd.f32 %v10449_v47, %v2948_v58  ;;  %v3972_v62 = vpop.f32.mrb[29].mxu1  ;;  %v9387_v63 = vpop.f32.mrb[30].mxu0  ;;  %v10042_v57 = vld [vmem:[%s10228_s22 + $0x648] sm:$0xff]   ;;  %v10043_v58 = vld [vmem:[%s10228_s22 + $0x250] sm:$0xff]  }
 0x121   : > { %v8615_v2 = vpack.c.bf16 %v2957_v56, %v2957_v56  ;;  %v3973_v3 = vadd.f32 %v10449_v47, %v3972_v62  ;;  %v2960_v4 = vadd.f32 %v9387_v63, %v10449_v47  ;;  %v9643_v5 = vpop.f32.mrb[30].mxu1  ;;  %v2951_v6 = vpop.f32.mrb[31].mxu0 }
 0x122   : > { %v8871_v8 = vpack.c.bf16 %v3981_v60, %v3981_v60  ;;  %v8613_v9 = vpack.c.bf16 %v2949_v61, %v2949_v61  ;;  %v3984_v10 = vadd.f32 %v9643_v5, %v10449_v47  ;;  %v2952_v11 = vadd.f32 %v10449_v47, %v2951_v6  ;;  %v3975_v12 = vpop.f32.mrb[31].mxu1 }
 0x123   : > { %6962 = vst.msk [vmem:[%s10464_s27 + $0x78] sm:$0xf] %vm6931_vm1, %v8615_v2  ;;  %v8869_v13 = vpack.c.bf16 %v3973_v3, %v3973_v3  ;;  %v8616_v14 = vpack.c.bf16 %v2960_v4, %v2960_v4  ;;  %v3976_v15 = vadd.f32 %v10449_v47, %v3975_v12  ;;  %9493 = vmatmul.mubr.msk.bf16.gmra.mrb[136].mxu0 %vm2033_vm0, %v10033_v59 }
 0x124   : > { %7218 = vst.msk [vmem:[%s10464_s27 + $0x478] sm:$0xf] %vm6931_vm1, %v8871_v8  ;;  %6960 = vst.msk [vmem:[%s10464_s27 + $0x70] sm:$0xf] %vm6931_vm1, %v8613_v9  ;;  %v8872_v16 = vpack.c.bf16 %v3984_v10, %v3984_v10  ;;  %v8614_v17 = vpack.c.bf16 %v2952_v11, %v2952_v11  ;;  %9749 = vmatmul.mubr.msk.bf16.gmra.mrb[136].mxu1 %vm2033_vm0, %v10034_v0  ;;  %9496 = vmatprep.mubr.msk.bf16.mxu0 %vm2033_vm0, %v10035_v1  ;;  %v10044_v0 = vld [vmem:[%s10228_s22 + $0x650] sm:$0xff]  }
 0x125   : > { %7216 = vst.msk [vmem:[%s10464_s27 + $0x470] sm:$0xf] %vm6931_vm1, %v8869_v13  ;;  %6963 = vst.msk [vmem:[%s10464_s27 + $0x7c] sm:$0xf] %vm6931_vm1, %v8616_v14  ;;  %v8870_v18 = vpack.c.bf16 %v3976_v15, %v3976_v15  ;;  %9752 = vmatprep.mubr.msk.bf16.mxu1 %vm2033_vm0, %v10036_v7 }
 0x126   : > { %7219 = vst.msk [vmem:[%s10464_s27 + $0x47c] sm:$0xf] %vm6931_vm1, %v8872_v16  ;;  %6961 = vst.msk [vmem:[%s10464_s27 + $0x74] sm:$0xf] %vm6931_vm1, %v8614_v17  ;;  %v9390_v19 = vpop.f32.mrb[32].mxu0  ;;  %v10045_v16 = vld [vmem:[%s10228_s22 + $0x258] sm:$0xff]  }
 0x127   : > { %7217 = vst.msk [vmem:[%s10464_s27 + $0x474] sm:$0xf] %vm6931_vm1, %v8870_v18  ;;  %v2973_v20 = vadd.f32 %v9390_v19, %v10449_v47  ;;  %v9646_v21 = vpop.f32.mrb[32].mxu1  ;;  %v2964_v22 = vpop.f32.mrb[33].mxu0 }
 0x128   : > { %v3997_v24 = vadd.f32 %v9646_v21, %v10449_v47  ;;  %v2965_v25 = vadd.f32 %v10449_v47, %v2964_v22  ;;  %v3988_v26 = vpop.f32.mrb[33].mxu1  ;;  %v9391_v27 = vpop.f32.mrb[34].mxu0  ;;  %v10046_v21 = vld [vmem:[%s10228_s22 + $0x658] sm:$0xff]   ;;  %v10047_v22 = vld [vmem:[%s10228_s22 + $0x260] sm:$0xff]  }
 0x129   : > { %v8619_v30 = vpack.c.bf16 %v2973_v20, %v2973_v20  ;;  %v3989_v31 = vadd.f32 %v10449_v47, %v3988_v26  ;;  %v2976_v32 = vadd.f32 %v9391_v27, %v10449_v47  ;;  %v9647_v33 = vpop.f32.mrb[34].mxu1  ;;  %v2967_v34 = vpop.f32.mrb[35].mxu0 }
 0x12a   : > { %v8875_v36 = vpack.c.bf16 %v3997_v24, %v3997_v24  ;;  %v8617_v37 = vpack.c.bf16 %v2965_v25, %v2965_v25  ;;  %v4000_v38 = vadd.f32 %v9647_v33, %v10449_v47  ;;  %v2968_v39 = vadd.f32 %v10449_v47, %v2967_v34  ;;  %v3991_v40 = vpop.f32.mrb[35].mxu1 }
 0x12b   : > { %6966 = vst.msk [vmem:[%s10464_s27 + $0x88] sm:$0xf] %vm6931_vm1, %v8619_v30  ;;  %v8873_v41 = vpack.c.bf16 %v3989_v31, %v3989_v31  ;;  %v8620_v42 = vpack.c.bf16 %v2976_v32, %v2976_v32  ;;  %v3992_v43 = vadd.f32 %v10449_v47, %v3991_v40  ;;  %9497 = vmatmul.mubr.msk.bf16.gmra.mrb[140].mxu0 %vm2033_vm0, %v10037_v23 }
 0x12c   : > { %7222 = vst.msk [vmem:[%s10464_s27 + $0x488] sm:$0xf] %vm6931_vm1, %v8875_v36  ;;  %6964 = vst.msk [vmem:[%s10464_s27 + $0x80] sm:$0xf] %vm6931_vm1, %v8617_v37  ;;  %v8876_v44 = vpack.c.bf16 %v4000_v38, %v4000_v38  ;;  %v8618_v45 = vpack.c.bf16 %v2968_v39, %v2968_v39  ;;  %9753 = vmatmul.mubr.msk.bf16.gmra.mrb[140].mxu1 %vm2033_vm0, %v10038_v28  ;;  %9500 = vmatprep.mubr.msk.bf16.mxu0 %vm2033_vm0, %v10039_v29  ;;  %v10048_v28 = vld [vmem:[%s10228_s22 + $0x660] sm:$0xff]  }
 0x12d   : > { %7220 = vst.msk [vmem:[%s10464_s27 + $0x480] sm:$0xf] %vm6931_vm1, %v8873_v41  ;;  %6967 = vst.msk [vmem:[%s10464_s27 + $0x8c] sm:$0xf] %vm6931_vm1, %v8620_v42  ;;  %v8874_v46 = vpack.c.bf16 %v3992_v43, %v3992_v43  ;;  %9756 = vmatprep.mubr.msk.bf16.mxu1 %vm2033_vm0, %v10040_v35 }
 0x12e   : > { %7223 = vst.msk [vmem:[%s10464_s27 + $0x48c] sm:$0xf] %vm6931_vm1, %v8876_v44  ;;  %6965 = vst.msk [vmem:[%s10464_s27 + $0x84] sm:$0xf] %vm6931_vm1, %v8618_v45  ;;  %v9394_v48 = vpop.f32.mrb[36].mxu0  ;;  %v10049_v44 = vld [vmem:[%s10228_s22 + $0x268] sm:$0xff]  }
 0x12f   : > { %7221 = vst.msk [vmem:[%s10464_s27 + $0x484] sm:$0xf] %vm6931_vm1, %v8874_v46  ;;  %v2989_v49 = vadd.f32 %v9394_v48, %v10449_v47  ;;  %v9650_v50 = vpop.f32.mrb[36].mxu1  ;;  %v2980_v51 = vpop.f32.mrb[37].mxu0 }
 0x130   : > { %v4013_v53 = vadd.f32 %v9650_v50, %v10449_v47  ;;  %v2981_v54 = vadd.f32 %v10449_v47, %v2980_v51  ;;  %v4004_v55 = vpop.f32.mrb[37].mxu1  ;;  %v9395_v56 = vpop.f32.mrb[38].mxu0  ;;  %v10050_v50 = vld [vmem:[%s10228_s22 + $0x668] sm:$0xff]   ;;  %v10051_v51 = vld [vmem:[%s10228_s22 + $0x270] sm:$0xff]  }
 0x131   : > { %v8623_v59 = vpack.c.bf16 %v2989_v49, %v2989_v49  ;;  %v4005_v60 = vadd.f32 %v10449_v47, %v4004_v55  ;;  %v2992_v61 = vadd.f32 %v9395_v56, %v10449_v47  ;;  %v9651_v62 = vpop.f32.mrb[38].mxu1  ;;  %v2983_v63 = vpop.f32.mrb[39].mxu0 }
 0x132   : > { %v8879_v1 = vpack.c.bf16 %v4013_v53, %v4013_v53  ;;  %v8621_v2 = vpack.c.bf16 %v2981_v54, %v2981_v54  ;;  %v4016_v3 = vadd.f32 %v9651_v62, %v10449_v47  ;;  %v2984_v4 = vadd.f32 %v10449_v47, %v2983_v63  ;;  %v4007_v5 = vpop.f32.mrb[39].mxu1 }
 0x133   : > { %6970 = vst.msk [vmem:[%s10464_s27 + $0x98] sm:$0xf] %vm6931_vm1, %v8623_v59  ;;  %v8877_v6 = vpack.c.bf16 %v4005_v60, %v4005_v60  ;;  %v8624_v7 = vpack.c.bf16 %v2992_v61, %v2992_v61  ;;  %v4008_v8 = vadd.f32 %v10449_v47, %v4007_v5  ;;  %9501 = vmatmul.mubr.msk.bf16.gmra.mrb[144].mxu0 %vm2033_vm0, %v10041_v52  ;;  %v10826_v60 = vld [vmem:[%s12321_s2] ss:$0 sm:$0xff] }
 0x134   : > { %7226 = vst.msk [vmem:[%s10464_s27 + $0x498] sm:$0xf] %vm6931_vm1, %v8879_v1  ;;  %6968 = vst.msk [vmem:[%s10464_s27 + $0x90] sm:$0xf] %vm6931_vm1, %v8621_v2  ;;  %v8880_v9 = vpack.c.bf16 %v4016_v3, %v4016_v3  ;;  %v8622_v10 = vpack.c.bf16 %v2984_v4, %v2984_v4  ;;  %9757 = vmatmul.mubr.msk.bf16.gmra.mrb[144].mxu1 %vm2033_vm0, %v10042_v57  ;;  %9504 = vmatprep.mubr.msk.bf16.mxu0 %vm2033_vm0, %v10043_v58  ;;  %v10052_v57 = vld [vmem:[%s10228_s22 + $0x670] sm:$0xff]  }
 0x135   : > { %7224 = vst.msk [vmem:[%s10464_s27 + $0x490] sm:$0xf] %vm6931_vm1, %v8877_v6  ;;  %6971 = vst.msk [vmem:[%s10464_s27 + $0x9c] sm:$0xf] %vm6931_vm1, %v8624_v7  ;;  %v8878_v11 = vpack.c.bf16 %v4008_v8, %v4008_v8  ;;  %9760 = vmatprep.mubr.msk.bf16.mxu1 %vm2033_vm0, %v10044_v0 }
 0x136   : > { %7227 = vst.msk [vmem:[%s10464_s27 + $0x49c] sm:$0xf] %vm6931_vm1, %v8880_v9  ;;  %6969 = vst.msk [vmem:[%s10464_s27 + $0x94] sm:$0xf] %vm6931_vm1, %v8622_v10  ;;  %v9398_v12 = vpop.f32.mrb[40].mxu0  ;;  %v10053_v9 = vld [vmem:[%s10228_s22 + $0x278] sm:$0xff]  }
 0x137   : > { %7225 = vst.msk [vmem:[%s10464_s27 + $0x494] sm:$0xf] %vm6931_vm1, %v8878_v11  ;;  %v3005_v13 = vadd.f32 %v9398_v12, %v10449_v47  ;;  %v9654_v14 = vpop.f32.mrb[40].mxu1  ;;  %v2996_v15 = vpop.f32.mrb[41].mxu0 }
 0x138   : > { %v4029_v17 = vadd.f32 %v9654_v14, %v10449_v47  ;;  %v2997_v18 = vadd.f32 %v10449_v47, %v2996_v15  ;;  %v4020_v19 = vpop.f32.mrb[41].mxu1  ;;  %v9399_v20 = vpop.f32.mrb[42].mxu0  ;;  %v10054_v14 = vld [vmem:[%s10228_s22 + $0x678] sm:$0xff]   ;;  %v10055_v15 = vld [vmem:[%s10228_s22 + $0x280] sm:$0xff]  }
 0x139   : > { %v8627_v23 = vpack.c.bf16 %v3005_v13, %v3005_v13  ;;  %v4021_v24 = vadd.f32 %v10449_v47, %v4020_v19  ;;  %v3008_v25 = vadd.f32 %v9399_v20, %v10449_v47  ;;  %v9655_v26 = vpop.f32.mrb[42].mxu1  ;;  %v2999_v27 = vpop.f32.mrb[43].mxu0 }
 0x13a   : > { %v8883_v29 = vpack.c.bf16 %v4029_v17, %v4029_v17  ;;  %v8625_v30 = vpack.c.bf16 %v2997_v18, %v2997_v18  ;;  %v4032_v31 = vadd.f32 %v9655_v26, %v10449_v47  ;;  %v3000_v32 = vadd.f32 %v10449_v47, %v2999_v27  ;;  %v4023_v33 = vpop.f32.mrb[43].mxu1 }
 0x13b   : > { %6974 = vst.msk [vmem:[%s10464_s27 + $0xa8] sm:$0xf] %vm6931_vm1, %v8627_v23  ;;  %v8881_v34 = vpack.c.bf16 %v4021_v24, %v4021_v24  ;;  %v8628_v35 = vpack.c.bf16 %v3008_v25, %v3008_v25  ;;  %v4024_v36 = vadd.f32 %v10449_v47, %v4023_v33  ;;  %9505 = vmatmul.mubr.msk.bf16.gmra.mrb[148].mxu0 %vm2033_vm0, %v10045_v16 }
 0x13c   : > { %7230 = vst.msk [vmem:[%s10464_s27 + $0x4a8] sm:$0xf] %vm6931_vm1, %v8883_v29  ;;  %6972 = vst.msk [vmem:[%s10464_s27 + $0xa0] sm:$0xf] %vm6931_vm1, %v8625_v30  ;;  %v8884_v37 = vpack.c.bf16 %v4032_v31, %v4032_v31  ;;  %v8626_v38 = vpack.c.bf16 %v3000_v32, %v3000_v32  ;;  %9761 = vmatmul.mubr.msk.bf16.gmra.mrb[148].mxu1 %vm2033_vm0, %v10046_v21  ;;  %9508 = vmatprep.mubr.msk.bf16.mxu0 %vm2033_vm0, %v10047_v22  ;;  %v10056_v21 = vld [vmem:[%s10228_s22 + $0x680] sm:$0xff]  }
 0x13d   : > { %7228 = vst.msk [vmem:[%s10464_s27 + $0x4a0] sm:$0xf] %vm6931_vm1, %v8881_v34  ;;  %6975 = vst.msk [vmem:[%s10464_s27 + $0xac] sm:$0xf] %vm6931_vm1, %v8628_v35  ;;  %v8882_v39 = vpack.c.bf16 %v4024_v36, %v4024_v36  ;;  %9764 = vmatprep.mubr.msk.bf16.mxu1 %vm2033_vm0, %v10048_v28 }
 0x13e   : > { %7231 = vst.msk [vmem:[%s10464_s27 + $0x4ac] sm:$0xf] %vm6931_vm1, %v8884_v37  ;;  %6973 = vst.msk [vmem:[%s10464_s27 + $0xa4] sm:$0xf] %vm6931_vm1, %v8626_v38  ;;  %v9402_v40 = vpop.f32.mrb[44].mxu0  ;;  %v10057_v37 = vld [vmem:[%s10228_s22 + $0x288] sm:$0xff]  }
 0x13f   : > { %7229 = vst.msk [vmem:[%s10464_s27 + $0x4a4] sm:$0xf] %vm6931_vm1, %v8882_v39  ;;  %v3021_v41 = vadd.f32 %v9402_v40, %v10449_v47  ;;  %v9658_v42 = vpop.f32.mrb[44].mxu1  ;;  %v3012_v43 = vpop.f32.mrb[45].mxu0 }
 0x140   : > { %v4045_v45 = vadd.f32 %v9658_v42, %v10449_v47  ;;  %v3013_v46 = vadd.f32 %v10449_v47, %v3012_v43  ;;  %v4036_v48 = vpop.f32.mrb[45].mxu1  ;;  %v9403_v49 = vpop.f32.mrb[46].mxu0  ;;  %v10058_v42 = vld [vmem:[%s10228_s22 + $0x688] sm:$0xff]   ;;  %v10059_v43 = vld [vmem:[%s10228_s22 + $0x290] sm:$0xff]  }
 0x141   : > { %v8631_v52 = vpack.c.bf16 %v3021_v41, %v3021_v41  ;;  %v4037_v53 = vadd.f32 %v10449_v47, %v4036_v48  ;;  %v3024_v54 = vadd.f32 %v9403_v49, %v10449_v47  ;;  %v9659_v55 = vpop.f32.mrb[46].mxu1  ;;  %v3015_v56 = vpop.f32.mrb[47].mxu0 }
 0x142   : > { %v8887_v58 = vpack.c.bf16 %v4045_v45, %v4045_v45  ;;  %v8629_v59 = vpack.c.bf16 %v3013_v46, %v3013_v46  ;;  %v4048_v61 = vadd.f32 %v10826_v60, %v9659_v55  ;;  %v3016_v62 = vadd.f32 %v10826_v60, %v3015_v56  ;;  %v4039_v63 = vpop.f32.mrb[47].mxu1 }
 0x143   : > { %6978 = vst.msk [vmem:[%s10464_s27 + $0xb8] sm:$0xf] %vm6931_vm1, %v8631_v52  ;;  %v8885_v47 = vpack.c.bf16 %v4037_v53, %v4037_v53  ;;  %v8632_v0 = vpack.c.bf16 %v3024_v54, %v3024_v54  ;;  %v4040_v1 = vadd.f32 %v10826_v60, %v4039_v63  ;;  %9509 = vmatmul.mubr.msk.bf16.gmra.mrb[152].mxu0 %vm2033_vm0, %v10049_v44 }
 0x144   : > { %7234 = vst.msk [vmem:[%s10464_s27 + $0x4b8] sm:$0xf] %vm6931_vm1, %v8887_v58  ;;  %6976 = vst.msk [vmem:[%s10464_s27 + $0xb0] sm:$0xf] %vm6931_vm1, %v8629_v59  ;;  %v8888_v2 = vpack.c.bf16 %v4048_v61, %v4048_v61  ;;  %v8630_v3 = vpack.c.bf16 %v3016_v62, %v3016_v62  ;;  %9765 = vmatmul.mubr.msk.bf16.gmra.mrb[152].mxu1 %vm2033_vm0, %v10050_v50  ;;  %9512 = vmatprep.mubr.msk.bf16.mxu0 %vm2033_vm0, %v10051_v51  ;;  %v10060_v50 = vld [vmem:[%s10228_s22 + $0x690] sm:$0xff]  }
 0x145   : > { %7232 = vst.msk [vmem:[%s10464_s27 + $0x4b0] sm:$0xf] %vm6931_vm1, %v8885_v47  ;;  %6979 = vst.msk [vmem:[%s10464_s27 + $0xbc] sm:$0xf] %vm6931_vm1, %v8632_v0  ;;  %v8886_v4 = vpack.c.bf16 %v4040_v1, %v4040_v1  ;;  %9768 = vmatprep.mubr.msk.bf16.mxu1 %vm2033_vm0, %v10052_v57 }
 0x146   : > { %7235 = vst.msk [vmem:[%s10464_s27 + $0x4bc] sm:$0xf] %vm6931_vm1, %v8888_v2  ;;  %6977 = vst.msk [vmem:[%s10464_s27 + $0xb4] sm:$0xf] %vm6931_vm1, %v8630_v3  ;;  %v9406_v5 = vpop.f32.mrb[48].mxu0  ;;  %v10061_v2 = vld [vmem:[%s10228_s22 + $0x298] sm:$0xff]  }
 0x147   : > { %7233 = vst.msk [vmem:[%s10464_s27 + $0x4b4] sm:$0xf] %vm6931_vm1, %v8886_v4  ;;  %v3037_v6 = vadd.f32 %v10826_v60, %v9406_v5  ;;  %v9662_v7 = vpop.f32.mrb[48].mxu1  ;;  %v3028_v8 = vpop.f32.mrb[49].mxu0 }
 0x148   : > { %v4061_v10 = vadd.f32 %v10826_v60, %v9662_v7  ;;  %v3029_v11 = vadd.f32 %v10826_v60, %v3028_v8  ;;  %v4052_v12 = vpop.f32.mrb[49].mxu1  ;;  %v9407_v13 = vpop.f32.mrb[50].mxu0  ;;  %v10062_v7 = vld [vmem:[%s10228_s22 + $0x698] sm:$0xff]   ;;  %v10063_v8 = vld [vmem:[%s10228_s22 + $0x2a0] sm:$0xff]  }
 0x149   : > { %v8635_v16 = vpack.c.bf16 %v3037_v6, %v3037_v6  ;;  %v4053_v17 = vadd.f32 %v10826_v60, %v4052_v12  ;;  %v3040_v18 = vadd.f32 %v10826_v60, %v9407_v13  ;;  %v9663_v19 = vpop.f32.mrb[50].mxu1  ;;  %v3031_v20 = vpop.f32.mrb[51].mxu0 }
 0x14a   : > { %v8891_v22 = vpack.c.bf16 %v4061_v10, %v4061_v10  ;;  %v8633_v23 = vpack.c.bf16 %v3029_v11, %v3029_v11  ;;  %v4064_v24 = vadd.f32 %v10826_v60, %v9663_v19  ;;  %v3032_v25 = vadd.f32 %v10826_v60, %v3031_v20  ;;  %v4055_v26 = vpop.f32.mrb[51].mxu1 }
 0x14b   : > { %6982 = vst.msk [vmem:[%s10464_s27 + $0xc8] sm:$0xf] %vm6931_vm1, %v8635_v16  ;;  %v8889_v27 = vpack.c.bf16 %v4053_v17, %v4053_v17  ;;  %v8636_v28 = vpack.c.bf16 %v3040_v18, %v3040_v18  ;;  %v4056_v29 = vadd.f32 %v10826_v60, %v4055_v26  ;;  %9513 = vmatmul.mubr.msk.bf16.gmra.mrb[156].mxu0 %vm2033_vm0, %v10053_v9 }
 0x14c   : > { %7238 = vst.msk [vmem:[%s10464_s27 + $0x4c8] sm:$0xf] %vm6931_vm1, %v8891_v22  ;;  %6980 = vst.msk [vmem:[%s10464_s27 + $0xc0] sm:$0xf] %vm6931_vm1, %v8633_v23  ;;  %v8892_v30 = vpack.c.bf16 %v4064_v24, %v4064_v24  ;;  %v8634_v31 = vpack.c.bf16 %v3032_v25, %v3032_v25  ;;  %9769 = vmatmul.mubr.msk.bf16.gmra.mrb[156].mxu1 %vm2033_vm0, %v10054_v14  ;;  %9516 = vmatprep.mubr.msk.bf16.mxu0 %vm2033_vm0, %v10055_v15  ;;  %v10064_v14 = vld [vmem:[%s10228_s22 + $0x6a0] sm:$0xff]  }
 0x14d   : > { %7236 = vst.msk [vmem:[%s10464_s27 + $0x4c0] sm:$0xf] %vm6931_vm1, %v8889_v27  ;;  %6983 = vst.msk [vmem:[%s10464_s27 + $0xcc] sm:$0xf] %vm6931_vm1, %v8636_v28  ;;  %v8890_v32 = vpack.c.bf16 %v4056_v29, %v4056_v29  ;;  %9772 = vmatprep.mubr.msk.bf16.mxu1 %vm2033_vm0, %v10056_v21 }
 0x14e   : > { %7239 = vst.msk [vmem:[%s10464_s27 + $0x4cc] sm:$0xf] %vm6931_vm1, %v8892_v30  ;;  %6981 = vst.msk [vmem:[%s10464_s27 + $0xc4] sm:$0xf] %vm6931_vm1, %v8634_v31  ;;  %v9410_v33 = vpop.f32.mrb[52].mxu0  ;;  %v10065_v30 = vld [vmem:[%s10228_s22 + $0x2a8] sm:$0xff]  }
 0x14f   : > { %7237 = vst.msk [vmem:[%s10464_s27 + $0x4c4] sm:$0xf] %vm6931_vm1, %v8890_v32  ;;  %v3053_v34 = vadd.f32 %v10826_v60, %v9410_v33  ;;  %v9666_v35 = vpop.f32.mrb[52].mxu1  ;;  %v3044_v36 = vpop.f32.mrb[53].mxu0 }
 0x150   : > { %v4077_v38 = vadd.f32 %v10826_v60, %v9666_v35  ;;  %v3045_v39 = vadd.f32 %v10826_v60, %v3044_v36  ;;  %v4068_v40 = vpop.f32.mrb[53].mxu1  ;;  %v9411_v41 = vpop.f32.mrb[54].mxu0  ;;  %v10066_v35 = vld [vmem:[%s10228_s22 + $0x6a8] sm:$0xff]   ;;  %v10067_v36 = vld [vmem:[%s10228_s22 + $0x2b0] sm:$0xff]  }
 0x151   : > { %v8639_v44 = vpack.c.bf16 %v3053_v34, %v3053_v34  ;;  %v4069_v45 = vadd.f32 %v10826_v60, %v4068_v40  ;;  %v3056_v46 = vadd.f32 %v10826_v60, %v9411_v41  ;;  %v9667_v48 = vpop.f32.mrb[54].mxu1  ;;  %v3047_v49 = vpop.f32.mrb[55].mxu0 }
 0x152   : > { %v8895_v51 = vpack.c.bf16 %v4077_v38, %v4077_v38  ;;  %v8637_v52 = vpack.c.bf16 %v3045_v39, %v3045_v39  ;;  %v4080_v53 = vadd.f32 %v10826_v60, %v9667_v48  ;;  %v3048_v54 = vadd.f32 %v10826_v60, %v3047_v49  ;;  %v4071_v55 = vpop.f32.mrb[55].mxu1 }
 0x153   : > { %6986 = vst.msk [vmem:[%s10464_s27 + $0xd8] sm:$0xf] %vm6931_vm1, %v8639_v44  ;;  %v8893_v56 = vpack.c.bf16 %v4069_v45, %v4069_v45  ;;  %v8640_v57 = vpack.c.bf16 %v3056_v46, %v3056_v46  ;;  %v4072_v58 = vadd.f32 %v10826_v60, %v4071_v55  ;;  %9517 = vmatmul.mubr.msk.bf16.gmra.mrb[160].mxu0 %vm2033_vm0, %v10057_v37 }
 0x154   : > { %7242 = vst.msk [vmem:[%s10464_s27 + $0x4d8] sm:$0xf] %vm6931_vm1, %v8895_v51  ;;  %6984 = vst.msk [vmem:[%s10464_s27 + $0xd0] sm:$0xf] %vm6931_vm1, %v8637_v52  ;;  %v8896_v59 = vpack.c.bf16 %v4080_v53, %v4080_v53  ;;  %v8638_v61 = vpack.c.bf16 %v3048_v54, %v3048_v54  ;;  %9773 = vmatmul.mubr.msk.bf16.gmra.mrb[160].mxu1 %vm2033_vm0, %v10058_v42  ;;  %9520 = vmatprep.mubr.msk.bf16.mxu0 %vm2033_vm0, %v10059_v43  ;;  %v10068_v42 = vld [vmem:[%s10228_s22 + $0x6b0] sm:$0xff]  }
 0x155   : > { %7240 = vst.msk [vmem:[%s10464_s27 + $0x4d0] sm:$0xf] %vm6931_vm1, %v8893_v56  ;;  %6987 = vst.msk [vmem:[%s10464_s27 + $0xdc] sm:$0xf] %vm6931_vm1, %v8640_v57  ;;  %v8894_v62 = vpack.c.bf16 %v4072_v58, %v4072_v58  ;;  %9776 = vmatprep.mubr.msk.bf16.mxu1 %vm2033_vm0, %v10060_v50 }
 0x156   : > { %7243 = vst.msk [vmem:[%s10464_s27 + $0x4dc] sm:$0xf] %vm6931_vm1, %v8896_v59  ;;  %6985 = vst.msk [vmem:[%s10464_s27 + $0xd4] sm:$0xf] %vm6931_vm1, %v8638_v61  ;;  %v9414_v63 = vpop.f32.mrb[56].mxu0  ;;  %v10069_v59 = vld [vmem:[%s10228_s22 + $0x2b8] sm:$0xff]  }
 0x157   : > { %7241 = vst.msk [vmem:[%s10464_s27 + $0x4d4] sm:$0xf] %vm6931_vm1, %v8894_v62  ;;  %v3069_v47 = vadd.f32 %v10826_v60, %v9414_v63  ;;  %v9670_v0 = vpop.f32.mrb[56].mxu1  ;;  %v3060_v1 = vpop.f32.mrb[57].mxu0 }
 0x158   : > { %v4093_v3 = vadd.f32 %v10826_v60, %v9670_v0  ;;  %v3061_v4 = vadd.f32 %v10826_v60, %v3060_v1  ;;  %v4084_v5 = vpop.f32.mrb[57].mxu1  ;;  %v9415_v6 = vpop.f32.mrb[58].mxu0  ;;  %v10070_v0 = vld [vmem:[%s10228_s22 + $0x6b8] sm:$0xff]   ;;  %v10071_v1 = vld [vmem:[%s10228_s22 + $0x2c0] sm:$0xff]  }
 0x159   : > { %v8643_v9 = vpack.c.bf16 %v3069_v47, %v3069_v47  ;;  %v4085_v10 = vadd.f32 %v10826_v60, %v4084_v5  ;;  %v3072_v11 = vadd.f32 %v10826_v60, %v9415_v6  ;;  %v9671_v12 = vpop.f32.mrb[58].mxu1  ;;  %v3063_v13 = vpop.f32.mrb[59].mxu0 }
 0x15a   : > { %v8899_v15 = vpack.c.bf16 %v4093_v3, %v4093_v3  ;;  %v8641_v16 = vpack.c.bf16 %v3061_v4, %v3061_v4  ;;  %v4096_v17 = vadd.f32 %v10826_v60, %v9671_v12  ;;  %v3064_v18 = vadd.f32 %v10826_v60, %v3063_v13  ;;  %v4087_v19 = vpop.f32.mrb[59].mxu1 }
 0x15b   : > { %6990 = vst.msk [vmem:[%s10464_s27 + $0xe8] sm:$0xf] %vm6931_vm1, %v8643_v9  ;;  %v8897_v20 = vpack.c.bf16 %v4085_v10, %v4085_v10  ;;  %v8644_v21 = vpack.c.bf16 %v3072_v11, %v3072_v11  ;;  %v4088_v22 = vadd.f32 %v10826_v60, %v4087_v19  ;;  %9521 = vmatmul.mubr.msk.bf16.gmra.mrb[164].mxu0 %vm2033_vm0, %v10061_v2 }
 0x15c   : > { %7246 = vst.msk [vmem:[%s10464_s27 + $0x4e8] sm:$0xf] %vm6931_vm1, %v8899_v15  ;;  %6988 = vst.msk [vmem:[%s10464_s27 + $0xe0] sm:$0xf] %vm6931_vm1, %v8641_v16  ;;  %v8900_v23 = vpack.c.bf16 %v4096_v17, %v4096_v17  ;;  %v8642_v24 = vpack.c.bf16 %v3064_v18, %v3064_v18  ;;  %9777 = vmatmul.mubr.msk.bf16.gmra.mrb[164].mxu1 %vm2033_vm0, %v10062_v7  ;;  %9524 = vmatprep.mubr.msk.bf16.mxu0 %vm2033_vm0, %v10063_v8  ;;  %v10072_v7 = vld [vmem:[%s10228_s22 + $0x6c0] sm:$0xff]  }
 0x15d   : > { %7244 = vst.msk [vmem:[%s10464_s27 + $0x4e0] sm:$0xf] %vm6931_vm1, %v8897_v20  ;;  %6991 = vst.msk [vmem:[%s10464_s27 + $0xec] sm:$0xf] %vm6931_vm1, %v8644_v21  ;;  %v8898_v25 = vpack.c.bf16 %v4088_v22, %v4088_v22  ;;  %9780 = vmatprep.mubr.msk.bf16.mxu1 %vm2033_vm0, %v10064_v14 }
 0x15e   : > { %7247 = vst.msk [vmem:[%s10464_s27 + $0x4ec] sm:$0xf] %vm6931_vm1, %v8900_v23  ;;  %6989 = vst.msk [vmem:[%s10464_s27 + $0xe4] sm:$0xf] %vm6931_vm1, %v8642_v24  ;;  %v9418_v26 = vpop.f32.mrb[60].mxu0  ;;  %v10073_v23 = vld [vmem:[%s10228_s22 + $0x2c8] sm:$0xff]  }
 0x15f   : > { %7245 = vst.msk [vmem:[%s10464_s27 + $0x4e4] sm:$0xf] %vm6931_vm1, %v8898_v25  ;;  %v3085_v27 = vadd.f32 %v10826_v60, %v9418_v26  ;;  %v9674_v28 = vpop.f32.mrb[60].mxu1  ;;  %v3076_v29 = vpop.f32.mrb[61].mxu0 }
 0x160   : > { %v4109_v31 = vadd.f32 %v10826_v60, %v9674_v28  ;;  %v3077_v32 = vadd.f32 %v10826_v60, %v3076_v29  ;;  %v4100_v33 = vpop.f32.mrb[61].mxu1  ;;  %v9419_v34 = vpop.f32.mrb[62].mxu0  ;;  %v10074_v28 = vld [vmem:[%s10228_s22 + $0x6c8] sm:$0xff]   ;;  %v10075_v29 = vld [vmem:[%s10228_s22 + $0x2d0] sm:$0xff]  }
 0x161   : > { %v8647_v37 = vpack.c.bf16 %v3085_v27, %v3085_v27  ;;  %v4101_v38 = vadd.f32 %v10826_v60, %v4100_v33  ;;  %v3088_v39 = vadd.f32 %v10826_v60, %v9419_v34  ;;  %v9675_v40 = vpop.f32.mrb[62].mxu1  ;;  %v3079_v41 = vpop.f32.mrb[63].mxu0 }
 0x162   : > { %v8903_v43 = vpack.c.bf16 %v4109_v31, %v4109_v31  ;;  %v8645_v44 = vpack.c.bf16 %v3077_v32, %v3077_v32  ;;  %v4112_v45 = vadd.f32 %v10826_v60, %v9675_v40  ;;  %v3080_v46 = vadd.f32 %v10826_v60, %v3079_v41  ;;  %v4103_v48 = vpop.f32.mrb[63].mxu1 }
 0x163   : > { %6994 = vst.msk [vmem:[%s10464_s27 + $0xf8] sm:$0xf] %vm6931_vm1, %v8647_v37  ;;  %v8901_v49 = vpack.c.bf16 %v4101_v38, %v4101_v38  ;;  %v8648_v50 = vpack.c.bf16 %v3088_v39, %v3088_v39  ;;  %v4104_v51 = vadd.f32 %v10826_v60, %v4103_v48  ;;  %9525 = vmatmul.mubr.msk.bf16.gmra.mrb[168].mxu0 %vm2033_vm0, %v10065_v30 }
 0x164   : > { %7250 = vst.msk [vmem:[%s10464_s27 + $0x4f8] sm:$0xf] %vm6931_vm1, %v8903_v43  ;;  %6992 = vst.msk [vmem:[%s10464_s27 + $0xf0] sm:$0xf] %vm6931_vm1, %v8645_v44  ;;  %v8904_v52 = vpack.c.bf16 %v4112_v45, %v4112_v45  ;;  %v8646_v53 = vpack.c.bf16 %v3080_v46, %v3080_v46  ;;  %9781 = vmatmul.mubr.msk.bf16.gmra.mrb[168].mxu1 %vm2033_vm0, %v10066_v35  ;;  %9528 = vmatprep.mubr.msk.bf16.mxu0 %vm2033_vm0, %v10067_v36  ;;  %v10076_v35 = vld [vmem:[%s10228_s22 + $0x6d0] sm:$0xff]  }
 0x165   : > { %7248 = vst.msk [vmem:[%s10464_s27 + $0x4f0] sm:$0xf] %vm6931_vm1, %v8901_v49  ;;  %6995 = vst.msk [vmem:[%s10464_s27 + $0xfc] sm:$0xf] %vm6931_vm1, %v8648_v50  ;;  %v8902_v54 = vpack.c.bf16 %v4104_v51, %v4104_v51  ;;  %9784 = vmatprep.mubr.msk.bf16.mxu1 %vm2033_vm0, %v10068_v42 }
 0x166   : > { %7251 = vst.msk [vmem:[%s10464_s27 + $0x4fc] sm:$0xf] %vm6931_vm1, %v8904_v52  ;;  %6993 = vst.msk [vmem:[%s10464_s27 + $0xf4] sm:$0xf] %vm6931_vm1, %v8646_v53  ;;  %v9422_v55 = vpop.f32.mrb[64].mxu0  ;;  %v10077_v52 = vld [vmem:[%s10228_s22 + $0x2d8] sm:$0xff]  }
 0x167   : > { %7249 = vst.msk [vmem:[%s10464_s27 + $0x4f4] sm:$0xf] %vm6931_vm1, %v8902_v54  ;;  %v3101_v56 = vadd.f32 %v10826_v60, %v9422_v55  ;;  %v9678_v57 = vpop.f32.mrb[64].mxu1  ;;  %v3092_v58 = vpop.f32.mrb[65].mxu0 }
 0x168   : > { %v4125_v61 = vadd.f32 %v10826_v60, %v9678_v57  ;;  %v3093_v62 = vadd.f32 %v10826_v60, %v3092_v58  ;;  %v4116_v63 = vpop.f32.mrb[65].mxu1  ;;  %v9423_v47 = vpop.f32.mrb[66].mxu0  ;;  %v10078_v57 = vld [vmem:[%s10228_s22 + $0x6d8] sm:$0xff]   ;;  %v10079_v58 = vld [vmem:[%s10228_s22 + $0x2e0] sm:$0xff]  }
 0x169   : > { %v8651_v2 = vpack.c.bf16 %v3101_v56, %v3101_v56  ;;  %v4117_v3 = vadd.f32 %v10826_v60, %v4116_v63  ;;  %v3104_v4 = vadd.f32 %v10826_v60, %v9423_v47  ;;  %v9679_v5 = vpop.f32.mrb[66].mxu1  ;;  %v3095_v6 = vpop.f32.mrb[67].mxu0 }
 0x16a   : > { %v8907_v8 = vpack.c.bf16 %v4125_v61, %v4125_v61  ;;  %v8649_v9 = vpack.c.bf16 %v3093_v62, %v3093_v62  ;;  %v4128_v10 = vadd.f32 %v10826_v60, %v9679_v5  ;;  %v3096_v11 = vadd.f32 %v10826_v60, %v3095_v6  ;;  %v4119_v12 = vpop.f32.mrb[67].mxu1 }
 0x16b   : > { %6998 = vst.msk [vmem:[%s10464_s27 + $0x108] sm:$0xf] %vm6931_vm1, %v8651_v2  ;;  %v8905_v13 = vpack.c.bf16 %v4117_v3, %v4117_v3  ;;  %v8652_v14 = vpack.c.bf16 %v3104_v4, %v3104_v4  ;;  %v4120_v15 = vadd.f32 %v10826_v60, %v4119_v12  ;;  %9529 = vmatmul.mubr.msk.bf16.gmra.mrb[172].mxu0 %vm2033_vm0, %v10069_v59 }
 0x16c   : > { %7254 = vst.msk [vmem:[%s10464_s27 + $0x508] sm:$0xf] %vm6931_vm1, %v8907_v8  ;;  %6996 = vst.msk [vmem:[%s10464_s27 + $0x100] sm:$0xf] %vm6931_vm1, %v8649_v9  ;;  %v8908_v16 = vpack.c.bf16 %v4128_v10, %v4128_v10  ;;  %v8650_v17 = vpack.c.bf16 %v3096_v11, %v3096_v11  ;;  %9785 = vmatmul.mubr.msk.bf16.gmra.mrb[172].mxu1 %vm2033_vm0, %v10070_v0  ;;  %9532 = vmatprep.mubr.msk.bf16.mxu0 %vm2033_vm0, %v10071_v1  ;;  %v10080_v0 = vld [vmem:[%s10228_s22 + $0x6e0] sm:$0xff]  }
 0x16d   : > { %7252 = vst.msk [vmem:[%s10464_s27 + $0x500] sm:$0xf] %vm6931_vm1, %v8905_v13  ;;  %6999 = vst.msk [vmem:[%s10464_s27 + $0x10c] sm:$0xf] %vm6931_vm1, %v8652_v14  ;;  %v8906_v18 = vpack.c.bf16 %v4120_v15, %v4120_v15  ;;  %9788 = vmatprep.mubr.msk.bf16.mxu1 %vm2033_vm0, %v10072_v7 }
 0x16e   : > { %7255 = vst.msk [vmem:[%s10464_s27 + $0x50c] sm:$0xf] %vm6931_vm1, %v8908_v16  ;;  %6997 = vst.msk [vmem:[%s10464_s27 + $0x104] sm:$0xf] %vm6931_vm1, %v8650_v17  ;;  %v9426_v19 = vpop.f32.mrb[68].mxu0  ;;  %v10081_v16 = vld [vmem:[%s10228_s22 + $0x2e8] sm:$0xff]  }
 0x16f   : > { %7253 = vst.msk [vmem:[%s10464_s27 + $0x504] sm:$0xf] %vm6931_vm1, %v8906_v18  ;;  %v3117_v20 = vadd.f32 %v10826_v60, %v9426_v19  ;;  %v9682_v21 = vpop.f32.mrb[68].mxu1  ;;  %v3108_v22 = vpop.f32.mrb[69].mxu0 }
 0x170   : > { %v4141_v24 = vadd.f32 %v10826_v60, %v9682_v21  ;;  %v3109_v25 = vadd.f32 %v10826_v60, %v3108_v22  ;;  %v4132_v26 = vpop.f32.mrb[69].mxu1  ;;  %v9427_v27 = vpop.f32.mrb[70].mxu0  ;;  %v10082_v21 = vld [vmem:[%s10228_s22 + $0x6e8] sm:$0xff]   ;;  %v10083_v22 = vld [vmem:[%s10228_s22 + $0x2f0] sm:$0xff]  }
 0x171   : > { %v8655_v30 = vpack.c.bf16 %v3117_v20, %v3117_v20  ;;  %v4133_v31 = vadd.f32 %v10826_v60, %v4132_v26  ;;  %v3120_v32 = vadd.f32 %v10826_v60, %v9427_v27  ;;  %v9683_v33 = vpop.f32.mrb[70].mxu1  ;;  %v3111_v34 = vpop.f32.mrb[71].mxu0 }
 0x172   : > { %v8911_v36 = vpack.c.bf16 %v4141_v24, %v4141_v24  ;;  %v8653_v37 = vpack.c.bf16 %v3109_v25, %v3109_v25  ;;  %v4144_v38 = vadd.f32 %v10826_v60, %v9683_v33  ;;  %v3112_v39 = vadd.f32 %v10826_v60, %v3111_v34  ;;  %v4135_v40 = vpop.f32.mrb[71].mxu1 }
 0x173   : > { %7002 = vst.msk [vmem:[%s10464_s27 + $0x118] sm:$0xf] %vm6931_vm1, %v8655_v30  ;;  %v8909_v41 = vpack.c.bf16 %v4133_v31, %v4133_v31  ;;  %v8656_v42 = vpack.c.bf16 %v3120_v32, %v3120_v32  ;;  %v4136_v43 = vadd.f32 %v10826_v60, %v4135_v40  ;;  %9533 = vmatmul.mubr.msk.bf16.gmra.mrb[176].mxu0 %vm2033_vm0, %v10073_v23 }
 0x174   : > { %7258 = vst.msk [vmem:[%s10464_s27 + $0x518] sm:$0xf] %vm6931_vm1, %v8911_v36  ;;  %7000 = vst.msk [vmem:[%s10464_s27 + $0x110] sm:$0xf] %vm6931_vm1, %v8653_v37  ;;  %v8912_v44 = vpack.c.bf16 %v4144_v38, %v4144_v38  ;;  %v8654_v45 = vpack.c.bf16 %v3112_v39, %v3112_v39  ;;  %9789 = vmatmul.mubr.msk.bf16.gmra.mrb[176].mxu1 %vm2033_vm0, %v10074_v28  ;;  %9536 = vmatprep.mubr.msk.bf16.mxu0 %vm2033_vm0, %v10075_v29  ;;  %v10084_v28 = vld [vmem:[%s10228_s22 + $0x6f0] sm:$0xff]  }
 0x175   : > { %7256 = vst.msk [vmem:[%s10464_s27 + $0x510] sm:$0xf] %vm6931_vm1, %v8909_v41  ;;  %7003 = vst.msk [vmem:[%s10464_s27 + $0x11c] sm:$0xf] %vm6931_vm1, %v8656_v42  ;;  %v8910_v46 = vpack.c.bf16 %v4136_v43, %v4136_v43  ;;  %9792 = vmatprep.mubr.msk.bf16.mxu1 %vm2033_vm0, %v10076_v35 }
 0x176   : > { %7259 = vst.msk [vmem:[%s10464_s27 + $0x51c] sm:$0xf] %vm6931_vm1, %v8912_v44  ;;  %7001 = vst.msk [vmem:[%s10464_s27 + $0x114] sm:$0xf] %vm6931_vm1, %v8654_v45  ;;  %v9430_v48 = vpop.f32.mrb[72].mxu0  ;;  %v10085_v44 = vld [vmem:[%s10228_s22 + $0x2f8] sm:$0xff]  }
 0x177   : > { %7257 = vst.msk [vmem:[%s10464_s27 + $0x514] sm:$0xf] %vm6931_vm1, %v8910_v46  ;;  %v3133_v49 = vadd.f32 %v10826_v60, %v9430_v48  ;;  %v9686_v50 = vpop.f32.mrb[72].mxu1  ;;  %v3124_v51 = vpop.f32.mrb[73].mxu0 }
 0x178   : > { %v4157_v53 = vadd.f32 %v10826_v60, %v9686_v50  ;;  %v3125_v54 = vadd.f32 %v10826_v60, %v3124_v51  ;;  %v4148_v55 = vpop.f32.mrb[73].mxu1  ;;  %v9431_v56 = vpop.f32.mrb[74].mxu0  ;;  %v10086_v50 = vld [vmem:[%s10228_s22 + $0x6f8] sm:$0xff]   ;;  %v10087_v51 = vld [vmem:[%s10228_s22 + $0x300] sm:$0xff]  }
 0x179   : > { %v8659_v59 = vpack.c.bf16 %v3133_v49, %v3133_v49  ;;  %v4149_v61 = vadd.f32 %v10826_v60, %v4148_v55  ;;  %v3136_v62 = vadd.f32 %v10826_v60, %v9431_v56  ;;  %v9687_v63 = vpop.f32.mrb[74].mxu1  ;;  %v3127_v47 = vpop.f32.mrb[75].mxu0 }
 0x17a   : > { %v8915_v1 = vpack.c.bf16 %v4157_v53, %v4157_v53  ;;  %v8657_v2 = vpack.c.bf16 %v3125_v54, %v3125_v54  ;;  %v4160_v3 = vadd.f32 %v10826_v60, %v9687_v63  ;;  %v3128_v4 = vadd.f32 %v10826_v60, %v3127_v47  ;;  %v4151_v5 = vpop.f32.mrb[75].mxu1 }
 0x17b   : > { %7006 = vst.msk [vmem:[%s10464_s27 + $0x128] sm:$0xf] %vm6931_vm1, %v8659_v59  ;;  %v8913_v6 = vpack.c.bf16 %v4149_v61, %v4149_v61  ;;  %v8660_v7 = vpack.c.bf16 %v3136_v62, %v3136_v62  ;;  %v4152_v8 = vadd.f32 %v10826_v60, %v4151_v5  ;;  %9537 = vmatmul.mubr.msk.bf16.gmra.mrb[180].mxu0 %vm2033_vm0, %v10077_v52 }
 0x17c   : > { %7262 = vst.msk [vmem:[%s10464_s27 + $0x528] sm:$0xf] %vm6931_vm1, %v8915_v1  ;;  %7004 = vst.msk [vmem:[%s10464_s27 + $0x120] sm:$0xf] %vm6931_vm1, %v8657_v2  ;;  %v8916_v9 = vpack.c.bf16 %v4160_v3, %v4160_v3  ;;  %v8658_v10 = vpack.c.bf16 %v3128_v4, %v3128_v4  ;;  %9793 = vmatmul.mubr.msk.bf16.gmra.mrb[180].mxu1 %vm2033_vm0, %v10078_v57  ;;  %9540 = vmatprep.mubr.msk.bf16.mxu0 %vm2033_vm0, %v10079_v58  ;;  %v10088_v57 = vld [vmem:[%s10228_s22 + $0x700] sm:$0xff]  }
 0x17d   : > { %7260 = vst.msk [vmem:[%s10464_s27 + $0x520] sm:$0xf] %vm6931_vm1, %v8913_v6  ;;  %7007 = vst.msk [vmem:[%s10464_s27 + $0x12c] sm:$0xf] %vm6931_vm1, %v8660_v7  ;;  %v8914_v11 = vpack.c.bf16 %v4152_v8, %v4152_v8  ;;  %9796 = vmatprep.mubr.msk.bf16.mxu1 %vm2033_vm0, %v10080_v0 }
 0x17e   : > { %7263 = vst.msk [vmem:[%s10464_s27 + $0x52c] sm:$0xf] %vm6931_vm1, %v8916_v9  ;;  %7005 = vst.msk [vmem:[%s10464_s27 + $0x124] sm:$0xf] %vm6931_vm1, %v8658_v10  ;;  %v9434_v12 = vpop.f32.mrb[76].mxu0  ;;  %v10089_v9 = vld [vmem:[%s10228_s22 + $0x308] sm:$0xff]  }
 0x17f   : > { %7261 = vst.msk [vmem:[%s10464_s27 + $0x524] sm:$0xf] %vm6931_vm1, %v8914_v11  ;;  %v3149_v13 = vadd.f32 %v10826_v60, %v9434_v12  ;;  %v9690_v14 = vpop.f32.mrb[76].mxu1  ;;  %v3140_v15 = vpop.f32.mrb[77].mxu0 }
 0x180   : > { %v4173_v17 = vadd.f32 %v10826_v60, %v9690_v14  ;;  %v3141_v18 = vadd.f32 %v10826_v60, %v3140_v15  ;;  %v4164_v19 = vpop.f32.mrb[77].mxu1  ;;  %v9435_v20 = vpop.f32.mrb[78].mxu0  ;;  %v10090_v14 = vld [vmem:[%s10228_s22 + $0x708] sm:$0xff]   ;;  %v10091_v15 = vld [vmem:[%s10228_s22 + $0x310] sm:$0xff]  }
 0x181   : > { %v8663_v23 = vpack.c.bf16 %v3149_v13, %v3149_v13  ;;  %v4165_v24 = vadd.f32 %v10826_v60, %v4164_v19  ;;  %v3152_v25 = vadd.f32 %v10826_v60, %v9435_v20  ;;  %v9691_v26 = vpop.f32.mrb[78].mxu1  ;;  %v3143_v27 = vpop.f32.mrb[79].mxu0 }
 0x182   : > { %v8919_v29 = vpack.c.bf16 %v4173_v17, %v4173_v17  ;;  %v8661_v30 = vpack.c.bf16 %v3141_v18, %v3141_v18  ;;  %v4176_v31 = vadd.f32 %v10826_v60, %v9691_v26  ;;  %v3144_v32 = vadd.f32 %v10826_v60, %v3143_v27  ;;  %v4167_v33 = vpop.f32.mrb[79].mxu1 }
 0x183   : > { %7010 = vst.msk [vmem:[%s10464_s27 + $0x138] sm:$0xf] %vm6931_vm1, %v8663_v23  ;;  %v8917_v34 = vpack.c.bf16 %v4165_v24, %v4165_v24  ;;  %v8664_v35 = vpack.c.bf16 %v3152_v25, %v3152_v25  ;;  %v4168_v36 = vadd.f32 %v10826_v60, %v4167_v33  ;;  %9541 = vmatmul.mubr.msk.bf16.gmra.mrb[184].mxu0 %vm2033_vm0, %v10081_v16 }
 0x184   : > { %7266 = vst.msk [vmem:[%s10464_s27 + $0x538] sm:$0xf] %vm6931_vm1, %v8919_v29  ;;  %7008 = vst.msk [vmem:[%s10464_s27 + $0x130] sm:$0xf] %vm6931_vm1, %v8661_v30  ;;  %v8920_v37 = vpack.c.bf16 %v4176_v31, %v4176_v31  ;;  %v8662_v38 = vpack.c.bf16 %v3144_v32, %v3144_v32  ;;  %9797 = vmatmul.mubr.msk.bf16.gmra.mrb[184].mxu1 %vm2033_vm0, %v10082_v21  ;;  %9544 = vmatprep.mubr.msk.bf16.mxu0 %vm2033_vm0, %v10083_v22  ;;  %v10092_v21 = vld [vmem:[%s10228_s22 + $0x710] sm:$0xff]  }
 0x185   : > { %7264 = vst.msk [vmem:[%s10464_s27 + $0x530] sm:$0xf] %vm6931_vm1, %v8917_v34  ;;  %7011 = vst.msk [vmem:[%s10464_s27 + $0x13c] sm:$0xf] %vm6931_vm1, %v8664_v35  ;;  %v8918_v39 = vpack.c.bf16 %v4168_v36, %v4168_v36  ;;  %9800 = vmatprep.mubr.msk.bf16.mxu1 %vm2033_vm0, %v10084_v28 }
 0x186   : > { %7267 = vst.msk [vmem:[%s10464_s27 + $0x53c] sm:$0xf] %vm6931_vm1, %v8920_v37  ;;  %7009 = vst.msk [vmem:[%s10464_s27 + $0x134] sm:$0xf] %vm6931_vm1, %v8662_v38  ;;  %v9438_v40 = vpop.f32.mrb[80].mxu0  ;;  %v10093_v37 = vld [vmem:[%s10228_s22 + $0x318] sm:$0xff]  }
 0x187   : > { %7265 = vst.msk [vmem:[%s10464_s27 + $0x534] sm:$0xf] %vm6931_vm1, %v8918_v39  ;;  %v3165_v41 = vadd.f32 %v10826_v60, %v9438_v40  ;;  %v9694_v42 = vpop.f32.mrb[80].mxu1  ;;  %v3156_v43 = vpop.f32.mrb[81].mxu0 }
 0x188   : > { %v4189_v45 = vadd.f32 %v10826_v60, %v9694_v42  ;;  %v3157_v46 = vadd.f32 %v10826_v60, %v3156_v43  ;;  %v4180_v48 = vpop.f32.mrb[81].mxu1  ;;  %v9439_v49 = vpop.f32.mrb[82].mxu0  ;;  %v10094_v42 = vld [vmem:[%s10228_s22 + $0x718] sm:$0xff]   ;;  %v10095_v43 = vld [vmem:[%s10228_s22 + $0x320] sm:$0xff]  }
 0x189   : > { %v8667_v52 = vpack.c.bf16 %v3165_v41, %v3165_v41  ;;  %v4181_v53 = vadd.f32 %v10826_v60, %v4180_v48  ;;  %v3168_v54 = vadd.f32 %v10826_v60, %v9439_v49  ;;  %v9695_v55 = vpop.f32.mrb[82].mxu1  ;;  %v3159_v56 = vpop.f32.mrb[83].mxu0 }
 0x18a   : > { %v8923_v58 = vpack.c.bf16 %v4189_v45, %v4189_v45  ;;  %v8665_v59 = vpack.c.bf16 %v3157_v46, %v3157_v46  ;;  %v4192_v61 = vadd.f32 %v10826_v60, %v9695_v55  ;;  %v3160_v62 = vadd.f32 %v10826_v60, %v3159_v56  ;;  %v4183_v63 = vpop.f32.mrb[83].mxu1 }
 0x18b   : > { %7014 = vst.msk [vmem:[%s10464_s27 + $0x148] sm:$0xf] %vm6931_vm1, %v8667_v52  ;;  %v8921_v47 = vpack.c.bf16 %v4181_v53, %v4181_v53  ;;  %v8668_v0 = vpack.c.bf16 %v3168_v54, %v3168_v54  ;;  %v4184_v1 = vadd.f32 %v10826_v60, %v4183_v63  ;;  %9545 = vmatmul.mubr.msk.bf16.gmra.mrb[188].mxu0 %vm2033_vm0, %v10085_v44 }
 0x18c   : > { %7270 = vst.msk [vmem:[%s10464_s27 + $0x548] sm:$0xf] %vm6931_vm1, %v8923_v58  ;;  %7012 = vst.msk [vmem:[%s10464_s27 + $0x140] sm:$0xf] %vm6931_vm1, %v8665_v59  ;;  %v8924_v2 = vpack.c.bf16 %v4192_v61, %v4192_v61  ;;  %v8666_v3 = vpack.c.bf16 %v3160_v62, %v3160_v62  ;;  %9801 = vmatmul.mubr.msk.bf16.gmra.mrb[188].mxu1 %vm2033_vm0, %v10086_v50  ;;  %9548 = vmatprep.mubr.msk.bf16.mxu0 %vm2033_vm0, %v10087_v51  ;;  %v10096_v50 = vld [vmem:[%s10228_s22 + $0x720] sm:$0xff]  }
 0x18d   : > { %7268 = vst.msk [vmem:[%s10464_s27 + $0x540] sm:$0xf] %vm6931_vm1, %v8921_v47  ;;  %7015 = vst.msk [vmem:[%s10464_s27 + $0x14c] sm:$0xf] %vm6931_vm1, %v8668_v0  ;;  %v8922_v4 = vpack.c.bf16 %v4184_v1, %v4184_v1  ;;  %9804 = vmatprep.mubr.msk.bf16.mxu1 %vm2033_vm0, %v10088_v57 }
 0x18e   : > { %7271 = vst.msk [vmem:[%s10464_s27 + $0x54c] sm:$0xf] %vm6931_vm1, %v8924_v2  ;;  %7013 = vst.msk [vmem:[%s10464_s27 + $0x144] sm:$0xf] %vm6931_vm1, %v8666_v3  ;;  %v9442_v5 = vpop.f32.mrb[84].mxu0  ;;  %v10097_v2 = vld [vmem:[%s10228_s22 + $0x328] sm:$0xff]  }
 0x18f   : > { %7269 = vst.msk [vmem:[%s10464_s27 + $0x544] sm:$0xf] %vm6931_vm1, %v8922_v4  ;;  %v3181_v6 = vadd.f32 %v10826_v60, %v9442_v5  ;;  %v9698_v7 = vpop.f32.mrb[84].mxu1  ;;  %v3172_v8 = vpop.f32.mrb[85].mxu0 }
 0x190   : > { %v4205_v10 = vadd.f32 %v10826_v60, %v9698_v7  ;;  %v3173_v11 = vadd.f32 %v10826_v60, %v3172_v8  ;;  %v4196_v12 = vpop.f32.mrb[85].mxu1  ;;  %v9443_v13 = vpop.f32.mrb[86].mxu0  ;;  %v10098_v7 = vld [vmem:[%s10228_s22 + $0x728] sm:$0xff]   ;;  %v10099_v8 = vld [vmem:[%s10228_s22 + $0x330] sm:$0xff]  }
 0x191   : > { %v8671_v16 = vpack.c.bf16 %v3181_v6, %v3181_v6  ;;  %v4197_v17 = vadd.f32 %v10826_v60, %v4196_v12  ;;  %v3184_v18 = vadd.f32 %v10826_v60, %v9443_v13  ;;  %v9699_v19 = vpop.f32.mrb[86].mxu1  ;;  %v3175_v20 = vpop.f32.mrb[87].mxu0 }
 0x192   : > { %v8927_v22 = vpack.c.bf16 %v4205_v10, %v4205_v10  ;;  %v8669_v23 = vpack.c.bf16 %v3173_v11, %v3173_v11  ;;  %v4208_v24 = vadd.f32 %v10826_v60, %v9699_v19  ;;  %v3176_v25 = vadd.f32 %v10826_v60, %v3175_v20  ;;  %v4199_v26 = vpop.f32.mrb[87].mxu1 }
 0x193   : > { %7018 = vst.msk [vmem:[%s10464_s27 + $0x158] sm:$0xf] %vm6931_vm1, %v8671_v16  ;;  %v8925_v27 = vpack.c.bf16 %v4197_v17, %v4197_v17  ;;  %v8672_v28 = vpack.c.bf16 %v3184_v18, %v3184_v18  ;;  %v4200_v29 = vadd.f32 %v10826_v60, %v4199_v26  ;;  %9549 = vmatmul.mubr.msk.bf16.gmra.mrb[192].mxu0 %vm2033_vm0, %v10089_v9 }
 0x194   : > { %7274 = vst.msk [vmem:[%s10464_s27 + $0x558] sm:$0xf] %vm6931_vm1, %v8927_v22  ;;  %7016 = vst.msk [vmem:[%s10464_s27 + $0x150] sm:$0xf] %vm6931_vm1, %v8669_v23  ;;  %v8928_v30 = vpack.c.bf16 %v4208_v24, %v4208_v24  ;;  %v8670_v31 = vpack.c.bf16 %v3176_v25, %v3176_v25  ;;  %9805 = vmatmul.mubr.msk.bf16.gmra.mrb[192].mxu1 %vm2033_vm0, %v10090_v14  ;;  %9552 = vmatprep.mubr.msk.bf16.mxu0 %vm2033_vm0, %v10091_v15  ;;  %v10100_v14 = vld [vmem:[%s10228_s22 + $0x730] sm:$0xff]  }
 0x195   : > { %7272 = vst.msk [vmem:[%s10464_s27 + $0x550] sm:$0xf] %vm6931_vm1, %v8925_v27  ;;  %7019 = vst.msk [vmem:[%s10464_s27 + $0x15c] sm:$0xf] %vm6931_vm1, %v8672_v28  ;;  %v8926_v32 = vpack.c.bf16 %v4200_v29, %v4200_v29  ;;  %9808 = vmatprep.mubr.msk.bf16.mxu1 %vm2033_vm0, %v10092_v21 }
 0x196   : > { %7275 = vst.msk [vmem:[%s10464_s27 + $0x55c] sm:$0xf] %vm6931_vm1, %v8928_v30  ;;  %7017 = vst.msk [vmem:[%s10464_s27 + $0x154] sm:$0xf] %vm6931_vm1, %v8670_v31  ;;  %v9446_v33 = vpop.f32.mrb[88].mxu0  ;;  %v10101_v30 = vld [vmem:[%s10228_s22 + $0x338] sm:$0xff]  }
 0x197   : > { %7273 = vst.msk [vmem:[%s10464_s27 + $0x554] sm:$0xf] %vm6931_vm1, %v8926_v32  ;;  %v3197_v34 = vadd.f32 %v10826_v60, %v9446_v33  ;;  %v9702_v35 = vpop.f32.mrb[88].mxu1  ;;  %v3188_v36 = vpop.f32.mrb[89].mxu0 }
 0x198   : > { %v4221_v38 = vadd.f32 %v10826_v60, %v9702_v35  ;;  %v3189_v39 = vadd.f32 %v10826_v60, %v3188_v36  ;;  %v4212_v40 = vpop.f32.mrb[89].mxu1  ;;  %v9447_v41 = vpop.f32.mrb[90].mxu0  ;;  %v10102_v35 = vld [vmem:[%s10228_s22 + $0x738] sm:$0xff]   ;;  %v10103_v36 = vld [vmem:[%s10228_s22 + $0x340] sm:$0xff]  }
 0x199   : > { %v8675_v44 = vpack.c.bf16 %v3197_v34, %v3197_v34  ;;  %v4213_v45 = vadd.f32 %v10826_v60, %v4212_v40  ;;  %v3200_v46 = vadd.f32 %v10826_v60, %v9447_v41  ;;  %v9703_v48 = vpop.f32.mrb[90].mxu1  ;;  %v3191_v49 = vpop.f32.mrb[91].mxu0 }
 0x19a   : > { %v8931_v51 = vpack.c.bf16 %v4221_v38, %v4221_v38  ;;  %v8673_v52 = vpack.c.bf16 %v3189_v39, %v3189_v39  ;;  %v4224_v53 = vadd.f32 %v10826_v60, %v9703_v48  ;;  %v3192_v54 = vadd.f32 %v10826_v60, %v3191_v49  ;;  %v4215_v55 = vpop.f32.mrb[91].mxu1  ;;  %v11244_v38 = vld [vmem:[%s12321_s2] ss:$0 sm:$0xff] }
 0x19b   : > { %7022 = vst.msk [vmem:[%s10464_s27 + $0x168] sm:$0xf] %vm6931_vm1, %v8675_v44  ;;  %v8929_v56 = vpack.c.bf16 %v4213_v45, %v4213_v45  ;;  %v8676_v57 = vpack.c.bf16 %v3200_v46, %v3200_v46  ;;  %v4216_v58 = vadd.f32 %v10826_v60, %v4215_v55  ;;  %9553 = vmatmul.mubr.msk.bf16.gmra.mrb[196].mxu0 %vm2033_vm0, %v10093_v37 }
 0x19c   : > { %7278 = vst.msk [vmem:[%s10464_s27 + $0x568] sm:$0xf] %vm6931_vm1, %v8931_v51  ;;  %7020 = vst.msk [vmem:[%s10464_s27 + $0x160] sm:$0xf] %vm6931_vm1, %v8673_v52  ;;  %v8932_v59 = vpack.c.bf16 %v4224_v53, %v4224_v53  ;;  %v8674_v61 = vpack.c.bf16 %v3192_v54, %v3192_v54  ;;  %9809 = vmatmul.mubr.msk.bf16.gmra.mrb[196].mxu1 %vm2033_vm0, %v10094_v42  ;;  %9556 = vmatprep.mubr.msk.bf16.mxu0 %vm2033_vm0, %v10095_v43 }
 0x19d   : > { %7276 = vst.msk [vmem:[%s10464_s27 + $0x560] sm:$0xf] %vm6931_vm1, %v8929_v56  ;;  %7023 = vst.msk [vmem:[%s10464_s27 + $0x16c] sm:$0xf] %vm6931_vm1, %v8676_v57  ;;  %v8930_v62 = vpack.c.bf16 %v4216_v58, %v4216_v58  ;;  %9812 = vmatprep.mubr.msk.bf16.mxu1 %vm2033_vm0, %v10096_v50 }
 0x19e   : > { %7279 = vst.msk [vmem:[%s10464_s27 + $0x56c] sm:$0xf] %vm6931_vm1, %v8932_v59  ;;  %7021 = vst.msk [vmem:[%s10464_s27 + $0x164] sm:$0xf] %vm6931_vm1, %v8674_v61  ;;  %v9450_v63 = vpop.f32.mrb[92].mxu0  ;;  %v10105_v59 = vld [vmem:[%s10228_s22 + $0x348] sm:$0xff]  }
 0x19f   : > { %7277 = vst.msk [vmem:[%s10464_s27 + $0x564] sm:$0xf] %vm6931_vm1, %v8930_v62  ;;  %v3213_v47 = vadd.f32 %v10826_v60, %v9450_v63  ;;  %v9706_v0 = vpop.f32.mrb[92].mxu1  ;;  %v3204_v1 = vpop.f32.mrb[93].mxu0 }
 0x1a0   : > { %v4237_v3 = vadd.f32 %v10826_v60, %v9706_v0  ;;  %v3205_v4 = vadd.f32 %v10826_v60, %v3204_v1  ;;  %v4228_v5 = vpop.f32.mrb[93].mxu1  ;;  %v9451_v6 = vpop.f32.mrb[94].mxu0  ;;  %v10106_v0 = vld [vmem:[%s10228_s22 + $0x748] sm:$0xff]   ;;  %v10107_v1 = vld [vmem:[%s10228_s22 + $0x350] sm:$0xff]  }
 0x1a1   : > { %v8679_v9 = vpack.c.bf16 %v3213_v47, %v3213_v47  ;;  %v4229_v10 = vadd.f32 %v10826_v60, %v4228_v5  ;;  %v3216_v11 = vadd.f32 %v10826_v60, %v9451_v6  ;;  %v9707_v12 = vpop.f32.mrb[94].mxu1  ;;  %v3207_v13 = vpop.f32.mrb[95].mxu0 }
 0x1a2   : > { %v8935_v15 = vpack.c.bf16 %v4237_v3, %v4237_v3  ;;  %v8677_v16 = vpack.c.bf16 %v3205_v4, %v3205_v4  ;;  %v4240_v17 = vadd.f32 %v10826_v60, %v9707_v12  ;;  %v3208_v18 = vadd.f32 %v10826_v60, %v3207_v13  ;;  %v4231_v19 = vpop.f32.mrb[95].mxu1 }
 0x1a3   : > { %7026 = vst.msk [vmem:[%s10464_s27 + $0x178] sm:$0xf] %vm6931_vm1, %v8679_v9  ;;  %v8933_v20 = vpack.c.bf16 %v4229_v10, %v4229_v10  ;;  %v8680_v21 = vpack.c.bf16 %v3216_v11, %v3216_v11  ;;  %v4232_v22 = vadd.f32 %v10826_v60, %v4231_v19  ;;  %9557 = vmatmul.mubr.msk.bf16.gmra.mrb[200].mxu0 %vm2033_vm0, %v10097_v2 }
 0x1a4   : > { %7282 = vst.msk [vmem:[%s10464_s27 + $0x578] sm:$0xf] %vm6931_vm1, %v8935_v15  ;;  %7024 = vst.msk [vmem:[%s10464_s27 + $0x170] sm:$0xf] %vm6931_vm1, %v8677_v16  ;;  %v8936_v23 = vpack.c.bf16 %v4240_v17, %v4240_v17  ;;  %v8678_v24 = vpack.c.bf16 %v3208_v18, %v3208_v18  ;;  %9813 = vmatmul.mubr.msk.bf16.gmra.mrb[200].mxu1 %vm2033_vm0, %v10098_v7  ;;  %9560 = vmatprep.mubr.msk.bf16.mxu0 %vm2033_vm0, %v10099_v8  ;;  %v10108_v7 = vld [vmem:[%s10228_s22 + $0x750] sm:$0xff]  }
 0x1a5   : > { %7280 = vst.msk [vmem:[%s10464_s27 + $0x570] sm:$0xf] %vm6931_vm1, %v8933_v20  ;;  %7027 = vst.msk [vmem:[%s10464_s27 + $0x17c] sm:$0xf] %vm6931_vm1, %v8680_v21  ;;  %v8934_v25 = vpack.c.bf16 %v4232_v22, %v4232_v22  ;;  %9816 = vmatprep.mubr.msk.bf16.mxu1 %vm2033_vm0, %v10100_v14 }
 0x1a6   : > { %7283 = vst.msk [vmem:[%s10464_s27 + $0x57c] sm:$0xf] %vm6931_vm1, %v8936_v23  ;;  %7025 = vst.msk [vmem:[%s10464_s27 + $0x174] sm:$0xf] %vm6931_vm1, %v8678_v24  ;;  %v9454_v26 = vpop.f32.mrb[96].mxu0  ;;  %v10109_v23 = vld [vmem:[%s10228_s22 + $0x358] sm:$0xff]  }
 0x1a7   : > { %7281 = vst.msk [vmem:[%s10464_s27 + $0x574] sm:$0xf] %vm6931_vm1, %v8934_v25  ;;  %v3229_v27 = vadd.f32 %v10826_v60, %v9454_v26  ;;  %v9710_v28 = vpop.f32.mrb[96].mxu1  ;;  %v3220_v29 = vpop.f32.mrb[97].mxu0 }
 0x1a8   : > { %v4253_v31 = vadd.f32 %v10826_v60, %v9710_v28  ;;  %v3221_v32 = vadd.f32 %v10826_v60, %v3220_v29  ;;  %v4244_v33 = vpop.f32.mrb[97].mxu1  ;;  %v9455_v34 = vpop.f32.mrb[98].mxu0  ;;  %v10104_v60 = vld [vmem:[%s10228_s22 + $0x740] sm:$0xff]   ;;  %v10110_v28 = vld [vmem:[%s10228_s22 + $0x758] sm:$0xff]  }
 0x1a9   : > { %v8683_v37 = vpack.c.bf16 %v3229_v27, %v3229_v27  ;;  %v4245_v39 = vadd.f32 %v11244_v38, %v4244_v33  ;;  %v3232_v40 = vadd.f32 %v11244_v38, %v9455_v34  ;;  %v9711_v41 = vpop.f32.mrb[98].mxu1  ;;  %v3223_v42 = vpop.f32.mrb[99].mxu0  ;;  %v10111_v29 = vld [vmem:[%s10228_s22 + $0x360] sm:$0xff]  }
 0x1aa   : > { %v8939_v43 = vpack.c.bf16 %v4253_v31, %v4253_v31  ;;  %v8681_v44 = vpack.c.bf16 %v3221_v32, %v3221_v32  ;;  %v4256_v45 = vadd.f32 %v11244_v38, %v9711_v41  ;;  %v3224_v46 = vadd.f32 %v11244_v38, %v3223_v42  ;;  %v4247_v48 = vpop.f32.mrb[99].mxu1 }
 0x1ab   : > { %7030 = vst.msk [vmem:[%s10464_s27 + $0x188] sm:$0xf] %vm6931_vm1, %v8683_v37  ;;  %v8937_v49 = vpack.c.bf16 %v4245_v39, %v4245_v39  ;;  %v8684_v50 = vpack.c.bf16 %v3232_v40, %v3232_v40  ;;  %v4248_v51 = vadd.f32 %v11244_v38, %v4247_v48  ;;  %9561 = vmatmul.mubr.msk.bf16.gmra.mrb[204].mxu0 %vm2033_vm0, %v10101_v30 }
 0x1ac   : > { %7286 = vst.msk [vmem:[%s10464_s27 + $0x588] sm:$0xf] %vm6931_vm1, %v8939_v43  ;;  %7028 = vst.msk [vmem:[%s10464_s27 + $0x180] sm:$0xf] %vm6931_vm1, %v8681_v44  ;;  %v8940_v52 = vpack.c.bf16 %v4256_v45, %v4256_v45  ;;  %v8682_v53 = vpack.c.bf16 %v3224_v46, %v3224_v46  ;;  %9817 = vmatmul.mubr.msk.bf16.gmra.mrb[204].mxu1 %vm2033_vm0, %v10102_v35  ;;  %9564 = vmatprep.mubr.msk.bf16.mxu0 %vm2033_vm0, %v10103_v36  ;;  %v10112_v35 = vld [vmem:[%s10228_s22 + $0x760] sm:$0xff]  }
 0x1ad   : > { %7284 = vst.msk [vmem:[%s10464_s27 + $0x580] sm:$0xf] %vm6931_vm1, %v8937_v49  ;;  %7031 = vst.msk [vmem:[%s10464_s27 + $0x18c] sm:$0xf] %vm6931_vm1, %v8684_v50  ;;  %v8938_v54 = vpack.c.bf16 %v4248_v51, %v4248_v51  ;;  %9820 = vmatprep.mubr.msk.bf16.mxu1 %vm2033_vm0, %v10104_v60 }
 0x1ae   : > { %7287 = vst.msk [vmem:[%s10464_s27 + $0x58c] sm:$0xf] %vm6931_vm1, %v8940_v52  ;;  %7029 = vst.msk [vmem:[%s10464_s27 + $0x184] sm:$0xf] %vm6931_vm1, %v8682_v53  ;;  %v9458_v55 = vpop.f32.mrb[100].mxu0  ;;  %v10113_v52 = vld [vmem:[%s10228_s22 + $0x368] sm:$0xff]  }
 0x1af   : > { %7285 = vst.msk [vmem:[%s10464_s27 + $0x584] sm:$0xf] %vm6931_vm1, %v8938_v54  ;;  %v3245_v56 = vadd.f32 %v11244_v38, %v9458_v55  ;;  %v9714_v57 = vpop.f32.mrb[100].mxu1  ;;  %v3236_v58 = vpop.f32.mrb[101].mxu0 }
 0x1b0   : > { %v4269_v61 = vadd.f32 %v11244_v38, %v9714_v57  ;;  %v3237_v62 = vadd.f32 %v11244_v38, %v3236_v58  ;;  %v4260_v63 = vpop.f32.mrb[101].mxu1  ;;  %v9459_v47 = vpop.f32.mrb[102].mxu0  ;;  %v10114_v57 = vld [vmem:[%s10228_s22 + $0x768] sm:$0xff]   ;;  %v10115_v58 = vld [vmem:[%s10228_s22 + $0x370] sm:$0xff]  }
 0x1b1   : > { %v8687_v2 = vpack.c.bf16 %v3245_v56, %v3245_v56  ;;  %v4261_v3 = vadd.f32 %v11244_v38, %v4260_v63  ;;  %v3248_v4 = vadd.f32 %v11244_v38, %v9459_v47  ;;  %v9715_v5 = vpop.f32.mrb[102].mxu1  ;;  %v3239_v6 = vpop.f32.mrb[103].mxu0 }
 0x1b2   : > { %v8943_v8 = vpack.c.bf16 %v4269_v61, %v4269_v61  ;;  %v8685_v9 = vpack.c.bf16 %v3237_v62, %v3237_v62  ;;  %v4272_v10 = vadd.f32 %v11244_v38, %v9715_v5  ;;  %v3240_v11 = vadd.f32 %v11244_v38, %v3239_v6  ;;  %v4263_v12 = vpop.f32.mrb[103].mxu1 }
 0x1b3   : > { %7034 = vst.msk [vmem:[%s10464_s27 + $0x198] sm:$0xf] %vm6931_vm1, %v8687_v2  ;;  %v8941_v13 = vpack.c.bf16 %v4261_v3, %v4261_v3  ;;  %v8688_v14 = vpack.c.bf16 %v3248_v4, %v3248_v4  ;;  %v4264_v15 = vadd.f32 %v11244_v38, %v4263_v12  ;;  %9565 = vmatmul.mubr.msk.bf16.gmra.mrb[208].mxu0 %vm2033_vm0, %v10105_v59 }
 0x1b4   : > { %7290 = vst.msk [vmem:[%s10464_s27 + $0x598] sm:$0xf] %vm6931_vm1, %v8943_v8  ;;  %7032 = vst.msk [vmem:[%s10464_s27 + $0x190] sm:$0xf] %vm6931_vm1, %v8685_v9  ;;  %v8944_v16 = vpack.c.bf16 %v4272_v10, %v4272_v10  ;;  %v8686_v17 = vpack.c.bf16 %v3240_v11, %v3240_v11  ;;  %9821 = vmatmul.mubr.msk.bf16.gmra.mrb[208].mxu1 %vm2033_vm0, %v10106_v0  ;;  %9568 = vmatprep.mubr.msk.bf16.mxu0 %vm2033_vm0, %v10107_v1  ;;  %v10116_v0 = vld [vmem:[%s10228_s22 + $0x770] sm:$0xff]  }
 0x1b5   : > { %7288 = vst.msk [vmem:[%s10464_s27 + $0x590] sm:$0xf] %vm6931_vm1, %v8941_v13  ;;  %7035 = vst.msk [vmem:[%s10464_s27 + $0x19c] sm:$0xf] %vm6931_vm1, %v8688_v14  ;;  %v8942_v18 = vpack.c.bf16 %v4264_v15, %v4264_v15  ;;  %9824 = vmatprep.mubr.msk.bf16.mxu1 %vm2033_vm0, %v10108_v7 }
 0x1b6   : > { %7291 = vst.msk [vmem:[%s10464_s27 + $0x59c] sm:$0xf] %vm6931_vm1, %v8944_v16  ;;  %7033 = vst.msk [vmem:[%s10464_s27 + $0x194] sm:$0xf] %vm6931_vm1, %v8686_v17  ;;  %v9462_v19 = vpop.f32.mrb[104].mxu0  ;;  %v10117_v16 = vld [vmem:[%s10228_s22 + $0x378] sm:$0xff]  }
 0x1b7   : > { %7289 = vst.msk [vmem:[%s10464_s27 + $0x594] sm:$0xf] %vm6931_vm1, %v8942_v18  ;;  %v3261_v20 = vadd.f32 %v11244_v38, %v9462_v19  ;;  %v9718_v21 = vpop.f32.mrb[104].mxu1  ;;  %v3252_v22 = vpop.f32.mrb[105].mxu0 }
 0x1b8   : > { %v4285_v24 = vadd.f32 %v11244_v38, %v9718_v21  ;;  %v3253_v25 = vadd.f32 %v11244_v38, %v3252_v22  ;;  %v4276_v26 = vpop.f32.mrb[105].mxu1  ;;  %v9463_v27 = vpop.f32.mrb[106].mxu0  ;;  %v10118_v21 = vld [vmem:[%s10228_s22 + $0x778] sm:$0xff]   ;;  %v10119_v22 = vld [vmem:[%s10228_s22 + $0x380] sm:$0xff]  }
 0x1b9   : > { %v8691_v30 = vpack.c.bf16 %v3261_v20, %v3261_v20  ;;  %v4277_v31 = vadd.f32 %v11244_v38, %v4276_v26  ;;  %v3264_v32 = vadd.f32 %v11244_v38, %v9463_v27  ;;  %v9719_v33 = vpop.f32.mrb[106].mxu1  ;;  %v3255_v34 = vpop.f32.mrb[107].mxu0 }
 0x1ba   : > { %v8947_v36 = vpack.c.bf16 %v4285_v24, %v4285_v24  ;;  %v8689_v37 = vpack.c.bf16 %v3253_v25, %v3253_v25  ;;  %v4288_v39 = vadd.f32 %v11244_v38, %v9719_v33  ;;  %v3256_v40 = vadd.f32 %v11244_v38, %v3255_v34  ;;  %v4279_v41 = vpop.f32.mrb[107].mxu1 }
 0x1bb   : > { %7038 = vst.msk [vmem:[%s10464_s27 + $0x1a8] sm:$0xf] %vm6931_vm1, %v8691_v30  ;;  %v8945_v42 = vpack.c.bf16 %v4277_v31, %v4277_v31  ;;  %v8692_v60 = vpack.c.bf16 %v3264_v32, %v3264_v32  ;;  %v4280_v43 = vadd.f32 %v11244_v38, %v4279_v41  ;;  %9569 = vmatmul.mubr.msk.bf16.gmra.mrb[212].mxu0 %vm2033_vm0, %v10109_v23 }
 0x1bc   : > { %7294 = vst.msk [vmem:[%s10464_s27 + $0x5a8] sm:$0xf] %vm6931_vm1, %v8947_v36  ;;  %7036 = vst.msk [vmem:[%s10464_s27 + $0x1a0] sm:$0xf] %vm6931_vm1, %v8689_v37  ;;  %v8948_v44 = vpack.c.bf16 %v4288_v39, %v4288_v39  ;;  %v8690_v45 = vpack.c.bf16 %v3256_v40, %v3256_v40  ;;  %9825 = vmatmul.mubr.msk.bf16.gmra.mrb[212].mxu1 %vm2033_vm0, %v10110_v28  ;;  %9572 = vmatprep.mubr.msk.bf16.mxu0 %vm2033_vm0, %v10111_v29  ;;  %v10120_v28 = vld [vmem:[%s10228_s22 + $0x780] sm:$0xff]  }
 0x1bd   : > { %7292 = vst.msk [vmem:[%s10464_s27 + $0x5a0] sm:$0xf] %vm6931_vm1, %v8945_v42  ;;  %7039 = vst.msk [vmem:[%s10464_s27 + $0x1ac] sm:$0xf] %vm6931_vm1, %v8692_v60  ;;  %v8946_v46 = vpack.c.bf16 %v4280_v43, %v4280_v43  ;;  %9828 = vmatprep.mubr.msk.bf16.mxu1 %vm2033_vm0, %v10112_v35 }
 0x1be   : > { %7295 = vst.msk [vmem:[%s10464_s27 + $0x5ac] sm:$0xf] %vm6931_vm1, %v8948_v44  ;;  %7037 = vst.msk [vmem:[%s10464_s27 + $0x1a4] sm:$0xf] %vm6931_vm1, %v8690_v45  ;;  %v9466_v48 = vpop.f32.mrb[108].mxu0  ;;  %v10121_v44 = vld [vmem:[%s10228_s22 + $0x388] sm:$0xff]  }
 0x1bf   : > { %7293 = vst.msk [vmem:[%s10464_s27 + $0x5a4] sm:$0xf] %vm6931_vm1, %v8946_v46  ;;  %v3277_v49 = vadd.f32 %v11244_v38, %v9466_v48  ;;  %v9722_v50 = vpop.f32.mrb[108].mxu1  ;;  %v3268_v51 = vpop.f32.mrb[109].mxu0 }
 0x1c0   : > { %v4301_v53 = vadd.f32 %v11244_v38, %v9722_v50  ;;  %v3269_v54 = vadd.f32 %v11244_v38, %v3268_v51  ;;  %v4292_v55 = vpop.f32.mrb[109].mxu1  ;;  %v9467_v56 = vpop.f32.mrb[110].mxu0  ;;  %v10122_v50 = vld [vmem:[%s10228_s22 + $0x788] sm:$0xff]   ;;  %v10123_v51 = vld [vmem:[%s10228_s22 + $0x390] sm:$0xff]  }
 0x1c1   : > { %v8695_v59 = vpack.c.bf16 %v3277_v49, %v3277_v49  ;;  %v4293_v61 = vadd.f32 %v11244_v38, %v4292_v55  ;;  %v3280_v62 = vadd.f32 %v11244_v38, %v9467_v56  ;;  %v9723_v63 = vpop.f32.mrb[110].mxu1  ;;  %v3271_v47 = vpop.f32.mrb[111].mxu0 }
 0x1c2   : > { %v8951_v1 = vpack.c.bf16 %v4301_v53, %v4301_v53  ;;  %v8693_v2 = vpack.c.bf16 %v3269_v54, %v3269_v54  ;;  %v4304_v3 = vadd.f32 %v11244_v38, %v9723_v63  ;;  %v3272_v4 = vadd.f32 %v11244_v38, %v3271_v47  ;;  %v4295_v5 = vpop.f32.mrb[111].mxu1 }
 0x1c3   : > { %7042 = vst.msk [vmem:[%s10464_s27 + $0x1b8] sm:$0xf] %vm6931_vm1, %v8695_v59  ;;  %v8949_v6 = vpack.c.bf16 %v4293_v61, %v4293_v61  ;;  %v8696_v7 = vpack.c.bf16 %v3280_v62, %v3280_v62  ;;  %v4296_v8 = vadd.f32 %v11244_v38, %v4295_v5  ;;  %9573 = vmatmul.mubr.msk.bf16.gmra.mrb[216].mxu0 %vm2033_vm0, %v10113_v52 }
 0x1c4   : > { %7298 = vst.msk [vmem:[%s10464_s27 + $0x5b8] sm:$0xf] %vm6931_vm1, %v8951_v1  ;;  %7040 = vst.msk [vmem:[%s10464_s27 + $0x1b0] sm:$0xf] %vm6931_vm1, %v8693_v2  ;;  %v8952_v9 = vpack.c.bf16 %v4304_v3, %v4304_v3  ;;  %v8694_v10 = vpack.c.bf16 %v3272_v4, %v3272_v4  ;;  %9829 = vmatmul.mubr.msk.bf16.gmra.mrb[216].mxu1 %vm2033_vm0, %v10114_v57  ;;  %9576 = vmatprep.mubr.msk.bf16.mxu0 %vm2033_vm0, %v10115_v58  ;;  %v10124_v57 = vld [vmem:[%s10228_s22 + $0x790] sm:$0xff]  }
 0x1c5   : > { %7296 = vst.msk [vmem:[%s10464_s27 + $0x5b0] sm:$0xf] %vm6931_vm1, %v8949_v6  ;;  %7043 = vst.msk [vmem:[%s10464_s27 + $0x1bc] sm:$0xf] %vm6931_vm1, %v8696_v7  ;;  %v8950_v11 = vpack.c.bf16 %v4296_v8, %v4296_v8  ;;  %9832 = vmatprep.mubr.msk.bf16.mxu1 %vm2033_vm0, %v10116_v0 }
 0x1c6   : > { %7299 = vst.msk [vmem:[%s10464_s27 + $0x5bc] sm:$0xf] %vm6931_vm1, %v8952_v9  ;;  %7041 = vst.msk [vmem:[%s10464_s27 + $0x1b4] sm:$0xf] %vm6931_vm1, %v8694_v10  ;;  %v9470_v12 = vpop.f32.mrb[112].mxu0  ;;  %v10125_v9 = vld [vmem:[%s10228_s22 + $0x398] sm:$0xff]  }
 0x1c7   : > { %7297 = vst.msk [vmem:[%s10464_s27 + $0x5b4] sm:$0xf] %vm6931_vm1, %v8950_v11  ;;  %v3293_v13 = vadd.f32 %v11244_v38, %v9470_v12  ;;  %v9726_v14 = vpop.f32.mrb[112].mxu1  ;;  %v3284_v15 = vpop.f32.mrb[113].mxu0 }
 0x1c8   : > { %v4317_v17 = vadd.f32 %v11244_v38, %v9726_v14  ;;  %v3285_v18 = vadd.f32 %v11244_v38, %v3284_v15  ;;  %v4308_v19 = vpop.f32.mrb[113].mxu1  ;;  %v9471_v20 = vpop.f32.mrb[114].mxu0  ;;  %v10126_v14 = vld [vmem:[%s10228_s22 + $0x798] sm:$0xff]   ;;  %v10127_v15 = vld [vmem:[%s10228_s22 + $0x3a0] sm:$0xff]  }
 0x1c9   : > { %v8699_v23 = vpack.c.bf16 %v3293_v13, %v3293_v13  ;;  %v4309_v24 = vadd.f32 %v11244_v38, %v4308_v19  ;;  %v3296_v25 = vadd.f32 %v11244_v38, %v9471_v20  ;;  %v9727_v26 = vpop.f32.mrb[114].mxu1  ;;  %v3287_v27 = vpop.f32.mrb[115].mxu0 }
 0x1ca   : > { %v8955_v29 = vpack.c.bf16 %v4317_v17, %v4317_v17  ;;  %v8697_v30 = vpack.c.bf16 %v3285_v18, %v3285_v18  ;;  %v4320_v31 = vadd.f32 %v11244_v38, %v9727_v26  ;;  %v3288_v32 = vadd.f32 %v11244_v38, %v3287_v27  ;;  %v4311_v33 = vpop.f32.mrb[115].mxu1 }
 0x1cb   : > { %7046 = vst.msk [vmem:[%s10464_s27 + $0x1c8] sm:$0xf] %vm6931_vm1, %v8699_v23  ;;  %v8953_v34 = vpack.c.bf16 %v4309_v24, %v4309_v24  ;;  %v8700_v35 = vpack.c.bf16 %v3296_v25, %v3296_v25  ;;  %v4312_v36 = vadd.f32 %v11244_v38, %v4311_v33  ;;  %9577 = vmatmul.mubr.msk.bf16.gmra.mrb[220].mxu0 %vm2033_vm0, %v10117_v16 }
 0x1cc   : > { %7302 = vst.msk [vmem:[%s10464_s27 + $0x5c8] sm:$0xf] %vm6931_vm1, %v8955_v29  ;;  %7044 = vst.msk [vmem:[%s10464_s27 + $0x1c0] sm:$0xf] %vm6931_vm1, %v8697_v30  ;;  %v8956_v37 = vpack.c.bf16 %v4320_v31, %v4320_v31  ;;  %v8698_v39 = vpack.c.bf16 %v3288_v32, %v3288_v32  ;;  %9833 = vmatmul.mubr.msk.bf16.gmra.mrb[220].mxu1 %vm2033_vm0, %v10118_v21  ;;  %9580 = vmatprep.mubr.msk.bf16.mxu0 %vm2033_vm0, %v10119_v22  ;;  %v10128_v21 = vld [vmem:[%s10228_s22 + $0x7a0] sm:$0xff]  }
 0x1cd   : > { %7300 = vst.msk [vmem:[%s10464_s27 + $0x5c0] sm:$0xf] %vm6931_vm1, %v8953_v34  ;;  %7047 = vst.msk [vmem:[%s10464_s27 + $0x1cc] sm:$0xf] %vm6931_vm1, %v8700_v35  ;;  %v8954_v40 = vpack.c.bf16 %v4312_v36, %v4312_v36  ;;  %9836 = vmatprep.mubr.msk.bf16.mxu1 %vm2033_vm0, %v10120_v28 }
 0x1ce   : > { %7303 = vst.msk [vmem:[%s10464_s27 + $0x5cc] sm:$0xf] %vm6931_vm1, %v8956_v37  ;;  %7045 = vst.msk [vmem:[%s10464_s27 + $0x1c4] sm:$0xf] %vm6931_vm1, %v8698_v39  ;;  %v9474_v41 = vpop.f32.mrb[116].mxu0  ;;  %v10129_v37 = vld [vmem:[%s10228_s22 + $0x3a8] sm:$0xff]  }
 0x1cf   : > { %7301 = vst.msk [vmem:[%s10464_s27 + $0x5c4] sm:$0xf] %vm6931_vm1, %v8954_v40  ;;  %v3309_v42 = vadd.f32 %v11244_v38, %v9474_v41  ;;  %v9730_v60 = vpop.f32.mrb[116].mxu1  ;;  %v3300_v43 = vpop.f32.mrb[117].mxu0 }
 0x1d0   : > { %v4333_v45 = vadd.f32 %v11244_v38, %v9730_v60  ;;  %v3301_v46 = vadd.f32 %v11244_v38, %v3300_v43  ;;  %v4324_v48 = vpop.f32.mrb[117].mxu1  ;;  %v9475_v49 = vpop.f32.mrb[118].mxu0  ;;  %v10130_v60 = vld [vmem:[%s10228_s22 + $0x7a8] sm:$0xff]   ;;  %v10131_v43 = vld [vmem:[%s10228_s22 + $0x3b0] sm:$0xff]  }
 0x1d1   : > { %v8703_v52 = vpack.c.bf16 %v3309_v42, %v3309_v42  ;;  %v4325_v53 = vadd.f32 %v11244_v38, %v4324_v48  ;;  %v3312_v54 = vadd.f32 %v11244_v38, %v9475_v49  ;;  %v9731_v55 = vpop.f32.mrb[118].mxu1  ;;  %v3303_v56 = vpop.f32.mrb[119].mxu0 }
 0x1d2   : > { %v8959_v58 = vpack.c.bf16 %v4333_v45, %v4333_v45  ;;  %v8701_v59 = vpack.c.bf16 %v3301_v46, %v3301_v46  ;;  %v4336_v61 = vadd.f32 %v11244_v38, %v9731_v55  ;;  %v3304_v62 = vadd.f32 %v11244_v38, %v3303_v56  ;;  %v4327_v63 = vpop.f32.mrb[119].mxu1 }
 0x1d3   : > { %7050 = vst.msk [vmem:[%s10464_s27 + $0x1d8] sm:$0xf] %vm6931_vm1, %v8703_v52  ;;  %v8957_v47 = vpack.c.bf16 %v4325_v53, %v4325_v53  ;;  %v8704_v0 = vpack.c.bf16 %v3312_v54, %v3312_v54  ;;  %v4328_v1 = vadd.f32 %v11244_v38, %v4327_v63  ;;  %9581 = vmatmul.mubr.msk.bf16.gmra.mrb[224].mxu0 %vm2033_vm0, %v10121_v44 }
 0x1d4   : > { %7306 = vst.msk [vmem:[%s10464_s27 + $0x5d8] sm:$0xf] %vm6931_vm1, %v8959_v58  ;;  %7048 = vst.msk [vmem:[%s10464_s27 + $0x1d0] sm:$0xf] %vm6931_vm1, %v8701_v59  ;;  %v8960_v2 = vpack.c.bf16 %v4336_v61, %v4336_v61  ;;  %v8702_v3 = vpack.c.bf16 %v3304_v62, %v3304_v62  ;;  %9837 = vmatmul.mubr.msk.bf16.gmra.mrb[224].mxu1 %vm2033_vm0, %v10122_v50  ;;  %9584 = vmatprep.mubr.msk.bf16.mxu0 %vm2033_vm0, %v10123_v51  ;;  %v10132_v50 = vld [vmem:[%s10228_s22 + $0x7b0] sm:$0xff]  }
 0x1d5   : > { %7304 = vst.msk [vmem:[%s10464_s27 + $0x5d0] sm:$0xf] %vm6931_vm1, %v8957_v47  ;;  %7051 = vst.msk [vmem:[%s10464_s27 + $0x1dc] sm:$0xf] %vm6931_vm1, %v8704_v0  ;;  %v8958_v4 = vpack.c.bf16 %v4328_v1, %v4328_v1  ;;  %9840 = vmatprep.mubr.msk.bf16.mxu1 %vm2033_vm0, %v10124_v57 }
 0x1d6   : > { %7307 = vst.msk [vmem:[%s10464_s27 + $0x5dc] sm:$0xf] %vm6931_vm1, %v8960_v2  ;;  %7049 = vst.msk [vmem:[%s10464_s27 + $0x1d4] sm:$0xf] %vm6931_vm1, %v8702_v3  ;;  %v9478_v5 = vpop.f32.mrb[120].mxu0  ;;  %v10133_v2 = vld [vmem:[%s10228_s22 + $0x3b8] sm:$0xff]  }
 0x1d7   : > { %7305 = vst.msk [vmem:[%s10464_s27 + $0x5d4] sm:$0xf] %vm6931_vm1, %v8958_v4  ;;  %v3325_v6 = vadd.f32 %v11244_v38, %v9478_v5  ;;  %v9734_v7 = vpop.f32.mrb[120].mxu1  ;;  %v3316_v8 = vpop.f32.mrb[121].mxu0 }
 0x1d8   : > { %v4349_v10 = vadd.f32 %v11244_v38, %v9734_v7  ;;  %v3317_v11 = vadd.f32 %v11244_v38, %v3316_v8  ;;  %v4340_v12 = vpop.f32.mrb[121].mxu1  ;;  %v9479_v13 = vpop.f32.mrb[122].mxu0  ;;  %v10134_v7 = vld [vmem:[%s10228_s22 + $0x7b8] sm:$0xff]   ;;  %v10135_v8 = vld [vmem:[%s10228_s22 + $0x3c0] sm:$0xff]  }
 0x1d9   : > { %v8707_v16 = vpack.c.bf16 %v3325_v6, %v3325_v6  ;;  %v4341_v17 = vadd.f32 %v11244_v38, %v4340_v12  ;;  %v3328_v18 = vadd.f32 %v11244_v38, %v9479_v13  ;;  %v9735_v19 = vpop.f32.mrb[122].mxu1  ;;  %v3319_v20 = vpop.f32.mrb[123].mxu0 }
 0x1da   : > { %v8963_v22 = vpack.c.bf16 %v4349_v10, %v4349_v10  ;;  %v8705_v23 = vpack.c.bf16 %v3317_v11, %v3317_v11  ;;  %v4352_v24 = vadd.f32 %v11244_v38, %v9735_v19  ;;  %v3320_v25 = vadd.f32 %v11244_v38, %v3319_v20  ;;  %v4343_v26 = vpop.f32.mrb[123].mxu1 }
 0x1db   : > { %7054 = vst.msk [vmem:[%s10464_s27 + $0x1e8] sm:$0xf] %vm6931_vm1, %v8707_v16  ;;  %v8961_v27 = vpack.c.bf16 %v4341_v17, %v4341_v17  ;;  %v8708_v28 = vpack.c.bf16 %v3328_v18, %v3328_v18  ;;  %v4344_v29 = vadd.f32 %v11244_v38, %v4343_v26  ;;  %9585 = vmatmul.mubr.msk.bf16.gmra.mrb[228].mxu0 %vm2033_vm0, %v10125_v9 }
 0x1dc   : > { %7310 = vst.msk [vmem:[%s10464_s27 + $0x5e8] sm:$0xf] %vm6931_vm1, %v8963_v22  ;;  %7052 = vst.msk [vmem:[%s10464_s27 + $0x1e0] sm:$0xf] %vm6931_vm1, %v8705_v23  ;;  %v8964_v30 = vpack.c.bf16 %v4352_v24, %v4352_v24  ;;  %v8706_v31 = vpack.c.bf16 %v3320_v25, %v3320_v25  ;;  %9841 = vmatmul.mubr.msk.bf16.gmra.mrb[228].mxu1 %vm2033_vm0, %v10126_v14  ;;  %9588 = vmatprep.mubr.msk.bf16.mxu0 %vm2033_vm0, %v10127_v15  ;;  %v10136_v14 = vld [vmem:[%s10228_s22 + $0x7c0] sm:$0xff]  }
 0x1dd   : > { %7308 = vst.msk [vmem:[%s10464_s27 + $0x5e0] sm:$0xf] %vm6931_vm1, %v8961_v27  ;;  %7055 = vst.msk [vmem:[%s10464_s27 + $0x1ec] sm:$0xf] %vm6931_vm1, %v8708_v28  ;;  %v8962_v32 = vpack.c.bf16 %v4344_v29, %v4344_v29  ;;  %9844 = vmatprep.mubr.msk.bf16.mxu1 %vm2033_vm0, %v10128_v21 }
 0x1de   : > { %7311 = vst.msk [vmem:[%s10464_s27 + $0x5ec] sm:$0xf] %vm6931_vm1, %v8964_v30  ;;  %7053 = vst.msk [vmem:[%s10464_s27 + $0x1e4] sm:$0xf] %vm6931_vm1, %v8706_v31  ;;  %v9482_v33 = vpop.f32.mrb[124].mxu0  ;;  %v10137_v30 = vld [vmem:[%s10228_s22 + $0x3c8] sm:$0xff]  }
 0x1df   : > { %7309 = vst.msk [vmem:[%s10464_s27 + $0x5e4] sm:$0xf] %vm6931_vm1, %v8962_v32  ;;  %v3341_v34 = vadd.f32 %v11244_v38, %v9482_v33  ;;  %v9738_v35 = vpop.f32.mrb[124].mxu1  ;;  %v3332_v36 = vpop.f32.mrb[125].mxu0 }
 0x1e0   : > { %v4365_v39 = vadd.f32 %v11244_v38, %v9738_v35  ;;  %v3333_v40 = vadd.f32 %v11244_v38, %v3332_v36  ;;  %v4356_v41 = vpop.f32.mrb[125].mxu1  ;;  %v9483_v42 = vpop.f32.mrb[126].mxu0  ;;  %v10138_v35 = vld [vmem:[%s10228_s22 + $0x7c8] sm:$0xff]   ;;  %v10139_v36 = vld [vmem:[%s10228_s22 + $0x3d0] sm:$0xff]  }
 0x1e1   : > { %v8711_v44 = vpack.c.bf16 %v3341_v34, %v3341_v34  ;;  %v4357_v45 = vadd.f32 %v11244_v38, %v4356_v41  ;;  %v3344_v46 = vadd.f32 %v11244_v38, %v9483_v42  ;;  %v9739_v48 = vpop.f32.mrb[126].mxu1  ;;  %v3335_v49 = vpop.f32.mrb[127].mxu0 }
 0x1e2   : > { %v8967_v51 = vpack.c.bf16 %v4365_v39, %v4365_v39  ;;  %v8709_v52 = vpack.c.bf16 %v3333_v40, %v3333_v40  ;;  %v4368_v53 = vadd.f32 %v11244_v38, %v9739_v48  ;;  %v3336_v54 = vadd.f32 %v11244_v38, %v3335_v49  ;;  %v4359_v55 = vpop.f32.mrb[127].mxu1 }
 0x1e3   : > { %7058 = vst.msk [vmem:[%s10464_s27 + $0x1f8] sm:$0xf] %vm6931_vm1, %v8711_v44  ;;  %v8965_v56 = vpack.c.bf16 %v4357_v45, %v4357_v45  ;;  %v8712_v57 = vpack.c.bf16 %v3344_v46, %v3344_v46  ;;  %v4360_v58 = vadd.f32 %v11244_v38, %v4359_v55  ;;  %9589 = vmatmul.mubr.msk.bf16.gmra.mrb[232].mxu0 %vm2033_vm0, %v10129_v37 }
 0x1e4   : > { %7314 = vst.msk [vmem:[%s10464_s27 + $0x5f8] sm:$0xf] %vm6931_vm1, %v8967_v51  ;;  %7056 = vst.msk [vmem:[%s10464_s27 + $0x1f0] sm:$0xf] %vm6931_vm1, %v8709_v52  ;;  %v8968_v59 = vpack.c.bf16 %v4368_v53, %v4368_v53  ;;  %v8710_v61 = vpack.c.bf16 %v3336_v54, %v3336_v54  ;;  %9845 = vmatmul.mubr.msk.bf16.gmra.mrb[232].mxu1 %vm2033_vm0, %v10130_v60  ;;  %9592 = vmatprep.mubr.msk.bf16.mxu0 %vm2033_vm0, %v10131_v43  ;;  %v10140_v60 = vld [vmem:[%s10228_s22 + $0x7d0] sm:$0xff]  }
 0x1e5   : > { %7312 = vst.msk [vmem:[%s10464_s27 + $0x5f0] sm:$0xf] %vm6931_vm1, %v8965_v56  ;;  %7059 = vst.msk [vmem:[%s10464_s27 + $0x1fc] sm:$0xf] %vm6931_vm1, %v8712_v57  ;;  %v8966_v62 = vpack.c.bf16 %v4360_v58, %v4360_v58  ;;  %9848 = vmatprep.mubr.msk.bf16.mxu1 %vm2033_vm0, %v10132_v50 }
 0x1e6   : > { %7315 = vst.msk [vmem:[%s10464_s27 + $0x5fc] sm:$0xf] %vm6931_vm1, %v8968_v59  ;;  %7057 = vst.msk [vmem:[%s10464_s27 + $0x1f4] sm:$0xf] %vm6931_vm1, %v8710_v61  ;;  %v9486_v63 = vpop.f32.mrb[128].mxu0  ;;  %v10141_v59 = vld [vmem:[%s10228_s22 + $0x3d8] sm:$0xff]  }
 0x1e7   : > { %7313 = vst.msk [vmem:[%s10464_s27 + $0x5f4] sm:$0xf] %vm6931_vm1, %v8966_v62  ;;  %v3357_v47 = vadd.f32 %v11244_v38, %v9486_v63  ;;  %v9742_v0 = vpop.f32.mrb[128].mxu1  ;;  %v3348_v1 = vpop.f32.mrb[129].mxu0 }
 0x1e8   : > { %v4381_v3 = vadd.f32 %v11244_v38, %v9742_v0  ;;  %v3349_v4 = vadd.f32 %v11244_v38, %v3348_v1  ;;  %v4372_v5 = vpop.f32.mrb[129].mxu1  ;;  %v9487_v6 = vpop.f32.mrb[130].mxu0  ;;  %v10142_v0 = vld [vmem:[%s10228_s22 + $0x7d8] sm:$0xff]   ;;  %v10143_v1 = vld [vmem:[%s10228_s22 + $0x3e0] sm:$0xff]  }
 0x1e9   : > { %v8715_v9 = vpack.c.bf16 %v3357_v47, %v3357_v47  ;;  %v4373_v10 = vadd.f32 %v11244_v38, %v4372_v5  ;;  %v3360_v11 = vadd.f32 %v11244_v38, %v9487_v6  ;;  %v9743_v12 = vpop.f32.mrb[130].mxu1  ;;  %v3351_v13 = vpop.f32.mrb[131].mxu0 }
 0x1ea   : > { %v8971_v15 = vpack.c.bf16 %v4381_v3, %v4381_v3  ;;  %v8713_v16 = vpack.c.bf16 %v3349_v4, %v3349_v4  ;;  %v4384_v17 = vadd.f32 %v11244_v38, %v9743_v12  ;;  %v3352_v18 = vadd.f32 %v11244_v38, %v3351_v13  ;;  %v4375_v19 = vpop.f32.mrb[131].mxu1 }
 0x1eb   : > { %7062 = vst.msk [vmem:[%s10464_s27 + $0x208] sm:$0xf] %vm6931_vm1, %v8715_v9  ;;  %v8969_v20 = vpack.c.bf16 %v4373_v10, %v4373_v10  ;;  %v8716_v21 = vpack.c.bf16 %v3360_v11, %v3360_v11  ;;  %v4376_v22 = vadd.f32 %v11244_v38, %v4375_v19  ;;  %9593 = vmatmul.mubr.msk.bf16.gmra.mrb[236].mxu0 %vm2033_vm0, %v10133_v2 }
 0x1ec   : > { %7318 = vst.msk [vmem:[%s10464_s27 + $0x608] sm:$0xf] %vm6931_vm1, %v8971_v15  ;;  %7060 = vst.msk [vmem:[%s10464_s27 + $0x200] sm:$0xf] %vm6931_vm1, %v8713_v16  ;;  %v8972_v23 = vpack.c.bf16 %v4384_v17, %v4384_v17  ;;  %v8714_v24 = vpack.c.bf16 %v3352_v18, %v3352_v18  ;;  %9849 = vmatmul.mubr.msk.bf16.gmra.mrb[236].mxu1 %vm2033_vm0, %v10134_v7  ;;  %9596 = vmatprep.mubr.msk.bf16.mxu0 %vm2033_vm0, %v10135_v8  ;;  %v10144_v7 = vld [vmem:[%s10228_s22 + $0x7e0] sm:$0xff]  }
 0x1ed   : > { %7316 = vst.msk [vmem:[%s10464_s27 + $0x600] sm:$0xf] %vm6931_vm1, %v8969_v20  ;;  %7063 = vst.msk [vmem:[%s10464_s27 + $0x20c] sm:$0xf] %vm6931_vm1, %v8716_v21  ;;  %v8970_v25 = vpack.c.bf16 %v4376_v22, %v4376_v22  ;;  %9852 = vmatprep.mubr.msk.bf16.mxu1 %vm2033_vm0, %v10136_v14 }
 0x1ee   : > { %7319 = vst.msk [vmem:[%s10464_s27 + $0x60c] sm:$0xf] %vm6931_vm1, %v8972_v23  ;;  %7061 = vst.msk [vmem:[%s10464_s27 + $0x204] sm:$0xf] %vm6931_vm1, %v8714_v24  ;;  %v9490_v26 = vpop.f32.mrb[132].mxu0  ;;  %v10145_v23 = vld [vmem:[%s10228_s22 + $0x3e8] sm:$0xff]  }
 0x1ef   : > { %7317 = vst.msk [vmem:[%s10464_s27 + $0x604] sm:$0xf] %vm6931_vm1, %v8970_v25  ;;  %v3373_v27 = vadd.f32 %v11244_v38, %v9490_v26  ;;  %v9746_v28 = vpop.f32.mrb[132].mxu1  ;;  %v3364_v29 = vpop.f32.mrb[133].mxu0 }
 0x1f0   : > { %v4397_v31 = vadd.f32 %v11244_v38, %v9746_v28  ;;  %v3365_v32 = vadd.f32 %v11244_v38, %v3364_v29  ;;  %v4388_v33 = vpop.f32.mrb[133].mxu1  ;;  %v9491_v34 = vpop.f32.mrb[134].mxu0  ;;  %v10146_v28 = vld [vmem:[%s10228_s22 + $0x7e8] sm:$0xff]   ;;  %v10147_v29 = vld [vmem:[%s10228_s22 + $0x3f0] sm:$0xff]  }
 0x1f1   : > { %v8719_v37 = vpack.c.bf16 %v3373_v27, %v3373_v27  ;;  %v4389_v39 = vadd.f32 %v11244_v38, %v4388_v33  ;;  %v3376_v40 = vadd.f32 %v11244_v38, %v9491_v34  ;;  %v9747_v41 = vpop.f32.mrb[134].mxu1  ;;  %v3367_v42 = vpop.f32.mrb[135].mxu0 }
 0x1f2   : > { %v8975_v43 = vpack.c.bf16 %v4397_v31, %v4397_v31  ;;  %v8717_v44 = vpack.c.bf16 %v3365_v32, %v3365_v32  ;;  %v4400_v45 = vadd.f32 %v11244_v38, %v9747_v41  ;;  %v3368_v46 = vadd.f32 %v11244_v38, %v3367_v42  ;;  %v4391_v48 = vpop.f32.mrb[135].mxu1 }
 0x1f3   : > { %7066 = vst.msk [vmem:[%s10464_s27 + $0x218] sm:$0xf] %vm6931_vm1, %v8719_v37  ;;  %v8973_v49 = vpack.c.bf16 %v4389_v39, %v4389_v39  ;;  %v8720_v50 = vpack.c.bf16 %v3376_v40, %v3376_v40  ;;  %v4392_v51 = vadd.f32 %v11244_v38, %v4391_v48  ;;  %9597 = vmatmul.mubr.msk.bf16.gmra.mrb[240].mxu0 %vm2033_vm0, %v10137_v30 }
 0x1f4   : > { %7322 = vst.msk [vmem:[%s10464_s27 + $0x618] sm:$0xf] %vm6931_vm1, %v8975_v43  ;;  %7064 = vst.msk [vmem:[%s10464_s27 + $0x210] sm:$0xf] %vm6931_vm1, %v8717_v44  ;;  %v8976_v52 = vpack.c.bf16 %v4400_v45, %v4400_v45  ;;  %v8718_v53 = vpack.c.bf16 %v3368_v46, %v3368_v46  ;;  %9853 = vmatmul.mubr.msk.bf16.gmra.mrb[240].mxu1 %vm2033_vm0, %v10138_v35  ;;  %9600 = vmatprep.mubr.msk.bf16.mxu0 %vm2033_vm0, %v10139_v36  ;;  %v10148_v35 = vld [vmem:[%s10228_s22 + $0x7f0] sm:$0xff]  }
 0x1f5   : > { %7320 = vst.msk [vmem:[%s10464_s27 + $0x610] sm:$0xf] %vm6931_vm1, %v8973_v49  ;;  %7067 = vst.msk [vmem:[%s10464_s27 + $0x21c] sm:$0xf] %vm6931_vm1, %v8720_v50  ;;  %v8974_v54 = vpack.c.bf16 %v4392_v51, %v4392_v51  ;;  %9856 = vmatprep.mubr.msk.bf16.mxu1 %vm2033_vm0, %v10140_v60 }
 0x1f6   : > { %7323 = vst.msk [vmem:[%s10464_s27 + $0x61c] sm:$0xf] %vm6931_vm1, %v8976_v52  ;;  %7065 = vst.msk [vmem:[%s10464_s27 + $0x214] sm:$0xf] %vm6931_vm1, %v8718_v53  ;;  %v9494_v55 = vpop.f32.mrb[136].mxu0  ;;  %v10149_v52 = vld [vmem:[%s10228_s22 + $0x3f8] sm:$0xff]  }
 0x1f7   : > { %7321 = vst.msk [vmem:[%s10464_s27 + $0x614] sm:$0xf] %vm6931_vm1, %v8974_v54  ;;  %v3389_v56 = vadd.f32 %v11244_v38, %v9494_v55  ;;  %v9750_v57 = vpop.f32.mrb[136].mxu1  ;;  %v3380_v58 = vpop.f32.mrb[137].mxu0 }
 0x1f8   : > { %v4413_v61 = vadd.f32 %v11244_v38, %v9750_v57  ;;  %v3381_v62 = vadd.f32 %v11244_v38, %v3380_v58  ;;  %v4404_v63 = vpop.f32.mrb[137].mxu1  ;;  %v9495_v47 = vpop.f32.mrb[138].mxu0  ;;  %v10150_v57 = vld [vmem:[%s10228_s22 + $0x7f8] sm:$0xff]  }
 0x1f9   : > { %v8723_v2 = vpack.c.bf16 %v3389_v56, %v3389_v56  ;;  %v4405_v3 = vadd.f32 %v11244_v38, %v4404_v63  ;;  %v3392_v4 = vadd.f32 %v11244_v38, %v9495_v47  ;;  %v9751_v5 = vpop.f32.mrb[138].mxu1  ;;  %v3383_v6 = vpop.f32.mrb[139].mxu0 }
 0x1fa   : > { %v8979_v8 = vpack.c.bf16 %v4413_v61, %v4413_v61  ;;  %v8721_v9 = vpack.c.bf16 %v3381_v62, %v3381_v62  ;;  %v4416_v10 = vadd.f32 %v11244_v38, %v9751_v5  ;;  %v3384_v11 = vadd.f32 %v11244_v38, %v3383_v6  ;;  %v4407_v12 = vpop.f32.mrb[139].mxu1 }
 0x1fb   : > { %7070 = vst.msk [vmem:[%s10464_s27 + $0x228] sm:$0xf] %vm6931_vm1, %v8723_v2  ;;  %v8977_v13 = vpack.c.bf16 %v4405_v3, %v4405_v3  ;;  %v8724_v14 = vpack.c.bf16 %v3392_v4, %v3392_v4  ;;  %v4408_v15 = vadd.f32 %v11244_v38, %v4407_v12  ;;  %9601 = vmatmul.mubr.msk.bf16.gmra.mrb[244].mxu0 %vm2033_vm0, %v10141_v59 }
 0x1fc   : > { %7326 = vst.msk [vmem:[%s10464_s27 + $0x628] sm:$0xf] %vm6931_vm1, %v8979_v8  ;;  %7068 = vst.msk [vmem:[%s10464_s27 + $0x220] sm:$0xf] %vm6931_vm1, %v8721_v9  ;;  %v8980_v16 = vpack.c.bf16 %v4416_v10, %v4416_v10  ;;  %v8722_v17 = vpack.c.bf16 %v3384_v11, %v3384_v11  ;;  %9857 = vmatmul.mubr.msk.bf16.gmra.mrb[244].mxu1 %vm2033_vm0, %v10142_v0  ;;  %9604 = vmatprep.mubr.msk.bf16.mxu0 %vm2033_vm0, %v10143_v1 }
 0x1fd   : > { %7324 = vst.msk [vmem:[%s10464_s27 + $0x620] sm:$0xf] %vm6931_vm1, %v8977_v13  ;;  %7071 = vst.msk [vmem:[%s10464_s27 + $0x22c] sm:$0xf] %vm6931_vm1, %v8724_v14  ;;  %v8978_v18 = vpack.c.bf16 %v4408_v15, %v4408_v15  ;;  %9860 = vmatprep.mubr.msk.bf16.mxu1 %vm2033_vm0, %v10144_v7 }
 0x1fe   : > { %7327 = vst.msk [vmem:[%s10464_s27 + $0x62c] sm:$0xf] %vm6931_vm1, %v8980_v16  ;;  %7069 = vst.msk [vmem:[%s10464_s27 + $0x224] sm:$0xf] %vm6931_vm1, %v8722_v17  ;;  %v9498_v19 = vpop.f32.mrb[140].mxu0 }
 0x1ff   : > { %7325 = vst.msk [vmem:[%s10464_s27 + $0x624] sm:$0xf] %vm6931_vm1, %v8978_v18  ;;  %v3405_v20 = vadd.f32 %v11244_v38, %v9498_v19  ;;  %v9754_v21 = vpop.f32.mrb[140].mxu1  ;;  %v3396_v22 = vpop.f32.mrb[141].mxu0  ;;  %v11658_v19 = vld [vmem:[%s12321_s2] ss:$0 sm:$0xff] }
 0x200   : > { %v4429_v24 = vadd.f32 %v11244_v38, %v9754_v21  ;;  %v3397_v25 = vadd.f32 %v11244_v38, %v3396_v22  ;;  %v4420_v26 = vpop.f32.mrb[141].mxu1  ;;  %v9499_v27 = vpop.f32.mrb[142].mxu0 }
 0x201   : > { %v8727_v30 = vpack.c.bf16 %v3405_v20, %v3405_v20  ;;  %v4421_v31 = vadd.f32 %v11244_v38, %v4420_v26  ;;  %v3408_v32 = vadd.f32 %v11244_v38, %v9499_v27  ;;  %v9755_v33 = vpop.f32.mrb[142].mxu1  ;;  %v3399_v34 = vpop.f32.mrb[143].mxu0 }
 0x202   : > { %v8983_v36 = vpack.c.bf16 %v4429_v24, %v4429_v24  ;;  %v8725_v37 = vpack.c.bf16 %v3397_v25, %v3397_v25  ;;  %v4432_v39 = vadd.f32 %v11244_v38, %v9755_v33  ;;  %v3400_v40 = vadd.f32 %v11244_v38, %v3399_v34  ;;  %v4423_v41 = vpop.f32.mrb[143].mxu1 }
 0x203   : > { %7074 = vst.msk [vmem:[%s10464_s27 + $0x238] sm:$0xf] %vm6931_vm1, %v8727_v30  ;;  %v8981_v42 = vpack.c.bf16 %v4421_v31, %v4421_v31  ;;  %v8728_v60 = vpack.c.bf16 %v3408_v32, %v3408_v32  ;;  %v4424_v43 = vadd.f32 %v11244_v38, %v4423_v41  ;;  %9605 = vmatmul.mubr.msk.bf16.gmra.mrb[248].mxu0 %vm2033_vm0, %v10145_v23 }
 0x204   : > { %7330 = vst.msk [vmem:[%s10464_s27 + $0x638] sm:$0xf] %vm6931_vm1, %v8983_v36  ;;  %7072 = vst.msk [vmem:[%s10464_s27 + $0x230] sm:$0xf] %vm6931_vm1, %v8725_v37  ;;  %v8984_v44 = vpack.c.bf16 %v4432_v39, %v4432_v39  ;;  %v8726_v45 = vpack.c.bf16 %v3400_v40, %v3400_v40  ;;  %9861 = vmatmul.mubr.msk.bf16.gmra.mrb[248].mxu1 %vm2033_vm0, %v10146_v28  ;;  %9608 = vmatprep.mubr.msk.bf16.mxu0 %vm2033_vm0, %v10147_v29 }
 0x205   : > { %7328 = vst.msk [vmem:[%s10464_s27 + $0x630] sm:$0xf] %vm6931_vm1, %v8981_v42  ;;  %7075 = vst.msk [vmem:[%s10464_s27 + $0x23c] sm:$0xf] %vm6931_vm1, %v8728_v60  ;;  %v8982_v46 = vpack.c.bf16 %v4424_v43, %v4424_v43  ;;  %9864 = vmatprep.mubr.msk.bf16.mxu1 %vm2033_vm0, %v10148_v35 }
 0x206   : > { %7331 = vst.msk [vmem:[%s10464_s27 + $0x63c] sm:$0xf] %vm6931_vm1, %v8984_v44  ;;  %7073 = vst.msk [vmem:[%s10464_s27 + $0x234] sm:$0xf] %vm6931_vm1, %v8726_v45  ;;  %v9502_v48 = vpop.f32.mrb[144].mxu0 }
 0x207   : > { %7329 = vst.msk [vmem:[%s10464_s27 + $0x634] sm:$0xf] %vm6931_vm1, %v8982_v46  ;;  %v3421_v49 = vadd.f32 %v11244_v38, %v9502_v48  ;;  %v9758_v50 = vpop.f32.mrb[144].mxu1  ;;  %v3412_v51 = vpop.f32.mrb[145].mxu0 }
 0x208   : > { %v4445_v53 = vadd.f32 %v11244_v38, %v9758_v50  ;;  %v3413_v54 = vadd.f32 %v11244_v38, %v3412_v51  ;;  %v4436_v55 = vpop.f32.mrb[145].mxu1  ;;  %v9503_v56 = vpop.f32.mrb[146].mxu0 }
 0x209   : > { %v8731_v58 = vpack.c.bf16 %v3421_v49, %v3421_v49  ;;  %v4437_v59 = vadd.f32 %v11244_v38, %v4436_v55  ;;  %v3424_v61 = vadd.f32 %v11244_v38, %v9503_v56  ;;  %v9759_v62 = vpop.f32.mrb[146].mxu1  ;;  %v3415_v63 = vpop.f32.mrb[147].mxu0 }
 0x20a   : > { %v8987_v47 = vpack.c.bf16 %v4445_v53, %v4445_v53  ;;  %v8729_v0 = vpack.c.bf16 %v3413_v54, %v3413_v54  ;;  %v4448_v1 = vadd.f32 %v11244_v38, %v9759_v62  ;;  %v3416_v2 = vadd.f32 %v11244_v38, %v3415_v63  ;;  %v4439_v3 = vpop.f32.mrb[147].mxu1 }
 0x20b   : > { %7078 = vst.msk [vmem:[%s10464_s27 + $0x248] sm:$0xf] %vm6931_vm1, %v8731_v58  ;;  %v8985_v4 = vpack.c.bf16 %v4437_v59, %v4437_v59  ;;  %v8732_v5 = vpack.c.bf16 %v3424_v61, %v3424_v61  ;;  %v4440_v6 = vadd.f32 %v11244_v38, %v4439_v3  ;;  %9609 = vmatmul.mubr.msk.bf16.gmra.mrb[252].mxu0 %vm2033_vm0, %v10149_v52 }
 0x20c   : > { %7334 = vst.msk [vmem:[%s10464_s27 + $0x648] sm:$0xf] %vm6931_vm1, %v8987_v47  ;;  %7076 = vst.msk [vmem:[%s10464_s27 + $0x240] sm:$0xf] %vm6931_vm1, %v8729_v0  ;;  %v8988_v7 = vpack.c.bf16 %v4448_v1, %v4448_v1  ;;  %v8730_v8 = vpack.c.bf16 %v3416_v2, %v3416_v2  ;;  %9865 = vmatmul.mubr.msk.bf16.gmra.mrb[252].mxu1 %vm2033_vm0, %v10150_v57 }
 0x20d   : > { %7332 = vst.msk [vmem:[%s10464_s27 + $0x640] sm:$0xf] %vm6931_vm1, %v8985_v4  ;;  %7079 = vst.msk [vmem:[%s10464_s27 + $0x24c] sm:$0xf] %vm6931_vm1, %v8732_v5  ;;  %v8986_v9 = vpack.c.bf16 %v4440_v6, %v4440_v6 }
 0x20e   : > { %7335 = vst.msk [vmem:[%s10464_s27 + $0x64c] sm:$0xf] %vm6931_vm1, %v8988_v7  ;;  %7077 = vst.msk [vmem:[%s10464_s27 + $0x244] sm:$0xf] %vm6931_vm1, %v8730_v8  ;;  %v9506_v10 = vpop.f32.mrb[148].mxu0 }
 0x20f   : > { %7333 = vst.msk [vmem:[%s10464_s27 + $0x644] sm:$0xf] %vm6931_vm1, %v8986_v9  ;;  %v3437_v11 = vadd.f32 %v11244_v38, %v9506_v10  ;;  %v9762_v12 = vpop.f32.mrb[148].mxu1  ;;  %v3428_v13 = vpop.f32.mrb[149].mxu0 }
 0x210   : > { %v4461_v14 = vadd.f32 %v11244_v38, %v9762_v12  ;;  %v3429_v15 = vadd.f32 %v11244_v38, %v3428_v13  ;;  %v4452_v16 = vpop.f32.mrb[149].mxu1  ;;  %v9507_v17 = vpop.f32.mrb[150].mxu0 }
 0x211   : > { %v8735_v18 = vpack.c.bf16 %v3437_v11, %v3437_v11  ;;  %v4453_v20 = vadd.f32 %v11658_v19, %v4452_v16  ;;  %v3440_v21 = vadd.f32 %v11658_v19, %v9507_v17  ;;  %v9763_v22 = vpop.f32.mrb[150].mxu1  ;;  %v3431_v23 = vpop.f32.mrb[151].mxu0 }
 0x212   : > { %v8991_v24 = vpack.c.bf16 %v4461_v14, %v4461_v14  ;;  %v8733_v38 = vpack.c.bf16 %v3429_v15, %v3429_v15  ;;  %v4464_v25 = vadd.f32 %v11658_v19, %v9763_v22  ;;  %v3432_v26 = vadd.f32 %v11658_v19, %v3431_v23  ;;  %v4455_v27 = vpop.f32.mrb[151].mxu1 }
 0x213   : > { %7082 = vst.msk [vmem:[%s10464_s27 + $0x258] sm:$0xf] %vm6931_vm1, %v8735_v18  ;;  %v8989_v28 = vpack.c.bf16 %v4453_v20, %v4453_v20  ;;  %v8736_v29 = vpack.c.bf16 %v3440_v21, %v3440_v21  ;;  %v4456_v30 = vadd.f32 %v11658_v19, %v4455_v27 }
 0x214   : > { %7338 = vst.msk [vmem:[%s10464_s27 + $0x658] sm:$0xf] %vm6931_vm1, %v8991_v24  ;;  %7080 = vst.msk [vmem:[%s10464_s27 + $0x250] sm:$0xf] %vm6931_vm1, %v8733_v38  ;;  %v8992_v31 = vpack.c.bf16 %v4464_v25, %v4464_v25  ;;  %v8734_v32 = vpack.c.bf16 %v3432_v26, %v3432_v26 }
 0x215   : > { %7336 = vst.msk [vmem:[%s10464_s27 + $0x650] sm:$0xf] %vm6931_vm1, %v8989_v28  ;;  %7083 = vst.msk [vmem:[%s10464_s27 + $0x25c] sm:$0xf] %vm6931_vm1, %v8736_v29  ;;  %v8990_v33 = vpack.c.bf16 %v4456_v30, %v4456_v30 }
 0x216   : > { %7339 = vst.msk [vmem:[%s10464_s27 + $0x65c] sm:$0xf] %vm6931_vm1, %v8992_v31  ;;  %7081 = vst.msk [vmem:[%s10464_s27 + $0x254] sm:$0xf] %vm6931_vm1, %v8734_v32  ;;  %v9510_v34 = vpop.f32.mrb[152].mxu0 }
 0x217   : > { %7337 = vst.msk [vmem:[%s10464_s27 + $0x654] sm:$0xf] %vm6931_vm1, %v8990_v33  ;;  %v3453_v35 = vadd.f32 %v11658_v19, %v9510_v34  ;;  %v9766_v36 = vpop.f32.mrb[152].mxu1  ;;  %v3444_v37 = vpop.f32.mrb[153].mxu0 }
 0x218   : > { %v4477_v39 = vadd.f32 %v11658_v19, %v9766_v36  ;;  %v3445_v40 = vadd.f32 %v11658_v19, %v3444_v37  ;;  %v4468_v41 = vpop.f32.mrb[153].mxu1  ;;  %v9511_v42 = vpop.f32.mrb[154].mxu0 }
 0x219   : > { %v8739_v60 = vpack.c.bf16 %v3453_v35, %v3453_v35  ;;  %v4469_v43 = vadd.f32 %v11658_v19, %v4468_v41  ;;  %v3456_v44 = vadd.f32 %v11658_v19, %v9511_v42  ;;  %v9767_v45 = vpop.f32.mrb[154].mxu1  ;;  %v3447_v46 = vpop.f32.mrb[155].mxu0 }
 0x21a   : > { %v8995_v48 = vpack.c.bf16 %v4477_v39, %v4477_v39  ;;  %v8737_v49 = vpack.c.bf16 %v3445_v40, %v3445_v40  ;;  %v4480_v50 = vadd.f32 %v11658_v19, %v9767_v45  ;;  %v3448_v51 = vadd.f32 %v11658_v19, %v3447_v46  ;;  %v4471_v52 = vpop.f32.mrb[155].mxu1 }
 0x21b   : > { %7086 = vst.msk [vmem:[%s10464_s27 + $0x268] sm:$0xf] %vm6931_vm1, %v8739_v60  ;;  %v8993_v53 = vpack.c.bf16 %v4469_v43, %v4469_v43  ;;  %v8740_v54 = vpack.c.bf16 %v3456_v44, %v3456_v44  ;;  %v4472_v55 = vadd.f32 %v11658_v19, %v4471_v52 }
 0x21c   : > { %7342 = vst.msk [vmem:[%s10464_s27 + $0x668] sm:$0xf] %vm6931_vm1, %v8995_v48  ;;  %7084 = vst.msk [vmem:[%s10464_s27 + $0x260] sm:$0xf] %vm6931_vm1, %v8737_v49  ;;  %v8996_v56 = vpack.c.bf16 %v4480_v50, %v4480_v50  ;;  %v8738_v57 = vpack.c.bf16 %v3448_v51, %v3448_v51 }
 0x21d   : > { %7340 = vst.msk [vmem:[%s10464_s27 + $0x660] sm:$0xf] %vm6931_vm1, %v8993_v53  ;;  %7087 = vst.msk [vmem:[%s10464_s27 + $0x26c] sm:$0xf] %vm6931_vm1, %v8740_v54  ;;  %v8994_v58 = vpack.c.bf16 %v4472_v55, %v4472_v55 }
 0x21e   : > { %7343 = vst.msk [vmem:[%s10464_s27 + $0x66c] sm:$0xf] %vm6931_vm1, %v8996_v56  ;;  %7085 = vst.msk [vmem:[%s10464_s27 + $0x264] sm:$0xf] %vm6931_vm1, %v8738_v57  ;;  %v9514_v59 = vpop.f32.mrb[156].mxu0 }
 0x21f   : > { %7341 = vst.msk [vmem:[%s10464_s27 + $0x664] sm:$0xf] %vm6931_vm1, %v8994_v58  ;;  %v3469_v61 = vadd.f32 %v11658_v19, %v9514_v59  ;;  %v9770_v62 = vpop.f32.mrb[156].mxu1  ;;  %v3460_v63 = vpop.f32.mrb[157].mxu0 }
 0x220   : > { %v4493_v47 = vadd.f32 %v11658_v19, %v9770_v62  ;;  %v3461_v0 = vadd.f32 %v11658_v19, %v3460_v63  ;;  %v4484_v1 = vpop.f32.mrb[157].mxu1  ;;  %v9515_v2 = vpop.f32.mrb[158].mxu0 }
 0x221   : > { %v8743_v3 = vpack.c.bf16 %v3469_v61, %v3469_v61  ;;  %v4485_v4 = vadd.f32 %v11658_v19, %v4484_v1  ;;  %v3472_v5 = vadd.f32 %v11658_v19, %v9515_v2  ;;  %v9771_v6 = vpop.f32.mrb[158].mxu1  ;;  %v3463_v7 = vpop.f32.mrb[159].mxu0 }
 0x222   : > { %v8999_v8 = vpack.c.bf16 %v4493_v47, %v4493_v47  ;;  %v8741_v9 = vpack.c.bf16 %v3461_v0, %v3461_v0  ;;  %v4496_v10 = vadd.f32 %v11658_v19, %v9771_v6  ;;  %v3464_v11 = vadd.f32 %v11658_v19, %v3463_v7  ;;  %v4487_v12 = vpop.f32.mrb[159].mxu1 }
 0x223   : > { %7090 = vst.msk [vmem:[%s10464_s27 + $0x278] sm:$0xf] %vm6931_vm1, %v8743_v3  ;;  %v8997_v13 = vpack.c.bf16 %v4485_v4, %v4485_v4  ;;  %v8744_v14 = vpack.c.bf16 %v3472_v5, %v3472_v5  ;;  %v4488_v15 = vadd.f32 %v11658_v19, %v4487_v12 }
 0x224   : > { %7346 = vst.msk [vmem:[%s10464_s27 + $0x678] sm:$0xf] %vm6931_vm1, %v8999_v8  ;;  %7088 = vst.msk [vmem:[%s10464_s27 + $0x270] sm:$0xf] %vm6931_vm1, %v8741_v9  ;;  %v9000_v16 = vpack.c.bf16 %v4496_v10, %v4496_v10  ;;  %v8742_v17 = vpack.c.bf16 %v3464_v11, %v3464_v11 }
 0x225   : > { %7344 = vst.msk [vmem:[%s10464_s27 + $0x670] sm:$0xf] %vm6931_vm1, %v8997_v13  ;;  %7091 = vst.msk [vmem:[%s10464_s27 + $0x27c] sm:$0xf] %vm6931_vm1, %v8744_v14  ;;  %v8998_v18 = vpack.c.bf16 %v4488_v15, %v4488_v15 }
 0x226   : > { %7347 = vst.msk [vmem:[%s10464_s27 + $0x67c] sm:$0xf] %vm6931_vm1, %v9000_v16  ;;  %7089 = vst.msk [vmem:[%s10464_s27 + $0x274] sm:$0xf] %vm6931_vm1, %v8742_v17  ;;  %v9518_v20 = vpop.f32.mrb[160].mxu0 }
 0x227   : > { %7345 = vst.msk [vmem:[%s10464_s27 + $0x674] sm:$0xf] %vm6931_vm1, %v8998_v18  ;;  %v3485_v21 = vadd.f32 %v11658_v19, %v9518_v20  ;;  %v9774_v22 = vpop.f32.mrb[160].mxu1  ;;  %v3476_v23 = vpop.f32.mrb[161].mxu0 }
 0x228   : > { %v4509_v24 = vadd.f32 %v11658_v19, %v9774_v22  ;;  %v3477_v38 = vadd.f32 %v11658_v19, %v3476_v23  ;;  %v4500_v25 = vpop.f32.mrb[161].mxu1  ;;  %v9519_v26 = vpop.f32.mrb[162].mxu0 }
 0x229   : > { %v8747_v27 = vpack.c.bf16 %v3485_v21, %v3485_v21  ;;  %v4501_v28 = vadd.f32 %v11658_v19, %v4500_v25  ;;  %v3488_v29 = vadd.f32 %v11658_v19, %v9519_v26  ;;  %v9775_v30 = vpop.f32.mrb[162].mxu1  ;;  %v3479_v31 = vpop.f32.mrb[163].mxu0 }
 0x22a   : > { %v9003_v32 = vpack.c.bf16 %v4509_v24, %v4509_v24  ;;  %v8745_v33 = vpack.c.bf16 %v3477_v38, %v3477_v38  ;;  %v4512_v34 = vadd.f32 %v11658_v19, %v9775_v30  ;;  %v3480_v35 = vadd.f32 %v11658_v19, %v3479_v31  ;;  %v4503_v36 = vpop.f32.mrb[163].mxu1 }
 0x22b   : > { %7094 = vst.msk [vmem:[%s10464_s27 + $0x288] sm:$0xf] %vm6931_vm1, %v8747_v27  ;;  %v9001_v37 = vpack.c.bf16 %v4501_v28, %v4501_v28  ;;  %v8748_v39 = vpack.c.bf16 %v3488_v29, %v3488_v29  ;;  %v4504_v40 = vadd.f32 %v11658_v19, %v4503_v36 }
 0x22c   : > { %7350 = vst.msk [vmem:[%s10464_s27 + $0x688] sm:$0xf] %vm6931_vm1, %v9003_v32  ;;  %7092 = vst.msk [vmem:[%s10464_s27 + $0x280] sm:$0xf] %vm6931_vm1, %v8745_v33  ;;  %v9004_v41 = vpack.c.bf16 %v4512_v34, %v4512_v34  ;;  %v8746_v42 = vpack.c.bf16 %v3480_v35, %v3480_v35 }
 0x22d   : > { %7348 = vst.msk [vmem:[%s10464_s27 + $0x680] sm:$0xf] %vm6931_vm1, %v9001_v37  ;;  %7095 = vst.msk [vmem:[%s10464_s27 + $0x28c] sm:$0xf] %vm6931_vm1, %v8748_v39  ;;  %v9002_v60 = vpack.c.bf16 %v4504_v40, %v4504_v40 }
 0x22e   : > { %7351 = vst.msk [vmem:[%s10464_s27 + $0x68c] sm:$0xf] %vm6931_vm1, %v9004_v41  ;;  %7093 = vst.msk [vmem:[%s10464_s27 + $0x284] sm:$0xf] %vm6931_vm1, %v8746_v42  ;;  %v9522_v43 = vpop.f32.mrb[164].mxu0 }
 0x22f   : > { %7349 = vst.msk [vmem:[%s10464_s27 + $0x684] sm:$0xf] %vm6931_vm1, %v9002_v60  ;;  %v3501_v44 = vadd.f32 %v11658_v19, %v9522_v43  ;;  %v9778_v45 = vpop.f32.mrb[164].mxu1  ;;  %v3492_v46 = vpop.f32.mrb[165].mxu0 }
 0x230   : > { %v4525_v48 = vadd.f32 %v11658_v19, %v9778_v45  ;;  %v3493_v49 = vadd.f32 %v11658_v19, %v3492_v46  ;;  %v4516_v50 = vpop.f32.mrb[165].mxu1  ;;  %v9523_v51 = vpop.f32.mrb[166].mxu0 }
 0x231   : > { %v8751_v52 = vpack.c.bf16 %v3501_v44, %v3501_v44  ;;  %v4517_v53 = vadd.f32 %v11658_v19, %v4516_v50  ;;  %v3504_v54 = vadd.f32 %v11658_v19, %v9523_v51  ;;  %v9779_v55 = vpop.f32.mrb[166].mxu1  ;;  %v3495_v56 = vpop.f32.mrb[167].mxu0 }
 0x232   : > { %v9007_v57 = vpack.c.bf16 %v4525_v48, %v4525_v48  ;;  %v8749_v58 = vpack.c.bf16 %v3493_v49, %v3493_v49  ;;  %v4528_v59 = vadd.f32 %v11658_v19, %v9779_v55  ;;  %v3496_v61 = vadd.f32 %v11658_v19, %v3495_v56  ;;  %v4519_v62 = vpop.f32.mrb[167].mxu1 }
 0x233   : > { %7098 = vst.msk [vmem:[%s10464_s27 + $0x298] sm:$0xf] %vm6931_vm1, %v8751_v52  ;;  %v9005_v63 = vpack.c.bf16 %v4517_v53, %v4517_v53  ;;  %v8752_v47 = vpack.c.bf16 %v3504_v54, %v3504_v54  ;;  %v4520_v0 = vadd.f32 %v11658_v19, %v4519_v62 }
 0x234   : > { %7354 = vst.msk [vmem:[%s10464_s27 + $0x698] sm:$0xf] %vm6931_vm1, %v9007_v57  ;;  %7096 = vst.msk [vmem:[%s10464_s27 + $0x290] sm:$0xf] %vm6931_vm1, %v8749_v58  ;;  %v9008_v1 = vpack.c.bf16 %v4528_v59, %v4528_v59  ;;  %v8750_v2 = vpack.c.bf16 %v3496_v61, %v3496_v61 }
 0x235   : > { %7352 = vst.msk [vmem:[%s10464_s27 + $0x690] sm:$0xf] %vm6931_vm1, %v9005_v63  ;;  %7099 = vst.msk [vmem:[%s10464_s27 + $0x29c] sm:$0xf] %vm6931_vm1, %v8752_v47  ;;  %v9006_v3 = vpack.c.bf16 %v4520_v0, %v4520_v0 }
 0x236   : > { %7355 = vst.msk [vmem:[%s10464_s27 + $0x69c] sm:$0xf] %vm6931_vm1, %v9008_v1  ;;  %7097 = vst.msk [vmem:[%s10464_s27 + $0x294] sm:$0xf] %vm6931_vm1, %v8750_v2  ;;  %v9526_v4 = vpop.f32.mrb[168].mxu0 }
 0x237   : > { %7353 = vst.msk [vmem:[%s10464_s27 + $0x694] sm:$0xf] %vm6931_vm1, %v9006_v3  ;;  %v3517_v5 = vadd.f32 %v11658_v19, %v9526_v4  ;;  %v9782_v6 = vpop.f32.mrb[168].mxu1  ;;  %v3508_v7 = vpop.f32.mrb[169].mxu0 }
 0x238   : > { %v4541_v8 = vadd.f32 %v11658_v19, %v9782_v6  ;;  %v3509_v9 = vadd.f32 %v11658_v19, %v3508_v7  ;;  %v4532_v10 = vpop.f32.mrb[169].mxu1  ;;  %v9527_v11 = vpop.f32.mrb[170].mxu0 }
 0x239   : > { %v8755_v12 = vpack.c.bf16 %v3517_v5, %v3517_v5  ;;  %v4533_v13 = vadd.f32 %v11658_v19, %v4532_v10  ;;  %v3520_v14 = vadd.f32 %v11658_v19, %v9527_v11  ;;  %v9783_v15 = vpop.f32.mrb[170].mxu1  ;;  %v3511_v16 = vpop.f32.mrb[171].mxu0 }
 0x23a   : > { %v9011_v17 = vpack.c.bf16 %v4541_v8, %v4541_v8  ;;  %v8753_v18 = vpack.c.bf16 %v3509_v9, %v3509_v9  ;;  %v4544_v20 = vadd.f32 %v11658_v19, %v9783_v15  ;;  %v3512_v21 = vadd.f32 %v11658_v19, %v3511_v16  ;;  %v4535_v22 = vpop.f32.mrb[171].mxu1 }
 0x23b   : > { %7102 = vst.msk [vmem:[%s10464_s27 + $0x2a8] sm:$0xf] %vm6931_vm1, %v8755_v12  ;;  %v9009_v23 = vpack.c.bf16 %v4533_v13, %v4533_v13  ;;  %v8756_v24 = vpack.c.bf16 %v3520_v14, %v3520_v14  ;;  %v4536_v38 = vadd.f32 %v11658_v19, %v4535_v22 }
 0x23c   : > { %7358 = vst.msk [vmem:[%s10464_s27 + $0x6a8] sm:$0xf] %vm6931_vm1, %v9011_v17  ;;  %7100 = vst.msk [vmem:[%s10464_s27 + $0x2a0] sm:$0xf] %vm6931_vm1, %v8753_v18  ;;  %v9012_v25 = vpack.c.bf16 %v4544_v20, %v4544_v20  ;;  %v8754_v26 = vpack.c.bf16 %v3512_v21, %v3512_v21 }
 0x23d   : > { %7356 = vst.msk [vmem:[%s10464_s27 + $0x6a0] sm:$0xf] %vm6931_vm1, %v9009_v23  ;;  %7103 = vst.msk [vmem:[%s10464_s27 + $0x2ac] sm:$0xf] %vm6931_vm1, %v8756_v24  ;;  %v9010_v27 = vpack.c.bf16 %v4536_v38, %v4536_v38 }
 0x23e   : > { %7359 = vst.msk [vmem:[%s10464_s27 + $0x6ac] sm:$0xf] %vm6931_vm1, %v9012_v25  ;;  %7101 = vst.msk [vmem:[%s10464_s27 + $0x2a4] sm:$0xf] %vm6931_vm1, %v8754_v26  ;;  %v9530_v28 = vpop.f32.mrb[172].mxu0 }
 0x23f   : > { %7357 = vst.msk [vmem:[%s10464_s27 + $0x6a4] sm:$0xf] %vm6931_vm1, %v9010_v27  ;;  %v3533_v29 = vadd.f32 %v11658_v19, %v9530_v28  ;;  %v9786_v30 = vpop.f32.mrb[172].mxu1  ;;  %v3524_v31 = vpop.f32.mrb[173].mxu0 }
 0x240   : > { %v4557_v32 = vadd.f32 %v11658_v19, %v9786_v30  ;;  %v3525_v33 = vadd.f32 %v11658_v19, %v3524_v31  ;;  %v4548_v34 = vpop.f32.mrb[173].mxu1  ;;  %v9531_v35 = vpop.f32.mrb[174].mxu0 }
 0x241   : > { %v8759_v36 = vpack.c.bf16 %v3533_v29, %v3533_v29  ;;  %v4549_v37 = vadd.f32 %v11658_v19, %v4548_v34  ;;  %v3536_v39 = vadd.f32 %v11658_v19, %v9531_v35  ;;  %v9787_v40 = vpop.f32.mrb[174].mxu1  ;;  %v3527_v41 = vpop.f32.mrb[175].mxu0 }
 0x242   : > { %v9015_v42 = vpack.c.bf16 %v4557_v32, %v4557_v32  ;;  %v8757_v60 = vpack.c.bf16 %v3525_v33, %v3525_v33  ;;  %v4560_v43 = vadd.f32 %v11658_v19, %v9787_v40  ;;  %v3528_v44 = vadd.f32 %v11658_v19, %v3527_v41  ;;  %v4551_v45 = vpop.f32.mrb[175].mxu1 }
 0x243   : > { %7106 = vst.msk [vmem:[%s10464_s27 + $0x2b8] sm:$0xf] %vm6931_vm1, %v8759_v36  ;;  %v9013_v46 = vpack.c.bf16 %v4549_v37, %v4549_v37  ;;  %v8760_v48 = vpack.c.bf16 %v3536_v39, %v3536_v39  ;;  %v4552_v49 = vadd.f32 %v11658_v19, %v4551_v45 }
 0x244   : > { %7362 = vst.msk [vmem:[%s10464_s27 + $0x6b8] sm:$0xf] %vm6931_vm1, %v9015_v42  ;;  %7104 = vst.msk [vmem:[%s10464_s27 + $0x2b0] sm:$0xf] %vm6931_vm1, %v8757_v60  ;;  %v9016_v50 = vpack.c.bf16 %v4560_v43, %v4560_v43  ;;  %v8758_v51 = vpack.c.bf16 %v3528_v44, %v3528_v44 }
 0x245   : > { %7360 = vst.msk [vmem:[%s10464_s27 + $0x6b0] sm:$0xf] %vm6931_vm1, %v9013_v46  ;;  %7107 = vst.msk [vmem:[%s10464_s27 + $0x2bc] sm:$0xf] %vm6931_vm1, %v8760_v48  ;;  %v9014_v52 = vpack.c.bf16 %v4552_v49, %v4552_v49 }
 0x246   : > { %7363 = vst.msk [vmem:[%s10464_s27 + $0x6bc] sm:$0xf] %vm6931_vm1, %v9016_v50  ;;  %7105 = vst.msk [vmem:[%s10464_s27 + $0x2b4] sm:$0xf] %vm6931_vm1, %v8758_v51  ;;  %v9534_v53 = vpop.f32.mrb[176].mxu0 }
 0x247   : > { %7361 = vst.msk [vmem:[%s10464_s27 + $0x6b4] sm:$0xf] %vm6931_vm1, %v9014_v52  ;;  %v3549_v54 = vadd.f32 %v11658_v19, %v9534_v53  ;;  %v9790_v55 = vpop.f32.mrb[176].mxu1  ;;  %v3540_v56 = vpop.f32.mrb[177].mxu0 }
 0x248   : > { %v4573_v57 = vadd.f32 %v11658_v19, %v9790_v55  ;;  %v3541_v58 = vadd.f32 %v11658_v19, %v3540_v56  ;;  %v4564_v59 = vpop.f32.mrb[177].mxu1  ;;  %v9535_v61 = vpop.f32.mrb[178].mxu0 }
 0x249   : > { %v8763_v62 = vpack.c.bf16 %v3549_v54, %v3549_v54  ;;  %v4565_v63 = vadd.f32 %v11658_v19, %v4564_v59  ;;  %v3552_v47 = vadd.f32 %v11658_v19, %v9535_v61  ;;  %v9791_v0 = vpop.f32.mrb[178].mxu1  ;;  %v3543_v1 = vpop.f32.mrb[179].mxu0 }
 0x24a   : > { %v9019_v2 = vpack.c.bf16 %v4573_v57, %v4573_v57  ;;  %v8761_v3 = vpack.c.bf16 %v3541_v58, %v3541_v58  ;;  %v4576_v4 = vadd.f32 %v11658_v19, %v9791_v0  ;;  %v3544_v5 = vadd.f32 %v11658_v19, %v3543_v1  ;;  %v4567_v6 = vpop.f32.mrb[179].mxu1 }
 0x24b   : > { %7110 = vst.msk [vmem:[%s10464_s27 + $0x2c8] sm:$0xf] %vm6931_vm1, %v8763_v62  ;;  %v9017_v7 = vpack.c.bf16 %v4565_v63, %v4565_v63  ;;  %v8764_v8 = vpack.c.bf16 %v3552_v47, %v3552_v47  ;;  %v4568_v9 = vadd.f32 %v11658_v19, %v4567_v6 }
 0x24c   : > { %7366 = vst.msk [vmem:[%s10464_s27 + $0x6c8] sm:$0xf] %vm6931_vm1, %v9019_v2  ;;  %7108 = vst.msk [vmem:[%s10464_s27 + $0x2c0] sm:$0xf] %vm6931_vm1, %v8761_v3  ;;  %v9020_v10 = vpack.c.bf16 %v4576_v4, %v4576_v4  ;;  %v8762_v11 = vpack.c.bf16 %v3544_v5, %v3544_v5 }
 0x24d   : > { %7364 = vst.msk [vmem:[%s10464_s27 + $0x6c0] sm:$0xf] %vm6931_vm1, %v9017_v7  ;;  %7111 = vst.msk [vmem:[%s10464_s27 + $0x2cc] sm:$0xf] %vm6931_vm1, %v8764_v8  ;;  %v9018_v12 = vpack.c.bf16 %v4568_v9, %v4568_v9 }
 0x24e   : > { %7367 = vst.msk [vmem:[%s10464_s27 + $0x6cc] sm:$0xf] %vm6931_vm1, %v9020_v10  ;;  %7109 = vst.msk [vmem:[%s10464_s27 + $0x2c4] sm:$0xf] %vm6931_vm1, %v8762_v11  ;;  %v9538_v13 = vpop.f32.mrb[180].mxu0 }
 0x24f   : > { %7365 = vst.msk [vmem:[%s10464_s27 + $0x6c4] sm:$0xf] %vm6931_vm1, %v9018_v12  ;;  %v3565_v14 = vadd.f32 %v11658_v19, %v9538_v13  ;;  %v9794_v15 = vpop.f32.mrb[180].mxu1  ;;  %v3556_v16 = vpop.f32.mrb[181].mxu0 }
 0x250   : > { %v4589_v17 = vadd.f32 %v11658_v19, %v9794_v15  ;;  %v3557_v18 = vadd.f32 %v11658_v19, %v3556_v16  ;;  %v4580_v20 = vpop.f32.mrb[181].mxu1  ;;  %v9539_v21 = vpop.f32.mrb[182].mxu0 }
 0x251   : > { %v8767_v22 = vpack.c.bf16 %v3565_v14, %v3565_v14  ;;  %v4581_v23 = vadd.f32 %v11658_v19, %v4580_v20  ;;  %v3568_v24 = vadd.f32 %v11658_v19, %v9539_v21  ;;  %v9795_v38 = vpop.f32.mrb[182].mxu1  ;;  %v3559_v25 = vpop.f32.mrb[183].mxu0 }
 0x252   : > { %v9023_v26 = vpack.c.bf16 %v4589_v17, %v4589_v17  ;;  %v8765_v27 = vpack.c.bf16 %v3557_v18, %v3557_v18  ;;  %v4592_v28 = vadd.f32 %v11658_v19, %v9795_v38  ;;  %v3560_v29 = vadd.f32 %v11658_v19, %v3559_v25  ;;  %v4583_v30 = vpop.f32.mrb[183].mxu1 }
 0x253   : > { %7114 = vst.msk [vmem:[%s10464_s27 + $0x2d8] sm:$0xf] %vm6931_vm1, %v8767_v22  ;;  %v9021_v31 = vpack.c.bf16 %v4581_v23, %v4581_v23  ;;  %v8768_v32 = vpack.c.bf16 %v3568_v24, %v3568_v24  ;;  %v4584_v33 = vadd.f32 %v11658_v19, %v4583_v30 }
 0x254   : > { %7370 = vst.msk [vmem:[%s10464_s27 + $0x6d8] sm:$0xf] %vm6931_vm1, %v9023_v26  ;;  %7112 = vst.msk [vmem:[%s10464_s27 + $0x2d0] sm:$0xf] %vm6931_vm1, %v8765_v27  ;;  %v9024_v34 = vpack.c.bf16 %v4592_v28, %v4592_v28  ;;  %v8766_v35 = vpack.c.bf16 %v3560_v29, %v3560_v29 }
 0x255   : > { %7368 = vst.msk [vmem:[%s10464_s27 + $0x6d0] sm:$0xf] %vm6931_vm1, %v9021_v31  ;;  %7115 = vst.msk [vmem:[%s10464_s27 + $0x2dc] sm:$0xf] %vm6931_vm1, %v8768_v32  ;;  %v9022_v36 = vpack.c.bf16 %v4584_v33, %v4584_v33 }
 0x256   : > { %7371 = vst.msk [vmem:[%s10464_s27 + $0x6dc] sm:$0xf] %vm6931_vm1, %v9024_v34  ;;  %7113 = vst.msk [vmem:[%s10464_s27 + $0x2d4] sm:$0xf] %vm6931_vm1, %v8766_v35  ;;  %v9542_v37 = vpop.f32.mrb[184].mxu0 }
 0x257   : > { %7369 = vst.msk [vmem:[%s10464_s27 + $0x6d4] sm:$0xf] %vm6931_vm1, %v9022_v36  ;;  %v3581_v39 = vadd.f32 %v11658_v19, %v9542_v37  ;;  %v9798_v40 = vpop.f32.mrb[184].mxu1  ;;  %v3572_v41 = vpop.f32.mrb[185].mxu0 }
 0x258   : > { %v4605_v42 = vadd.f32 %v11658_v19, %v9798_v40  ;;  %v3573_v60 = vadd.f32 %v11658_v19, %v3572_v41  ;;  %v4596_v43 = vpop.f32.mrb[185].mxu1  ;;  %v9543_v44 = vpop.f32.mrb[186].mxu0 }
 0x259   : > { %v8771_v45 = vpack.c.bf16 %v3581_v39, %v3581_v39  ;;  %v4597_v46 = vadd.f32 %v11658_v19, %v4596_v43  ;;  %v3584_v48 = vadd.f32 %v11658_v19, %v9543_v44  ;;  %v9799_v49 = vpop.f32.mrb[186].mxu1  ;;  %v3575_v50 = vpop.f32.mrb[187].mxu0 }
 0x25a   : > { %v9027_v51 = vpack.c.bf16 %v4605_v42, %v4605_v42  ;;  %v8769_v52 = vpack.c.bf16 %v3573_v60, %v3573_v60  ;;  %v4608_v53 = vadd.f32 %v11658_v19, %v9799_v49  ;;  %v3576_v54 = vadd.f32 %v11658_v19, %v3575_v50  ;;  %v4599_v55 = vpop.f32.mrb[187].mxu1 }
 0x25b   : > { %7118 = vst.msk [vmem:[%s10464_s27 + $0x2e8] sm:$0xf] %vm6931_vm1, %v8771_v45  ;;  %v9025_v56 = vpack.c.bf16 %v4597_v46, %v4597_v46  ;;  %v8772_v57 = vpack.c.bf16 %v3584_v48, %v3584_v48  ;;  %v4600_v58 = vadd.f32 %v11658_v19, %v4599_v55 }
 0x25c   : > { %7374 = vst.msk [vmem:[%s10464_s27 + $0x6e8] sm:$0xf] %vm6931_vm1, %v9027_v51  ;;  %7116 = vst.msk [vmem:[%s10464_s27 + $0x2e0] sm:$0xf] %vm6931_vm1, %v8769_v52  ;;  %v9028_v59 = vpack.c.bf16 %v4608_v53, %v4608_v53  ;;  %v8770_v61 = vpack.c.bf16 %v3576_v54, %v3576_v54 }
 0x25d   : > { %7372 = vst.msk [vmem:[%s10464_s27 + $0x6e0] sm:$0xf] %vm6931_vm1, %v9025_v56  ;;  %7119 = vst.msk [vmem:[%s10464_s27 + $0x2ec] sm:$0xf] %vm6931_vm1, %v8772_v57  ;;  %v9026_v62 = vpack.c.bf16 %v4600_v58, %v4600_v58 }
 0x25e   : > { %7375 = vst.msk [vmem:[%s10464_s27 + $0x6ec] sm:$0xf] %vm6931_vm1, %v9028_v59  ;;  %7117 = vst.msk [vmem:[%s10464_s27 + $0x2e4] sm:$0xf] %vm6931_vm1, %v8770_v61  ;;  %v9546_v63 = vpop.f32.mrb[188].mxu0 }
 0x25f   : > { %7373 = vst.msk [vmem:[%s10464_s27 + $0x6e4] sm:$0xf] %vm6931_vm1, %v9026_v62  ;;  %v3597_v47 = vadd.f32 %v11658_v19, %v9546_v63  ;;  %v9802_v0 = vpop.f32.mrb[188].mxu1  ;;  %v3588_v1 = vpop.f32.mrb[189].mxu0 }
 0x260   : > { %v4621_v2 = vadd.f32 %v11658_v19, %v9802_v0  ;;  %v3589_v3 = vadd.f32 %v11658_v19, %v3588_v1  ;;  %v4612_v4 = vpop.f32.mrb[189].mxu1  ;;  %v9547_v5 = vpop.f32.mrb[190].mxu0 }
 0x261   : > { %v8775_v6 = vpack.c.bf16 %v3597_v47, %v3597_v47  ;;  %v4613_v7 = vadd.f32 %v11658_v19, %v4612_v4  ;;  %v3600_v8 = vadd.f32 %v11658_v19, %v9547_v5  ;;  %v9803_v9 = vpop.f32.mrb[190].mxu1  ;;  %v3591_v10 = vpop.f32.mrb[191].mxu0 }
 0x262   : > { %v9031_v11 = vpack.c.bf16 %v4621_v2, %v4621_v2  ;;  %v8773_v12 = vpack.c.bf16 %v3589_v3, %v3589_v3  ;;  %v4624_v13 = vadd.f32 %v11658_v19, %v9803_v9  ;;  %v3592_v14 = vadd.f32 %v11658_v19, %v3591_v10  ;;  %v4615_v15 = vpop.f32.mrb[191].mxu1 }
 0x263   : > { %7122 = vst.msk [vmem:[%s10464_s27 + $0x2f8] sm:$0xf] %vm6931_vm1, %v8775_v6  ;;  %v9029_v16 = vpack.c.bf16 %v4613_v7, %v4613_v7  ;;  %v8776_v17 = vpack.c.bf16 %v3600_v8, %v3600_v8  ;;  %v4616_v18 = vadd.f32 %v11658_v19, %v4615_v15 }
 0x264   : > { %7378 = vst.msk [vmem:[%s10464_s27 + $0x6f8] sm:$0xf] %vm6931_vm1, %v9031_v11  ;;  %7120 = vst.msk [vmem:[%s10464_s27 + $0x2f0] sm:$0xf] %vm6931_vm1, %v8773_v12  ;;  %v9032_v20 = vpack.c.bf16 %v4624_v13, %v4624_v13  ;;  %v8774_v21 = vpack.c.bf16 %v3592_v14, %v3592_v14 }
 0x265   : > { %7376 = vst.msk [vmem:[%s10464_s27 + $0x6f0] sm:$0xf] %vm6931_vm1, %v9029_v16  ;;  %7123 = vst.msk [vmem:[%s10464_s27 + $0x2fc] sm:$0xf] %vm6931_vm1, %v8776_v17  ;;  %v9030_v22 = vpack.c.bf16 %v4616_v18, %v4616_v18 }
 0x266   : > { %7379 = vst.msk [vmem:[%s10464_s27 + $0x6fc] sm:$0xf] %vm6931_vm1, %v9032_v20  ;;  %7121 = vst.msk [vmem:[%s10464_s27 + $0x2f4] sm:$0xf] %vm6931_vm1, %v8774_v21  ;;  %v9550_v23 = vpop.f32.mrb[192].mxu0 }
 0x267   : > { %7377 = vst.msk [vmem:[%s10464_s27 + $0x6f4] sm:$0xf] %vm6931_vm1, %v9030_v22  ;;  %v3613_v24 = vadd.f32 %v11658_v19, %v9550_v23  ;;  %v9806_v38 = vpop.f32.mrb[192].mxu1  ;;  %v3604_v25 = vpop.f32.mrb[193].mxu0 }
 0x268   : > { %v4637_v26 = vadd.f32 %v11658_v19, %v9806_v38  ;;  %v3605_v27 = vadd.f32 %v11658_v19, %v3604_v25  ;;  %v4628_v28 = vpop.f32.mrb[193].mxu1  ;;  %v9551_v29 = vpop.f32.mrb[194].mxu0 }
 0x269   : > { %v8779_v30 = vpack.c.bf16 %v3613_v24, %v3613_v24  ;;  %v4629_v31 = vadd.f32 %v11658_v19, %v4628_v28  ;;  %v3616_v32 = vadd.f32 %v11658_v19, %v9551_v29  ;;  %v9807_v33 = vpop.f32.mrb[194].mxu1  ;;  %v3607_v34 = vpop.f32.mrb[195].mxu0 }
 0x26a   : > { %v9035_v35 = vpack.c.bf16 %v4637_v26, %v4637_v26  ;;  %v8777_v36 = vpack.c.bf16 %v3605_v27, %v3605_v27  ;;  %v4640_v37 = vadd.f32 %v11658_v19, %v9807_v33  ;;  %v3608_v39 = vadd.f32 %v11658_v19, %v3607_v34  ;;  %v4631_v40 = vpop.f32.mrb[195].mxu1 }
 0x26b   : > { %7126 = vst.msk [vmem:[%s10464_s27 + $0x308] sm:$0xf] %vm6931_vm1, %v8779_v30  ;;  %v9033_v41 = vpack.c.bf16 %v4629_v31, %v4629_v31  ;;  %v8780_v42 = vpack.c.bf16 %v3616_v32, %v3616_v32  ;;  %v4632_v60 = vadd.f32 %v11658_v19, %v4631_v40 }
 0x26c   : > { %7382 = vst.msk [vmem:[%s10464_s27 + $0x708] sm:$0xf] %vm6931_vm1, %v9035_v35  ;;  %7124 = vst.msk [vmem:[%s10464_s27 + $0x300] sm:$0xf] %vm6931_vm1, %v8777_v36  ;;  %v9036_v43 = vpack.c.bf16 %v4640_v37, %v4640_v37  ;;  %v8778_v44 = vpack.c.bf16 %v3608_v39, %v3608_v39 }
 0x26d   : > { %7380 = vst.msk [vmem:[%s10464_s27 + $0x700] sm:$0xf] %vm6931_vm1, %v9033_v41  ;;  %7127 = vst.msk [vmem:[%s10464_s27 + $0x30c] sm:$0xf] %vm6931_vm1, %v8780_v42  ;;  %v9034_v45 = vpack.c.bf16 %v4632_v60, %v4632_v60 }
 0x26e   : > { %7383 = vst.msk [vmem:[%s10464_s27 + $0x70c] sm:$0xf] %vm6931_vm1, %v9036_v43  ;;  %7125 = vst.msk [vmem:[%s10464_s27 + $0x304] sm:$0xf] %vm6931_vm1, %v8778_v44  ;;  %v9554_v46 = vpop.f32.mrb[196].mxu0 }
 0x26f   : > { %7381 = vst.msk [vmem:[%s10464_s27 + $0x704] sm:$0xf] %vm6931_vm1, %v9034_v45  ;;  %v3629_v48 = vadd.f32 %v11658_v19, %v9554_v46  ;;  %v9810_v49 = vpop.f32.mrb[196].mxu1  ;;  %v3620_v50 = vpop.f32.mrb[197].mxu0 }
 0x270   : > { %v4653_v51 = vadd.f32 %v11658_v19, %v9810_v49  ;;  %v3621_v52 = vadd.f32 %v11658_v19, %v3620_v50  ;;  %v4644_v53 = vpop.f32.mrb[197].mxu1  ;;  %v9555_v54 = vpop.f32.mrb[198].mxu0 }
 0x271   : > { %v8783_v55 = vpack.c.bf16 %v3629_v48, %v3629_v48  ;;  %v4645_v56 = vadd.f32 %v11658_v19, %v4644_v53  ;;  %v3632_v57 = vadd.f32 %v11658_v19, %v9555_v54  ;;  %v9811_v58 = vpop.f32.mrb[198].mxu1  ;;  %v3623_v59 = vpop.f32.mrb[199].mxu0 }
 0x272   : > { %v9039_v61 = vpack.c.bf16 %v4653_v51, %v4653_v51  ;;  %v8781_v62 = vpack.c.bf16 %v3621_v52, %v3621_v52  ;;  %v4656_v63 = vadd.f32 %v11658_v19, %v9811_v58  ;;  %v3624_v47 = vadd.f32 %v11658_v19, %v3623_v59  ;;  %v4647_v0 = vpop.f32.mrb[199].mxu1 }
 0x273   : > { %7130 = vst.msk [vmem:[%s10464_s27 + $0x318] sm:$0xf] %vm6931_vm1, %v8783_v55  ;;  %v9037_v1 = vpack.c.bf16 %v4645_v56, %v4645_v56  ;;  %v8784_v2 = vpack.c.bf16 %v3632_v57, %v3632_v57  ;;  %v4648_v3 = vadd.f32 %v11658_v19, %v4647_v0 }
 0x274   : > { %7386 = vst.msk [vmem:[%s10464_s27 + $0x718] sm:$0xf] %vm6931_vm1, %v9039_v61  ;;  %7128 = vst.msk [vmem:[%s10464_s27 + $0x310] sm:$0xf] %vm6931_vm1, %v8781_v62  ;;  %v9040_v4 = vpack.c.bf16 %v4656_v63, %v4656_v63  ;;  %v8782_v5 = vpack.c.bf16 %v3624_v47, %v3624_v47 }
 0x275   : > { %7384 = vst.msk [vmem:[%s10464_s27 + $0x710] sm:$0xf] %vm6931_vm1, %v9037_v1  ;;  %7131 = vst.msk [vmem:[%s10464_s27 + $0x31c] sm:$0xf] %vm6931_vm1, %v8784_v2  ;;  %v9038_v6 = vpack.c.bf16 %v4648_v3, %v4648_v3 }
 0x276   : > { %7387 = vst.msk [vmem:[%s10464_s27 + $0x71c] sm:$0xf] %vm6931_vm1, %v9040_v4  ;;  %7129 = vst.msk [vmem:[%s10464_s27 + $0x314] sm:$0xf] %vm6931_vm1, %v8782_v5  ;;  %v9558_v7 = vpop.f32.mrb[200].mxu0 }
 0x277   : > { %7385 = vst.msk [vmem:[%s10464_s27 + $0x714] sm:$0xf] %vm6931_vm1, %v9038_v6  ;;  %v3645_v8 = vadd.f32 %v11658_v19, %v9558_v7  ;;  %v9814_v9 = vpop.f32.mrb[200].mxu1  ;;  %v3636_v10 = vpop.f32.mrb[201].mxu0 }
 0x278   : > { %v4669_v11 = vadd.f32 %v11658_v19, %v9814_v9  ;;  %v3637_v12 = vadd.f32 %v11658_v19, %v3636_v10  ;;  %v4660_v13 = vpop.f32.mrb[201].mxu1  ;;  %v9559_v14 = vpop.f32.mrb[202].mxu0 }
 0x279   : > { %v8787_v15 = vpack.c.bf16 %v3645_v8, %v3645_v8  ;;  %v4661_v16 = vadd.f32 %v11658_v19, %v4660_v13  ;;  %v3648_v17 = vadd.f32 %v11658_v19, %v9559_v14  ;;  %v9815_v18 = vpop.f32.mrb[202].mxu1  ;;  %v3639_v20 = vpop.f32.mrb[203].mxu0 }
 0x27a   : > { %v9043_v21 = vpack.c.bf16 %v4669_v11, %v4669_v11  ;;  %v8785_v22 = vpack.c.bf16 %v3637_v12, %v3637_v12  ;;  %v4672_v23 = vadd.f32 %v11658_v19, %v9815_v18  ;;  %v3640_v24 = vadd.f32 %v11658_v19, %v3639_v20  ;;  %v4663_v38 = vpop.f32.mrb[203].mxu1 }
 0x27b   : > { %7134 = vst.msk [vmem:[%s10464_s27 + $0x328] sm:$0xf] %vm6931_vm1, %v8787_v15  ;;  %v9041_v25 = vpack.c.bf16 %v4661_v16, %v4661_v16  ;;  %v8788_v26 = vpack.c.bf16 %v3648_v17, %v3648_v17  ;;  %v4664_v27 = vadd.f32 %v11658_v19, %v4663_v38 }
 0x27c   : > { %7390 = vst.msk [vmem:[%s10464_s27 + $0x728] sm:$0xf] %vm6931_vm1, %v9043_v21  ;;  %7132 = vst.msk [vmem:[%s10464_s27 + $0x320] sm:$0xf] %vm6931_vm1, %v8785_v22  ;;  %v9044_v28 = vpack.c.bf16 %v4672_v23, %v4672_v23  ;;  %v8786_v29 = vpack.c.bf16 %v3640_v24, %v3640_v24 }
 0x27d   : > { %7388 = vst.msk [vmem:[%s10464_s27 + $0x720] sm:$0xf] %vm6931_vm1, %v9041_v25  ;;  %7135 = vst.msk [vmem:[%s10464_s27 + $0x32c] sm:$0xf] %vm6931_vm1, %v8788_v26  ;;  %v9042_v30 = vpack.c.bf16 %v4664_v27, %v4664_v27  ;;  %v12047_v25 = vld [vmem:[%s12321_s2] ss:$0 sm:$0xff] }
 0x27e   : > { %7391 = vst.msk [vmem:[%s10464_s27 + $0x72c] sm:$0xf] %vm6931_vm1, %v9044_v28  ;;  %7133 = vst.msk [vmem:[%s10464_s27 + $0x324] sm:$0xf] %vm6931_vm1, %v8786_v29  ;;  %v9562_v31 = vpop.f32.mrb[204].mxu0 }
 0x27f   : > { %7389 = vst.msk [vmem:[%s10464_s27 + $0x724] sm:$0xf] %vm6931_vm1, %v9042_v30  ;;  %v3661_v32 = vadd.f32 %v11658_v19, %v9562_v31  ;;  %v9818_v33 = vpop.f32.mrb[204].mxu1  ;;  %v3652_v34 = vpop.f32.mrb[205].mxu0 }
 0x280   : > { %v4685_v35 = vadd.f32 %v11658_v19, %v9818_v33  ;;  %v3653_v36 = vadd.f32 %v11658_v19, %v3652_v34  ;;  %v4676_v37 = vpop.f32.mrb[205].mxu1  ;;  %v9563_v39 = vpop.f32.mrb[206].mxu0 }
 0x281   : > { %v8791_v40 = vpack.c.bf16 %v3661_v32, %v3661_v32  ;;  %v4677_v41 = vadd.f32 %v11658_v19, %v4676_v37  ;;  %v3664_v42 = vadd.f32 %v11658_v19, %v9563_v39  ;;  %v9819_v60 = vpop.f32.mrb[206].mxu1  ;;  %v3655_v43 = vpop.f32.mrb[207].mxu0 }
 0x282   : > { %v9047_v44 = vpack.c.bf16 %v4685_v35, %v4685_v35  ;;  %v8789_v45 = vpack.c.bf16 %v3653_v36, %v3653_v36  ;;  %v4688_v46 = vadd.f32 %v11658_v19, %v9819_v60  ;;  %v3656_v48 = vadd.f32 %v11658_v19, %v3655_v43  ;;  %v4679_v49 = vpop.f32.mrb[207].mxu1 }
 0x283   : > { %7138 = vst.msk [vmem:[%s10464_s27 + $0x338] sm:$0xf] %vm6931_vm1, %v8791_v40  ;;  %v9045_v50 = vpack.c.bf16 %v4677_v41, %v4677_v41  ;;  %v8792_v51 = vpack.c.bf16 %v3664_v42, %v3664_v42  ;;  %v4680_v52 = vadd.f32 %v11658_v19, %v4679_v49 }
 0x284   : > { %7394 = vst.msk [vmem:[%s10464_s27 + $0x738] sm:$0xf] %vm6931_vm1, %v9047_v44  ;;  %7136 = vst.msk [vmem:[%s10464_s27 + $0x330] sm:$0xf] %vm6931_vm1, %v8789_v45  ;;  %v9048_v53 = vpack.c.bf16 %v4688_v46, %v4688_v46  ;;  %v8790_v54 = vpack.c.bf16 %v3656_v48, %v3656_v48 }
 0x285   : > { %7392 = vst.msk [vmem:[%s10464_s27 + $0x730] sm:$0xf] %vm6931_vm1, %v9045_v50  ;;  %7139 = vst.msk [vmem:[%s10464_s27 + $0x33c] sm:$0xf] %vm6931_vm1, %v8792_v51  ;;  %v9046_v55 = vpack.c.bf16 %v4680_v52, %v4680_v52 }
 0x286   : > { %7395 = vst.msk [vmem:[%s10464_s27 + $0x73c] sm:$0xf] %vm6931_vm1, %v9048_v53  ;;  %7137 = vst.msk [vmem:[%s10464_s27 + $0x334] sm:$0xf] %vm6931_vm1, %v8790_v54  ;;  %v9566_v56 = vpop.f32.mrb[208].mxu0 }
 0x287   : > { %7393 = vst.msk [vmem:[%s10464_s27 + $0x734] sm:$0xf] %vm6931_vm1, %v9046_v55  ;;  %v3677_v57 = vadd.f32 %v11658_v19, %v9566_v56  ;;  %v9822_v58 = vpop.f32.mrb[208].mxu1  ;;  %v3668_v59 = vpop.f32.mrb[209].mxu0 }
 0x288   : > { %v4701_v61 = vadd.f32 %v11658_v19, %v9822_v58  ;;  %v3669_v62 = vadd.f32 %v11658_v19, %v3668_v59  ;;  %v4692_v63 = vpop.f32.mrb[209].mxu1  ;;  %v9567_v47 = vpop.f32.mrb[210].mxu0 }
 0x289   : > { %v8795_v0 = vpack.c.bf16 %v3677_v57, %v3677_v57  ;;  %v4693_v1 = vadd.f32 %v11658_v19, %v4692_v63  ;;  %v3680_v2 = vadd.f32 %v11658_v19, %v9567_v47  ;;  %v9823_v3 = vpop.f32.mrb[210].mxu1  ;;  %v3671_v4 = vpop.f32.mrb[211].mxu0 }
 0x28a   : > { %v9051_v5 = vpack.c.bf16 %v4701_v61, %v4701_v61  ;;  %v8793_v6 = vpack.c.bf16 %v3669_v62, %v3669_v62  ;;  %v4704_v7 = vadd.f32 %v11658_v19, %v9823_v3  ;;  %v3672_v8 = vadd.f32 %v11658_v19, %v3671_v4  ;;  %v4695_v9 = vpop.f32.mrb[211].mxu1 }
 0x28b   : > { %7142 = vst.msk [vmem:[%s10464_s27 + $0x348] sm:$0xf] %vm6931_vm1, %v8795_v0  ;;  %v9049_v10 = vpack.c.bf16 %v4693_v1, %v4693_v1  ;;  %v8796_v11 = vpack.c.bf16 %v3680_v2, %v3680_v2  ;;  %v4696_v12 = vadd.f32 %v11658_v19, %v4695_v9 }
 0x28c   : > { %7398 = vst.msk [vmem:[%s10464_s27 + $0x748] sm:$0xf] %vm6931_vm1, %v9051_v5  ;;  %7140 = vst.msk [vmem:[%s10464_s27 + $0x340] sm:$0xf] %vm6931_vm1, %v8793_v6  ;;  %v9052_v13 = vpack.c.bf16 %v4704_v7, %v4704_v7  ;;  %v8794_v14 = vpack.c.bf16 %v3672_v8, %v3672_v8 }
 0x28d   : > { %7396 = vst.msk [vmem:[%s10464_s27 + $0x740] sm:$0xf] %vm6931_vm1, %v9049_v10  ;;  %7143 = vst.msk [vmem:[%s10464_s27 + $0x34c] sm:$0xf] %vm6931_vm1, %v8796_v11  ;;  %v9050_v15 = vpack.c.bf16 %v4696_v12, %v4696_v12 }
 0x28e   : > { %7399 = vst.msk [vmem:[%s10464_s27 + $0x74c] sm:$0xf] %vm6931_vm1, %v9052_v13  ;;  %7141 = vst.msk [vmem:[%s10464_s27 + $0x344] sm:$0xf] %vm6931_vm1, %v8794_v14  ;;  %v9570_v16 = vpop.f32.mrb[212].mxu0 }
 0x28f   : > { %7397 = vst.msk [vmem:[%s10464_s27 + $0x744] sm:$0xf] %vm6931_vm1, %v9050_v15  ;;  %v3693_v17 = vadd.f32 %v11658_v19, %v9570_v16  ;;  %v9826_v18 = vpop.f32.mrb[212].mxu1  ;;  %v3684_v20 = vpop.f32.mrb[213].mxu0 }
 0x290   : > { %v4717_v21 = vadd.f32 %v11658_v19, %v9826_v18  ;;  %v3685_v22 = vadd.f32 %v11658_v19, %v3684_v20  ;;  %v4708_v23 = vpop.f32.mrb[213].mxu1  ;;  %v9571_v24 = vpop.f32.mrb[214].mxu0 }
 0x291   : > { %v8799_v38 = vpack.c.bf16 %v3693_v17, %v3693_v17  ;;  %v4709_v26 = vadd.f32 %v12047_v25, %v4708_v23  ;;  %v3696_v27 = vadd.f32 %v12047_v25, %v9571_v24  ;;  %v9827_v28 = vpop.f32.mrb[214].mxu1  ;;  %v3687_v29 = vpop.f32.mrb[215].mxu0 }
 0x292   : > { %v9055_v30 = vpack.c.bf16 %v4717_v21, %v4717_v21  ;;  %v8797_v19 = vpack.c.bf16 %v3685_v22, %v3685_v22  ;;  %v4720_v31 = vadd.f32 %v12047_v25, %v9827_v28  ;;  %v3688_v32 = vadd.f32 %v12047_v25, %v3687_v29  ;;  %v4711_v33 = vpop.f32.mrb[215].mxu1 }
 0x293   : > { %7146 = vst.msk [vmem:[%s10464_s27 + $0x358] sm:$0xf] %vm6931_vm1, %v8799_v38  ;;  %v9053_v34 = vpack.c.bf16 %v4709_v26, %v4709_v26  ;;  %v8800_v35 = vpack.c.bf16 %v3696_v27, %v3696_v27  ;;  %v4712_v36 = vadd.f32 %v12047_v25, %v4711_v33 }
 0x294   : > { %7402 = vst.msk [vmem:[%s10464_s27 + $0x758] sm:$0xf] %vm6931_vm1, %v9055_v30  ;;  %7144 = vst.msk [vmem:[%s10464_s27 + $0x350] sm:$0xf] %vm6931_vm1, %v8797_v19  ;;  %v9056_v37 = vpack.c.bf16 %v4720_v31, %v4720_v31  ;;  %v8798_v39 = vpack.c.bf16 %v3688_v32, %v3688_v32 }
 0x295   : > { %7400 = vst.msk [vmem:[%s10464_s27 + $0x750] sm:$0xf] %vm6931_vm1, %v9053_v34  ;;  %7147 = vst.msk [vmem:[%s10464_s27 + $0x35c] sm:$0xf] %vm6931_vm1, %v8800_v35  ;;  %v9054_v40 = vpack.c.bf16 %v4712_v36, %v4712_v36 }
 0x296   : > { %7403 = vst.msk [vmem:[%s10464_s27 + $0x75c] sm:$0xf] %vm6931_vm1, %v9056_v37  ;;  %7145 = vst.msk [vmem:[%s10464_s27 + $0x354] sm:$0xf] %vm6931_vm1, %v8798_v39  ;;  %v9574_v41 = vpop.f32.mrb[216].mxu0 }
 0x297   : > { %7401 = vst.msk [vmem:[%s10464_s27 + $0x754] sm:$0xf] %vm6931_vm1, %v9054_v40  ;;  %v3709_v42 = vadd.f32 %v12047_v25, %v9574_v41  ;;  %v9830_v60 = vpop.f32.mrb[216].mxu1  ;;  %v3700_v43 = vpop.f32.mrb[217].mxu0 }
 0x298   : > { %v4733_v44 = vadd.f32 %v12047_v25, %v9830_v60  ;;  %v3701_v45 = vadd.f32 %v12047_v25, %v3700_v43  ;;  %v4724_v46 = vpop.f32.mrb[217].mxu1  ;;  %v9575_v48 = vpop.f32.mrb[218].mxu0 }
 0x299   : > { %v8803_v49 = vpack.c.bf16 %v3709_v42, %v3709_v42  ;;  %v4725_v50 = vadd.f32 %v12047_v25, %v4724_v46  ;;  %v3712_v51 = vadd.f32 %v12047_v25, %v9575_v48  ;;  %v9831_v52 = vpop.f32.mrb[218].mxu1  ;;  %v3703_v53 = vpop.f32.mrb[219].mxu0 }
 0x29a   : > { %v9059_v54 = vpack.c.bf16 %v4733_v44, %v4733_v44  ;;  %v8801_v55 = vpack.c.bf16 %v3701_v45, %v3701_v45  ;;  %v4736_v56 = vadd.f32 %v12047_v25, %v9831_v52  ;;  %v3704_v57 = vadd.f32 %v12047_v25, %v3703_v53  ;;  %v4727_v58 = vpop.f32.mrb[219].mxu1 }
 0x29b   : > { %7150 = vst.msk [vmem:[%s10464_s27 + $0x368] sm:$0xf] %vm6931_vm1, %v8803_v49  ;;  %v9057_v59 = vpack.c.bf16 %v4725_v50, %v4725_v50  ;;  %v8804_v61 = vpack.c.bf16 %v3712_v51, %v3712_v51  ;;  %v4728_v62 = vadd.f32 %v12047_v25, %v4727_v58 }
 0x29c   : > { %7406 = vst.msk [vmem:[%s10464_s27 + $0x768] sm:$0xf] %vm6931_vm1, %v9059_v54  ;;  %7148 = vst.msk [vmem:[%s10464_s27 + $0x360] sm:$0xf] %vm6931_vm1, %v8801_v55  ;;  %v9060_v63 = vpack.c.bf16 %v4736_v56, %v4736_v56  ;;  %v8802_v47 = vpack.c.bf16 %v3704_v57, %v3704_v57 }
 0x29d   : > { %7404 = vst.msk [vmem:[%s10464_s27 + $0x760] sm:$0xf] %vm6931_vm1, %v9057_v59  ;;  %7151 = vst.msk [vmem:[%s10464_s27 + $0x36c] sm:$0xf] %vm6931_vm1, %v8804_v61  ;;  %v9058_v0 = vpack.c.bf16 %v4728_v62, %v4728_v62 }
 0x29e   : > { %7407 = vst.msk [vmem:[%s10464_s27 + $0x76c] sm:$0xf] %vm6931_vm1, %v9060_v63  ;;  %7149 = vst.msk [vmem:[%s10464_s27 + $0x364] sm:$0xf] %vm6931_vm1, %v8802_v47  ;;  %v9578_v1 = vpop.f32.mrb[220].mxu0 }
 0x29f   : > { %7405 = vst.msk [vmem:[%s10464_s27 + $0x764] sm:$0xf] %vm6931_vm1, %v9058_v0  ;;  %v3725_v2 = vadd.f32 %v12047_v25, %v9578_v1  ;;  %v9834_v3 = vpop.f32.mrb[220].mxu1  ;;  %v3716_v4 = vpop.f32.mrb[221].mxu0 }
 0x2a0   : > { %v4749_v5 = vadd.f32 %v12047_v25, %v9834_v3  ;;  %v3717_v6 = vadd.f32 %v12047_v25, %v3716_v4  ;;  %v4740_v7 = vpop.f32.mrb[221].mxu1  ;;  %v9579_v8 = vpop.f32.mrb[222].mxu0 }
 0x2a1   : > { %v8807_v9 = vpack.c.bf16 %v3725_v2, %v3725_v2  ;;  %v4741_v10 = vadd.f32 %v12047_v25, %v4740_v7  ;;  %v3728_v11 = vadd.f32 %v12047_v25, %v9579_v8  ;;  %v9835_v12 = vpop.f32.mrb[222].mxu1  ;;  %v3719_v13 = vpop.f32.mrb[223].mxu0 }
 0x2a2   : > { %v9063_v14 = vpack.c.bf16 %v4749_v5, %v4749_v5  ;;  %v8805_v15 = vpack.c.bf16 %v3717_v6, %v3717_v6  ;;  %v4752_v16 = vadd.f32 %v12047_v25, %v9835_v12  ;;  %v3720_v17 = vadd.f32 %v12047_v25, %v3719_v13  ;;  %v4743_v18 = vpop.f32.mrb[223].mxu1 }
 0x2a3   : > { %7154 = vst.msk [vmem:[%s10464_s27 + $0x378] sm:$0xf] %vm6931_vm1, %v8807_v9  ;;  %v9061_v20 = vpack.c.bf16 %v4741_v10, %v4741_v10  ;;  %v8808_v21 = vpack.c.bf16 %v3728_v11, %v3728_v11  ;;  %v4744_v22 = vadd.f32 %v12047_v25, %v4743_v18 }
 0x2a4   : > { %7410 = vst.msk [vmem:[%s10464_s27 + $0x778] sm:$0xf] %vm6931_vm1, %v9063_v14  ;;  %7152 = vst.msk [vmem:[%s10464_s27 + $0x370] sm:$0xf] %vm6931_vm1, %v8805_v15  ;;  %v9064_v23 = vpack.c.bf16 %v4752_v16, %v4752_v16  ;;  %v8806_v24 = vpack.c.bf16 %v3720_v17, %v3720_v17 }
 0x2a5   : > { %7408 = vst.msk [vmem:[%s10464_s27 + $0x770] sm:$0xf] %vm6931_vm1, %v9061_v20  ;;  %7155 = vst.msk [vmem:[%s10464_s27 + $0x37c] sm:$0xf] %vm6931_vm1, %v8808_v21  ;;  %v9062_v38 = vpack.c.bf16 %v4744_v22, %v4744_v22 }
 0x2a6   : > { %7411 = vst.msk [vmem:[%s10464_s27 + $0x77c] sm:$0xf] %vm6931_vm1, %v9064_v23  ;;  %7153 = vst.msk [vmem:[%s10464_s27 + $0x374] sm:$0xf] %vm6931_vm1, %v8806_v24  ;;  %v9582_v26 = vpop.f32.mrb[224].mxu0 }
 0x2a7   : > { %7409 = vst.msk [vmem:[%s10464_s27 + $0x774] sm:$0xf] %vm6931_vm1, %v9062_v38  ;;  %v3741_v27 = vadd.f32 %v12047_v25, %v9582_v26  ;;  %v9838_v28 = vpop.f32.mrb[224].mxu1  ;;  %v3732_v29 = vpop.f32.mrb[225].mxu0 }
 0x2a8   : > { %v4765_v30 = vadd.f32 %v12047_v25, %v9838_v28  ;;  %v3733_v19 = vadd.f32 %v12047_v25, %v3732_v29  ;;  %v4756_v31 = vpop.f32.mrb[225].mxu1  ;;  %v9583_v32 = vpop.f32.mrb[226].mxu0 }
 0x2a9   : > { %v8811_v33 = vpack.c.bf16 %v3741_v27, %v3741_v27  ;;  %v4757_v34 = vadd.f32 %v12047_v25, %v4756_v31  ;;  %v3744_v35 = vadd.f32 %v12047_v25, %v9583_v32  ;;  %v9839_v36 = vpop.f32.mrb[226].mxu1  ;;  %v3735_v37 = vpop.f32.mrb[227].mxu0 }
 0x2aa   : > { %v9067_v39 = vpack.c.bf16 %v4765_v30, %v4765_v30  ;;  %v8809_v40 = vpack.c.bf16 %v3733_v19, %v3733_v19  ;;  %v4768_v41 = vadd.f32 %v12047_v25, %v9839_v36  ;;  %v3736_v42 = vadd.f32 %v12047_v25, %v3735_v37  ;;  %v4759_v60 = vpop.f32.mrb[227].mxu1 }
 0x2ab   : > { %7158 = vst.msk [vmem:[%s10464_s27 + $0x388] sm:$0xf] %vm6931_vm1, %v8811_v33  ;;  %v9065_v43 = vpack.c.bf16 %v4757_v34, %v4757_v34  ;;  %v8812_v44 = vpack.c.bf16 %v3744_v35, %v3744_v35  ;;  %v4760_v45 = vadd.f32 %v12047_v25, %v4759_v60 }
 0x2ac   : > { %7414 = vst.msk [vmem:[%s10464_s27 + $0x788] sm:$0xf] %vm6931_vm1, %v9067_v39  ;;  %7156 = vst.msk [vmem:[%s10464_s27 + $0x380] sm:$0xf] %vm6931_vm1, %v8809_v40  ;;  %v9068_v46 = vpack.c.bf16 %v4768_v41, %v4768_v41  ;;  %v8810_v48 = vpack.c.bf16 %v3736_v42, %v3736_v42 }
 0x2ad   : > { %7412 = vst.msk [vmem:[%s10464_s27 + $0x780] sm:$0xf] %vm6931_vm1, %v9065_v43  ;;  %7159 = vst.msk [vmem:[%s10464_s27 + $0x38c] sm:$0xf] %vm6931_vm1, %v8812_v44  ;;  %v9066_v49 = vpack.c.bf16 %v4760_v45, %v4760_v45 }
 0x2ae   : > { %7415 = vst.msk [vmem:[%s10464_s27 + $0x78c] sm:$0xf] %vm6931_vm1, %v9068_v46  ;;  %7157 = vst.msk [vmem:[%s10464_s27 + $0x384] sm:$0xf] %vm6931_vm1, %v8810_v48  ;;  %v9586_v50 = vpop.f32.mrb[228].mxu0 }
 0x2af   : > { %7413 = vst.msk [vmem:[%s10464_s27 + $0x784] sm:$0xf] %vm6931_vm1, %v9066_v49  ;;  %v3757_v51 = vadd.f32 %v12047_v25, %v9586_v50  ;;  %v9842_v52 = vpop.f32.mrb[228].mxu1  ;;  %v3748_v53 = vpop.f32.mrb[229].mxu0 }
 0x2b0   : > { %v4781_v54 = vadd.f32 %v12047_v25, %v9842_v52  ;;  %v3749_v55 = vadd.f32 %v12047_v25, %v3748_v53  ;;  %v4772_v56 = vpop.f32.mrb[229].mxu1  ;;  %v9587_v57 = vpop.f32.mrb[230].mxu0 }
 0x2b1   : > { %v8815_v58 = vpack.c.bf16 %v3757_v51, %v3757_v51  ;;  %v4773_v59 = vadd.f32 %v12047_v25, %v4772_v56  ;;  %v3760_v61 = vadd.f32 %v12047_v25, %v9587_v57  ;;  %v9843_v62 = vpop.f32.mrb[230].mxu1  ;;  %v3751_v63 = vpop.f32.mrb[231].mxu0 }
 0x2b2   : > { %v9071_v47 = vpack.c.bf16 %v4781_v54, %v4781_v54  ;;  %v8813_v0 = vpack.c.bf16 %v3749_v55, %v3749_v55  ;;  %v4784_v1 = vadd.f32 %v12047_v25, %v9843_v62  ;;  %v3752_v2 = vadd.f32 %v12047_v25, %v3751_v63  ;;  %v4775_v3 = vpop.f32.mrb[231].mxu1 }
 0x2b3   : > { %7162 = vst.msk [vmem:[%s10464_s27 + $0x398] sm:$0xf] %vm6931_vm1, %v8815_v58  ;;  %v9069_v4 = vpack.c.bf16 %v4773_v59, %v4773_v59  ;;  %v8816_v5 = vpack.c.bf16 %v3760_v61, %v3760_v61  ;;  %v4776_v6 = vadd.f32 %v12047_v25, %v4775_v3 }
 0x2b4   : > { %7418 = vst.msk [vmem:[%s10464_s27 + $0x798] sm:$0xf] %vm6931_vm1, %v9071_v47  ;;  %7160 = vst.msk [vmem:[%s10464_s27 + $0x390] sm:$0xf] %vm6931_vm1, %v8813_v0  ;;  %v9072_v7 = vpack.c.bf16 %v4784_v1, %v4784_v1  ;;  %v8814_v8 = vpack.c.bf16 %v3752_v2, %v3752_v2 }
 0x2b5   : > { %7416 = vst.msk [vmem:[%s10464_s27 + $0x790] sm:$0xf] %vm6931_vm1, %v9069_v4  ;;  %7163 = vst.msk [vmem:[%s10464_s27 + $0x39c] sm:$0xf] %vm6931_vm1, %v8816_v5  ;;  %v9070_v9 = vpack.c.bf16 %v4776_v6, %v4776_v6 }
 0x2b6   : > { %7419 = vst.msk [vmem:[%s10464_s27 + $0x79c] sm:$0xf] %vm6931_vm1, %v9072_v7  ;;  %7161 = vst.msk [vmem:[%s10464_s27 + $0x394] sm:$0xf] %vm6931_vm1, %v8814_v8  ;;  %v9590_v10 = vpop.f32.mrb[232].mxu0 }
 0x2b7   : > { %7417 = vst.msk [vmem:[%s10464_s27 + $0x794] sm:$0xf] %vm6931_vm1, %v9070_v9  ;;  %v3773_v11 = vadd.f32 %v12047_v25, %v9590_v10  ;;  %v9846_v12 = vpop.f32.mrb[232].mxu1  ;;  %v3764_v13 = vpop.f32.mrb[233].mxu0 }
 0x2b8   : > { %v4797_v14 = vadd.f32 %v12047_v25, %v9846_v12  ;;  %v3765_v15 = vadd.f32 %v12047_v25, %v3764_v13  ;;  %v4788_v16 = vpop.f32.mrb[233].mxu1  ;;  %v9591_v17 = vpop.f32.mrb[234].mxu0 }
 0x2b9   : > { %v8819_v18 = vpack.c.bf16 %v3773_v11, %v3773_v11  ;;  %v4789_v20 = vadd.f32 %v12047_v25, %v4788_v16  ;;  %v3776_v21 = vadd.f32 %v12047_v25, %v9591_v17  ;;  %v9847_v22 = vpop.f32.mrb[234].mxu1  ;;  %v3767_v23 = vpop.f32.mrb[235].mxu0 }
 0x2ba   : > { %v9075_v24 = vpack.c.bf16 %v4797_v14, %v4797_v14  ;;  %v8817_v38 = vpack.c.bf16 %v3765_v15, %v3765_v15  ;;  %v4800_v26 = vadd.f32 %v12047_v25, %v9847_v22  ;;  %v3768_v27 = vadd.f32 %v12047_v25, %v3767_v23  ;;  %v4791_v28 = vpop.f32.mrb[235].mxu1 }
 0x2bb   : > { %7166 = vst.msk [vmem:[%s10464_s27 + $0x3a8] sm:$0xf] %vm6931_vm1, %v8819_v18  ;;  %v9073_v29 = vpack.c.bf16 %v4789_v20, %v4789_v20  ;;  %v8820_v30 = vpack.c.bf16 %v3776_v21, %v3776_v21  ;;  %v4792_v19 = vadd.f32 %v12047_v25, %v4791_v28 }
 0x2bc   : > { %7422 = vst.msk [vmem:[%s10464_s27 + $0x7a8] sm:$0xf] %vm6931_vm1, %v9075_v24  ;;  %7164 = vst.msk [vmem:[%s10464_s27 + $0x3a0] sm:$0xf] %vm6931_vm1, %v8817_v38  ;;  %v9076_v31 = vpack.c.bf16 %v4800_v26, %v4800_v26  ;;  %v8818_v32 = vpack.c.bf16 %v3768_v27, %v3768_v27 }
 0x2bd   : > { %7420 = vst.msk [vmem:[%s10464_s27 + $0x7a0] sm:$0xf] %vm6931_vm1, %v9073_v29  ;;  %7167 = vst.msk [vmem:[%s10464_s27 + $0x3ac] sm:$0xf] %vm6931_vm1, %v8820_v30  ;;  %v9074_v33 = vpack.c.bf16 %v4792_v19, %v4792_v19 }
 0x2be   : > { %7423 = vst.msk [vmem:[%s10464_s27 + $0x7ac] sm:$0xf] %vm6931_vm1, %v9076_v31  ;;  %7165 = vst.msk [vmem:[%s10464_s27 + $0x3a4] sm:$0xf] %vm6931_vm1, %v8818_v32  ;;  %v9594_v34 = vpop.f32.mrb[236].mxu0 }
 0x2bf   : > { %7421 = vst.msk [vmem:[%s10464_s27 + $0x7a4] sm:$0xf] %vm6931_vm1, %v9074_v33  ;;  %v3789_v35 = vadd.f32 %v12047_v25, %v9594_v34  ;;  %v9850_v36 = vpop.f32.mrb[236].mxu1  ;;  %v3780_v37 = vpop.f32.mrb[237].mxu0 }
 0x2c0   : > { %v4813_v39 = vadd.f32 %v12047_v25, %v9850_v36  ;;  %v3781_v40 = vadd.f32 %v12047_v25, %v3780_v37  ;;  %v4804_v41 = vpop.f32.mrb[237].mxu1  ;;  %v9595_v42 = vpop.f32.mrb[238].mxu0 }
 0x2c1   : > { %v8823_v60 = vpack.c.bf16 %v3789_v35, %v3789_v35  ;;  %v4805_v43 = vadd.f32 %v12047_v25, %v4804_v41  ;;  %v3792_v44 = vadd.f32 %v12047_v25, %v9595_v42  ;;  %v9851_v45 = vpop.f32.mrb[238].mxu1  ;;  %v3783_v46 = vpop.f32.mrb[239].mxu0 }
 0x2c2   : > { %v9079_v48 = vpack.c.bf16 %v4813_v39, %v4813_v39  ;;  %v8821_v49 = vpack.c.bf16 %v3781_v40, %v3781_v40  ;;  %v4816_v50 = vadd.f32 %v12047_v25, %v9851_v45  ;;  %v3784_v51 = vadd.f32 %v12047_v25, %v3783_v46  ;;  %v4807_v52 = vpop.f32.mrb[239].mxu1 }
 0x2c3   : > { %7170 = vst.msk [vmem:[%s10464_s27 + $0x3b8] sm:$0xf] %vm6931_vm1, %v8823_v60  ;;  %v9077_v53 = vpack.c.bf16 %v4805_v43, %v4805_v43  ;;  %v8824_v54 = vpack.c.bf16 %v3792_v44, %v3792_v44  ;;  %v4808_v55 = vadd.f32 %v12047_v25, %v4807_v52 }
 0x2c4   : > { %7426 = vst.msk [vmem:[%s10464_s27 + $0x7b8] sm:$0xf] %vm6931_vm1, %v9079_v48  ;;  %7168 = vst.msk [vmem:[%s10464_s27 + $0x3b0] sm:$0xf] %vm6931_vm1, %v8821_v49  ;;  %v9080_v56 = vpack.c.bf16 %v4816_v50, %v4816_v50  ;;  %v8822_v57 = vpack.c.bf16 %v3784_v51, %v3784_v51 }
 0x2c5   : > { %7424 = vst.msk [vmem:[%s10464_s27 + $0x7b0] sm:$0xf] %vm6931_vm1, %v9077_v53  ;;  %7171 = vst.msk [vmem:[%s10464_s27 + $0x3bc] sm:$0xf] %vm6931_vm1, %v8824_v54  ;;  %v9078_v58 = vpack.c.bf16 %v4808_v55, %v4808_v55 }
 0x2c6   : > { %7427 = vst.msk [vmem:[%s10464_s27 + $0x7bc] sm:$0xf] %vm6931_vm1, %v9080_v56  ;;  %7169 = vst.msk [vmem:[%s10464_s27 + $0x3b4] sm:$0xf] %vm6931_vm1, %v8822_v57  ;;  %v9598_v59 = vpop.f32.mrb[240].mxu0 }
 0x2c7   : > { %7425 = vst.msk [vmem:[%s10464_s27 + $0x7b4] sm:$0xf] %vm6931_vm1, %v9078_v58  ;;  %v3805_v61 = vadd.f32 %v12047_v25, %v9598_v59  ;;  %v9854_v62 = vpop.f32.mrb[240].mxu1  ;;  %v3796_v63 = vpop.f32.mrb[241].mxu0 }
 0x2c8   : > { %v4829_v47 = vadd.f32 %v12047_v25, %v9854_v62  ;;  %v3797_v0 = vadd.f32 %v12047_v25, %v3796_v63  ;;  %v4820_v1 = vpop.f32.mrb[241].mxu1  ;;  %v9599_v2 = vpop.f32.mrb[242].mxu0 }
 0x2c9   : > { %v8827_v3 = vpack.c.bf16 %v3805_v61, %v3805_v61  ;;  %v4821_v4 = vadd.f32 %v12047_v25, %v4820_v1  ;;  %v3808_v5 = vadd.f32 %v12047_v25, %v9599_v2  ;;  %v9855_v6 = vpop.f32.mrb[242].mxu1  ;;  %v3799_v7 = vpop.f32.mrb[243].mxu0 }
 0x2ca   : > { %v9083_v8 = vpack.c.bf16 %v4829_v47, %v4829_v47  ;;  %v8825_v9 = vpack.c.bf16 %v3797_v0, %v3797_v0  ;;  %v4832_v10 = vadd.f32 %v12047_v25, %v9855_v6  ;;  %v3800_v11 = vadd.f32 %v12047_v25, %v3799_v7  ;;  %v4823_v12 = vpop.f32.mrb[243].mxu1 }
 0x2cb   : > { %7174 = vst.msk [vmem:[%s10464_s27 + $0x3c8] sm:$0xf] %vm6931_vm1, %v8827_v3  ;;  %v9081_v13 = vpack.c.bf16 %v4821_v4, %v4821_v4  ;;  %v8828_v14 = vpack.c.bf16 %v3808_v5, %v3808_v5  ;;  %v4824_v15 = vadd.f32 %v12047_v25, %v4823_v12 }
 0x2cc   : > { %7430 = vst.msk [vmem:[%s10464_s27 + $0x7c8] sm:$0xf] %vm6931_vm1, %v9083_v8  ;;  %7172 = vst.msk [vmem:[%s10464_s27 + $0x3c0] sm:$0xf] %vm6931_vm1, %v8825_v9  ;;  %v9084_v16 = vpack.c.bf16 %v4832_v10, %v4832_v10  ;;  %v8826_v17 = vpack.c.bf16 %v3800_v11, %v3800_v11 }
 0x2cd   : > { %7428 = vst.msk [vmem:[%s10464_s27 + $0x7c0] sm:$0xf] %vm6931_vm1, %v9081_v13  ;;  %7175 = vst.msk [vmem:[%s10464_s27 + $0x3cc] sm:$0xf] %vm6931_vm1, %v8828_v14  ;;  %v9082_v18 = vpack.c.bf16 %v4824_v15, %v4824_v15 }
 0x2ce   : > { %7431 = vst.msk [vmem:[%s10464_s27 + $0x7cc] sm:$0xf] %vm6931_vm1, %v9084_v16  ;;  %7173 = vst.msk [vmem:[%s10464_s27 + $0x3c4] sm:$0xf] %vm6931_vm1, %v8826_v17  ;;  %v9602_v20 = vpop.f32.mrb[244].mxu0 }
 0x2cf   : > { %7429 = vst.msk [vmem:[%s10464_s27 + $0x7c4] sm:$0xf] %vm6931_vm1, %v9082_v18  ;;  %v3821_v21 = vadd.f32 %v12047_v25, %v9602_v20  ;;  %v9858_v22 = vpop.f32.mrb[244].mxu1  ;;  %v3812_v23 = vpop.f32.mrb[245].mxu0 }
 0x2d0   : > { %v4845_v24 = vadd.f32 %v12047_v25, %v9858_v22  ;;  %v3813_v38 = vadd.f32 %v12047_v25, %v3812_v23  ;;  %v4836_v26 = vpop.f32.mrb[245].mxu1  ;;  %v9603_v27 = vpop.f32.mrb[246].mxu0 }
 0x2d1   : > { %v8831_v28 = vpack.c.bf16 %v3821_v21, %v3821_v21  ;;  %v4837_v29 = vadd.f32 %v12047_v25, %v4836_v26  ;;  %v3824_v30 = vadd.f32 %v12047_v25, %v9603_v27  ;;  %v9859_v19 = vpop.f32.mrb[246].mxu1  ;;  %v3815_v31 = vpop.f32.mrb[247].mxu0 }
 0x2d2   : > { %v9087_v32 = vpack.c.bf16 %v4845_v24, %v4845_v24  ;;  %v8829_v33 = vpack.c.bf16 %v3813_v38, %v3813_v38  ;;  %v4848_v34 = vadd.f32 %v12047_v25, %v9859_v19  ;;  %v3816_v35 = vadd.f32 %v12047_v25, %v3815_v31  ;;  %v4839_v36 = vpop.f32.mrb[247].mxu1 }
 0x2d3   : > { %7178 = vst.msk [vmem:[%s10464_s27 + $0x3d8] sm:$0xf] %vm6931_vm1, %v8831_v28  ;;  %v9085_v37 = vpack.c.bf16 %v4837_v29, %v4837_v29  ;;  %v8832_v39 = vpack.c.bf16 %v3824_v30, %v3824_v30  ;;  %v4840_v40 = vadd.f32 %v12047_v25, %v4839_v36 }
 0x2d4   : > { %7434 = vst.msk [vmem:[%s10464_s27 + $0x7d8] sm:$0xf] %vm6931_vm1, %v9087_v32  ;;  %7176 = vst.msk [vmem:[%s10464_s27 + $0x3d0] sm:$0xf] %vm6931_vm1, %v8829_v33  ;;  %v9088_v41 = vpack.c.bf16 %v4848_v34, %v4848_v34  ;;  %v8830_v42 = vpack.c.bf16 %v3816_v35, %v3816_v35 }
 0x2d5   : > { %7432 = vst.msk [vmem:[%s10464_s27 + $0x7d0] sm:$0xf] %vm6931_vm1, %v9085_v37  ;;  %7179 = vst.msk [vmem:[%s10464_s27 + $0x3dc] sm:$0xf] %vm6931_vm1, %v8832_v39  ;;  %v9086_v60 = vpack.c.bf16 %v4840_v40, %v4840_v40 }
 0x2d6   : > { %7435 = vst.msk [vmem:[%s10464_s27 + $0x7dc] sm:$0xf] %vm6931_vm1, %v9088_v41  ;;  %7177 = vst.msk [vmem:[%s10464_s27 + $0x3d4] sm:$0xf] %vm6931_vm1, %v8830_v42  ;;  %v9606_v43 = vpop.f32.mrb[248].mxu0 }
 0x2d7   : > { %7433 = vst.msk [vmem:[%s10464_s27 + $0x7d4] sm:$0xf] %vm6931_vm1, %v9086_v60  ;;  %v3837_v44 = vadd.f32 %v12047_v25, %v9606_v43  ;;  %v9862_v45 = vpop.f32.mrb[248].mxu1  ;;  %v3828_v46 = vpop.f32.mrb[249].mxu0 }
 0x2d8   : > { %v4861_v48 = vadd.f32 %v12047_v25, %v9862_v45  ;;  %v3829_v49 = vadd.f32 %v12047_v25, %v3828_v46  ;;  %v4852_v50 = vpop.f32.mrb[249].mxu1  ;;  %v9607_v51 = vpop.f32.mrb[250].mxu0 }
 0x2d9   : > { %v8835_v52 = vpack.c.bf16 %v3837_v44, %v3837_v44  ;;  %v4853_v53 = vadd.f32 %v12047_v25, %v4852_v50  ;;  %v3840_v54 = vadd.f32 %v12047_v25, %v9607_v51  ;;  %v9863_v55 = vpop.f32.mrb[250].mxu1  ;;  %v3831_v56 = vpop.f32.mrb[251].mxu0 }
 0x2da   : > { %v9091_v57 = vpack.c.bf16 %v4861_v48, %v4861_v48  ;;  %v8833_v58 = vpack.c.bf16 %v3829_v49, %v3829_v49  ;;  %v4864_v59 = vadd.f32 %v12047_v25, %v9863_v55  ;;  %v3832_v61 = vadd.f32 %v12047_v25, %v3831_v56  ;;  %v4855_v62 = vpop.f32.mrb[251].mxu1 }
 0x2db   : > { %7182 = vst.msk [vmem:[%s10464_s27 + $0x3e8] sm:$0xf] %vm6931_vm1, %v8835_v52  ;;  %v9089_v63 = vpack.c.bf16 %v4853_v53, %v4853_v53  ;;  %v8836_v47 = vpack.c.bf16 %v3840_v54, %v3840_v54  ;;  %v4856_v0 = vadd.f32 %v12047_v25, %v4855_v62 }
 0x2dc   : > { %7438 = vst.msk [vmem:[%s10464_s27 + $0x7e8] sm:$0xf] %vm6931_vm1, %v9091_v57  ;;  %7180 = vst.msk [vmem:[%s10464_s27 + $0x3e0] sm:$0xf] %vm6931_vm1, %v8833_v58  ;;  %v9092_v1 = vpack.c.bf16 %v4864_v59, %v4864_v59  ;;  %v8834_v2 = vpack.c.bf16 %v3832_v61, %v3832_v61 }
 0x2dd   : > { %7436 = vst.msk [vmem:[%s10464_s27 + $0x7e0] sm:$0xf] %vm6931_vm1, %v9089_v63  ;;  %7183 = vst.msk [vmem:[%s10464_s27 + $0x3ec] sm:$0xf] %vm6931_vm1, %v8836_v47  ;;  %v9090_v3 = vpack.c.bf16 %v4856_v0, %v4856_v0 }
 0x2de   : > { %7439 = vst.msk [vmem:[%s10464_s27 + $0x7ec] sm:$0xf] %vm6931_vm1, %v9092_v1  ;;  %7181 = vst.msk [vmem:[%s10464_s27 + $0x3e4] sm:$0xf] %vm6931_vm1, %v8834_v2  ;;  %v9610_v4 = vpop.f32.mrb[252].mxu0 }
 0x2df   : > { %7437 = vst.msk [vmem:[%s10464_s27 + $0x7e4] sm:$0xf] %vm6931_vm1, %v9090_v3  ;;  %v3853_v5 = vadd.f32 %v12047_v25, %v9610_v4  ;;  %v9866_v6 = vpop.f32.mrb[252].mxu1  ;;  %v3844_v7 = vpop.f32.mrb[253].mxu0 }
 0x2e0   : > { %v4877_v8 = vadd.f32 %v12047_v25, %v9866_v6  ;;  %v3845_v9 = vadd.f32 %v12047_v25, %v3844_v7  ;;  %v4868_v10 = vpop.f32.mrb[253].mxu1  ;;  %v9611_v11 = vpop.f32.mrb[254].mxu0 }
 0x2e1   : > { %v8839_v12 = vpack.c.bf16 %v3853_v5, %v3853_v5  ;;  %v4869_v13 = vadd.f32 %v12047_v25, %v4868_v10  ;;  %v3856_v14 = vadd.f32 %v12047_v25, %v9611_v11  ;;  %v9867_v15 = vpop.f32.mrb[254].mxu1  ;;  %v3847_v16 = vpop.f32.mrb[255].mxu0 }
 0x2e2   : > { %v9095_v17 = vpack.c.bf16 %v4877_v8, %v4877_v8  ;;  %v8837_v18 = vpack.c.bf16 %v3845_v9, %v3845_v9  ;;  %v4880_v20 = vadd.f32 %v12047_v25, %v9867_v15  ;;  %v3848_v21 = vadd.f32 %v12047_v25, %v3847_v16  ;;  %v4871_v22 = vpop.f32.mrb[255].mxu1 }
 0x2e3   : > { %7186 = vst.msk [vmem:[%s10464_s27 + $0x3f8] sm:$0xf] %vm6931_vm1, %v8839_v12  ;;  %v9093_v23 = vpack.c.bf16 %v4869_v13, %v4869_v13  ;;  %v8840_v24 = vpack.c.bf16 %v3856_v14, %v3856_v14  ;;  %v4872_v38 = vadd.f32 %v12047_v25, %v4871_v22 }
 0x2e4   : > { %7442 = vst.msk [vmem:[%s10464_s27 + $0x7f8] sm:$0xf] %vm6931_vm1, %v9095_v17  ;;  %7184 = vst.msk [vmem:[%s10464_s27 + $0x3f0] sm:$0xf] %vm6931_vm1, %v8837_v18  ;;  %v9096_v26 = vpack.c.bf16 %v4880_v20, %v4880_v20  ;;  %v8838_v27 = vpack.c.bf16 %v3848_v21, %v3848_v21 }
 0x2e5   : > { %7440 = vst.msk [vmem:[%s10464_s27 + $0x7f0] sm:$0xf] %vm6931_vm1, %v9093_v23  ;;  %7187 = vst.msk [vmem:[%s10464_s27 + $0x3fc] sm:$0xf] %vm6931_vm1, %v8840_v24  ;;  %v9094_v28 = vpack.c.bf16 %v4872_v38, %v4872_v38 }
 0x2e6   : > { %7443 = vst.msk [vmem:[%s10464_s27 + $0x7fc] sm:$0xf] %vm6931_vm1, %v9096_v26  ;;  %7185 = vst.msk [vmem:[%s10464_s27 + $0x3f4] sm:$0xf] %vm6931_vm1, %v8838_v27 }
 0x2e7   : > { %7441 = vst.msk [vmem:[%s10464_s27 + $0x7f4] sm:$0xf] %vm6931_vm1, %v9094_v28 }
 0x2e8 PF: > { %s13_s14 = sadd.s32 1, %s10177_s14   ;;  %s12323_s12 = smov %s10173_s13 }
 0x2e9   : > { %p10_p5 = scmp.ge.s32.totalorder %s13_s14, 6   ;;  %s12324_s13 = smov %s12326_s15 }
 0x2eb   :  { %12 = sbr.rel (!%p10_p5) target bundleno = 2 (0x2), region = 68 }

</bundles_post_ra>
